<compile_context>
chip_gen: v7x
topology: tpu7x:2x2x1
jax: 0.10.0
libtpu: 0.0.40
codegen_flags: <defaults>
</compile_context>

<pallas_src>
import functools

import numpy as np
import jax
import jax.numpy as jnp
from jax.experimental import pallas as pl
from jax.experimental.pallas import tpu as pltpu


# fp32 MXU contract precision (correctness note from review: do not rely on default demotion).
_DOT_KW = dict(preferred_element_type=jnp.float32, precision=jax.lax.Precision.HIGHEST)


def _cmatmul(ar, ai, br, bi):
    """Complex matmul (ar + i*ai) @ (br + i*bi) on the MXU with f32 accumulation."""
    rr = jnp.dot(ar, br, **_DOT_KW) - jnp.dot(ai, bi, **_DOT_KW)
    ri = jnp.dot(ar, bi, **_DOT_KW) + jnp.dot(ai, br, **_DOT_KW)
    return rr, ri


def _coilwise_transpose(x2d, n, a, b):
    """(n*a, b) with per-coil (a, b) tiles stacked along rows -> (n*b, a), each tile transposed.

    Implemented with 2D transposes + a sublane-axis concatenate (cheap XLU / layout ops) so the
    lowering stays simple; it sits between the two passes of each batched 2D (I)FFT.
    """
    x3 = x2d.reshape(n, a, b)
    return jnp.concatenate([x3[i].T for i in range(n)], axis=0)


def datavs_kernel(scal_ref,                     # SMEM (2,)  : [alpha, beta]
                  xr_ref, xi_ref,               # (1, M, H, W)     image (real/imag)
                  sr_ref, si_ref,               # (1, C, M, H, W)  coil sensitivity maps
                  ytr_ref, yti_ref,             # (1, C, W, H)     measured k-space, TRANSPOSED
                  mt_ref,                       # (1, W, H)        sampling mask,   TRANSPOSED
                  fhr_ref, fhi_ref,             # (H, H) ortho DFT matrix (row axis, symmetric)
                  fwr_ref, fwi_ref,             # (W, W) ortho DFT matrix (col axis, symmetric)
                  or_ref, oi_ref):              # outputs (1, M, H, W)
    C = sr_ref.shape[1]
    M = sr_ref.shape[2]
    H = xr_ref.shape[2]
    W = xr_ref.shape[3]

    alpha = scal_ref[0]
    beta = scal_ref[1]

    fhr = fhr_ref[...]
    fhi = fhi_ref[...]
    fwr = fwr_ref[...]
    fwi = fwi_ref[...]
    # Conjugated DFT matrices for the adjoint pass: negated ONCE per grid step (hoisted).
    nfhi = -fhi
    nfwi = -fwi

    xr = xr_ref[0]                              # (M, H, W)
    xi = xi_ref[0]
    sr = sr_ref[0]                              # (C, M, H, W)
    si = si_ref[0]

    # ---- forward soft-SENSE with FFT linearity: coil image z_c = sum_m x_m * smaps_{c,m}
    zr = sr[:, 0] * xr[0] - si[:, 0] * xi[0]    # (C, H, W)
    zi = si[:, 0] * xr[0] + sr[:, 0] * xi[0]
    for m in range(1, M):
        zr = zr + sr[:, m] * xr[m] - si[:, m] * xi[m]
        zi = zi + si[:, m] * xr[m] + sr[:, m] * xi[m]

    # ---- ONE batched FFT2 per coil:  A_c = F_H @ z_c @ F_W    (both matmuls span all coils)
    pr, pi = _cmatmul(zr.reshape(C * H, W), zi.reshape(C * H, W), fwr, fwi)   # column pass
    ptr = _coilwise_transpose(pr, C, H, W)                                    # (C*W, H)
    pti = _coilwise_transpose(pi, C, H, W)
    atr, ati = _cmatmul(ptr, pti, fhr, fhi)                                   # row pass: A_c^T

    # ---- data consistency (transposed k-space layout): kdc = A + w * (y - A), w = mask*(1-alpha)
    wt = (1.0 - alpha) * mt_ref[0]              # (W, H), hoisted / fused weight
    at3r = atr.reshape(C, W, H)
    at3i = ati.reshape(C, W, H)
    kr = at3r + wt[None] * (ytr_ref[0] - at3r)
    ki = at3i + wt[None] * (yti_ref[0] - at3i)

    # ---- batched IFFT2 per coil:  X_c = conj(F_H) @ kdc_c @ conj(F_W)
    qtr, qti = _cmatmul(kr.reshape(C * W, H), ki.reshape(C * W, H), fhr, nfhi)
    qr = _coilwise_transpose(qtr, C, W, H)      # (C*H, W)
    qi = _coilwise_transpose(qti, C, W, H)
    ir_, ii_ = _cmatmul(qr, qi, fwr, nfwi)
    ir_ = ir_.reshape(C, H, W)
    ii_ = ii_.reshape(C, H, W)

    # ---- adjoint coil combine (image * conj(smaps), summed over coils) + weighted averaging
    one_m_beta = 1.0 - beta
    for m in range(M):
        smr = sr[:, m]                          # (C, H, W)
        smi = si[:, m]
        xdc_r = jnp.sum(ir_ * smr + ii_ * smi, axis=0)   # (H, W)
        xdc_i = jnp.sum(ii_ * smr - ir_ * smi, axis=0)
        # Note: for production W that is a multiple of 128 these stores are lane-dense;
        # at the toy W=16 they are masked stores, which is acceptable here.
        or_ref[0, m] = beta * xr[m] + one_m_beta * xdc_r
        oi_ref[0, m] = beta * xi[m] + one_m_beta * xdc_i


def _dft_matrix(n):
    """Ortho-normalized (symmetric) DFT matrix, split into real/imag float32 parts."""
    k = np.arange(n, dtype=np.float64)
    ang = -2.0 * np.pi * np.outer(k, k) / n
    scale = 1.0 / np.sqrt(float(n))
    return (jnp.asarray(np.cos(ang) * scale, dtype=jnp.float32),
            jnp.asarray(np.sin(ang) * scale, dtype=jnp.float32))


def data_vs_layer(x_re, x_im, y_re, y_im, s_re, s_im, mask, alpha, beta):
    """Pallas DataVSLayer forward. All inputs float32 (real/imag split).

    x:     (B, M, H, W)      image per sense map
    y:     (B, C, H, W)      measured k-space per coil
    smaps: (B, C, M, H, W)   coil sensitivity maps
    mask:  (B, H, W)         sampling mask (broadcast over coils)
    """
    B, M, H, W = x_re.shape
    _, C, _, _, _ = s_re.shape

    fhr, fhi = _dft_matrix(H)
    fwr, fwi = _dft_matrix(W)
    scalars = jnp.array([alpha, beta], dtype=jnp.float32)

    # Layout plumbing (done by XLA outside the kernel, free): the kernel evaluates the DC step and
    # the FFT row pass in a per-coil transposed (W, H) layout, so hand it y and mask pre-transposed.
    yt_re = jnp.swapaxes(y_re, -1, -2)          # (B, C, W, H)
    yt_im = jnp.swapaxes(y_im, -1, -2)
    mask_t = jnp.swapaxes(mask, -1, -2)         # (B, W, H)

    # Advisory cost estimate: 4 complex (= 16 real) matmuls per batch element + elementwise work.
    matmul_flops = 2 * 8 * B * C * (H * H * W + H * W * W)
    ew_flops = B * H * W * (24 * C * M + 6 * C + 8 * M)
    bytes_accessed = 4 * (B * H * W * (4 * M + 2 * C * M + 2 * C + 1) + 2 * (H * H + W * W))
    cost = pl.CostEstimate(flops=matmul_flops + ew_flops, transcendentals=0,
                           bytes_accessed=bytes_accessed)

    full2d = lambda b: (0, 0)
    out_re, out_im = pl.pallas_call(
        datavs_kernel,
        out_shape=(jax.ShapeDtypeStruct((B, M, H, W), jnp.float32),
                   jax.ShapeDtypeStruct((B, M, H, W), jnp.float32)),
        grid=(B,),
        in_specs=[
            pl.BlockSpec(memory_space=pltpu.SMEM),                          # [alpha, beta]
            pl.BlockSpec((1, M, H, W), lambda b: (b, 0, 0, 0)),             # x_re
            pl.BlockSpec((1, M, H, W), lambda b: (b, 0, 0, 0)),             # x_im
            pl.BlockSpec((1, C, M, H, W), lambda b: (b, 0, 0, 0, 0)),       # s_re
            pl.BlockSpec((1, C, M, H, W), lambda b: (b, 0, 0, 0, 0)),       # s_im
            pl.BlockSpec((1, C, W, H), lambda b: (b, 0, 0, 0)),             # y_re^T
            pl.BlockSpec((1, C, W, H), lambda b: (b, 0, 0, 0)),             # y_im^T
            pl.BlockSpec((1, W, H), lambda b: (b, 0, 0)),                   # mask^T
            pl.BlockSpec((H, H), full2d),                                   # fh_re
            pl.BlockSpec((H, H), full2d),                                   # fh_im
            pl.BlockSpec((W, W), full2d),                                   # fw_re
            pl.BlockSpec((W, W), full2d),                                   # fw_im
        ],
        out_specs=(pl.BlockSpec((1, M, H, W), lambda b: (b, 0, 0, 0)),
                   pl.BlockSpec((1, M, H, W), lambda b: (b, 0, 0, 0))),
        compiler_params=pltpu.CompilerParams(
            dimension_semantics=("parallel",),          # batch elements are independent (megacore)
            vmem_limit_bytes=48 * 1024 * 1024),         # headroom for larger H/W/C configurations
        cost_estimate=cost,
    )(scalars, x_re, x_im, s_re, s_im, yt_re, yt_im, mask_t, fhr, fhi, fwr, fwi)
    return out_re, out_im


def reference_forward(x, y, smaps, mask, alpha, beta):
    """Pure-JAX (complex) reference matching the PyTorch DataVSLayer forward."""
    Ax = jnp.sum(jnp.fft.fft2(x[:, None] * smaps, norm="ortho"), axis=2)          # [B,C,H,W]
    m = mask[:, None]
    kdc = (1.0 - m) * Ax + m * (alpha * Ax + (1.0 - alpha) * y)
    xdc = jnp.sum(jnp.fft.ifft2(kdc, norm="ortho")[:, :, None] * jnp.conj(smaps), axis=1)
    return beta * x + (1.0 - beta) * xdc


if __name__ == "__main__":
    key = jax.random.PRNGKey(0)
    B, C, M, H, W = 2, 4, 2, 16, 16     # batch, coils, sense maps, spatial
    alpha_init, beta_init = 0.1, 0.1    # DataVSLayer(alpha_init, beta_init)

    ks = jax.random.split(key, 7)
    x_re = jax.random.normal(ks[0], (B, M, H, W), jnp.float32)
    x_im = jax.random.normal(ks[1], (B, M, H, W), jnp.float32)
    s_re = jax.random.normal(ks[2], (B, C, M, H, W), jnp.float32)
    s_im = jax.random.normal(ks[3], (B, C, M, H, W), jnp.float32)
    y_re = jax.random.normal(ks[4], (B, C, H, W), jnp.float32)
    y_im = jax.random.normal(ks[5], (B, C, H, W), jnp.float32)
    mask = (jax.random.uniform(ks[6], (B, H, W)) > 0.5).astype(jnp.float32)

    out_re, out_im = data_vs_layer(x_re, x_im, y_re, y_im, s_re, s_im, mask,
                                   alpha_init, beta_init)
    jax.block_until_ready(out_re)
    jax.block_until_ready(out_im)

    # Numerical check against the complex pure-JAX reference.
    x_c = x_re + 1j * x_im
    y_c = y_re + 1j * y_im
    s_c = s_re + 1j * s_im
    ref = reference_forward(x_c, y_c, s_c, mask, alpha_init, beta_init)
    assert jnp.allclose(out_re, jnp.real(ref), atol=1e-4, rtol=1e-4)
    assert jnp.allclose(out_im, jnp.imag(ref), atol=1e-4, rtol=1e-4)

    print("KERNEL_OK")
</pallas_src>

<mosaic_0001>
module attributes {stable_mosaic.version = 11 : i64} {
  func.func @datavs_kernel(%arg0: i32, %arg1: memref<2xf32, #tpu.memory_space<smem>>, %arg2: memref<1x2x16x16xf32, #tpu.memory_space<vmem>>, %arg3: memref<1x2x16x16xf32, #tpu.memory_space<vmem>>, %arg4: memref<1x4x2x16x16xf32, #tpu.memory_space<vmem>>, %arg5: memref<1x4x2x16x16xf32, #tpu.memory_space<vmem>>, %arg6: memref<1x4x16x16xf32, #tpu.memory_space<vmem>>, %arg7: memref<1x4x16x16xf32, #tpu.memory_space<vmem>>, %arg8: memref<1x16x16xf32, #tpu.memory_space<vmem>>, %arg9: memref<16x16xf32, #tpu.memory_space<vmem>>, %arg10: memref<16x16xf32, #tpu.memory_space<vmem>>, %arg11: memref<16x16xf32, #tpu.memory_space<vmem>>, %arg12: memref<16x16xf32, #tpu.memory_space<vmem>>, %arg13: memref<1x2x16x16xf32, #tpu.memory_space<vmem>>, %arg14: memref<1x2x16x16xf32, #tpu.memory_space<vmem>>) attributes {dimension_semantics = [#tpu.dimension_semantics<parallel>], iteration_bounds = array<i64: 2>, scalar_prefetch = 0 : i64, scratch_operands = 0 : i64, tpu.core_type = #tpu.core_type<tc>, window_params = [{transform_indices = @transform_0, window_bounds = array<i64: 2>}, {transform_indices = @transform_1, window_bounds = array<i64: 1, 2, 16, 16>}, {transform_indices = @transform_2, window_bounds = array<i64: 1, 2, 16, 16>}, {transform_indices = @transform_3, window_bounds = array<i64: 1, 4, 2, 16, 16>}, {transform_indices = @transform_4, window_bounds = array<i64: 1, 4, 2, 16, 16>}, {transform_indices = @transform_5, window_bounds = array<i64: 1, 4, 16, 16>}, {transform_indices = @transform_6, window_bounds = array<i64: 1, 4, 16, 16>}, {transform_indices = @transform_7, window_bounds = array<i64: 1, 16, 16>}, {pipeline_mode = #tpu.pipeline_mode<synchronous>, transform_indices = @transform_8, window_bounds = array<i64: 16, 16>}, {pipeline_mode = #tpu.pipeline_mode<synchronous>, transform_indices = @transform_9, window_bounds = array<i64: 16, 16>}, {pipeline_mode = #tpu.pipeline_mode<synchronous>, transform_indices = @transform_10, window_bounds = array<i64: 16, 16>}, {pipeline_mode = #tpu.pipeline_mode<synchronous>, transform_indices = @transform_11, window_bounds = array<i64: 16, 16>}, {transform_indices = @transform_12, window_bounds = array<i64: 1, 2, 16, 16>}, {transform_indices = @transform_13, window_bounds = array<i64: 1, 2, 16, 16>}]} {
    %c0 = arith.constant 0 : index
    %0 = memref.load %arg1[%c0] : memref<2xf32, #tpu.memory_space<smem>>
    %c1 = arith.constant 1 : index
    %1 = memref.load %arg1[%c1] : memref<2xf32, #tpu.memory_space<smem>>
    %c0_0 = arith.constant 0 : index
    %c0_1 = arith.constant 0 : index
    %2 = vector.load %arg9[%c0_0, %c0_1] : memref<16x16xf32, #tpu.memory_space<vmem>>, vector<16x16xf32>
    %c0_2 = arith.constant 0 : index
    %c0_3 = arith.constant 0 : index
    %3 = vector.load %arg10[%c0_2, %c0_3] : memref<16x16xf32, #tpu.memory_space<vmem>>, vector<16x16xf32>
    %c0_4 = arith.constant 0 : index
    %c0_5 = arith.constant 0 : index
    %4 = vector.load %arg11[%c0_4, %c0_5] : memref<16x16xf32, #tpu.memory_space<vmem>>, vector<16x16xf32>
    %c0_6 = arith.constant 0 : index
    %c0_7 = arith.constant 0 : index
    %5 = vector.load %arg12[%c0_6, %c0_7] : memref<16x16xf32, #tpu.memory_space<vmem>>, vector<16x16xf32>
    %cst = arith.constant 0.000000e+00 : f32
    %6 = vector.broadcast %cst : f32 to vector<16x16xf32>
    %7 = arith.subf %6, %3 : vector<16x16xf32>
    %cst_8 = arith.constant 0.000000e+00 : f32
    %8 = vector.broadcast %cst_8 : f32 to vector<16x16xf32>
    %9 = arith.subf %8, %5 : vector<16x16xf32>
    %c0_9 = arith.constant 0 : index
    %c0_10 = arith.constant 0 : index
    %c0_11 = arith.constant 0 : index
    %c0_12 = arith.constant 0 : index
    %10 = vector.load %arg2[%c0_9, %c0_10, %c0_11, %c0_12] : memref<1x2x16x16xf32, #tpu.memory_space<vmem>>, vector<1x2x16x16xf32>
    %11 = vector.shape_cast %10 : vector<1x2x16x16xf32> to vector<2x16x16xf32>
    %c0_13 = arith.constant 0 : index
    %c0_14 = arith.constant 0 : index
    %c0_15 = arith.constant 0 : index
    %c0_16 = arith.constant 0 : index
    %12 = vector.load %arg3[%c0_13, %c0_14, %c0_15, %c0_16] : memref<1x2x16x16xf32, #tpu.memory_space<vmem>>, vector<1x2x16x16xf32>
    %13 = vector.shape_cast %12 : vector<1x2x16x16xf32> to vector<2x16x16xf32>
    %c0_17 = arith.constant 0 : index
    %c0_18 = arith.constant 0 : index
    %c0_19 = arith.constant 0 : index
    %c0_20 = arith.constant 0 : index
    %c0_21 = arith.constant 0 : index
    %14 = vector.load %arg4[%c0_17, %c0_18, %c0_19, %c0_20, %c0_21] : memref<1x4x2x16x16xf32, #tpu.memory_space<vmem>>, vector<1x4x2x16x16xf32>
    %15 = vector.shape_cast %14 : vector<1x4x2x16x16xf32> to vector<4x2x16x16xf32>
    %c0_22 = arith.constant 0 : index
    %c0_23 = arith.constant 0 : index
    %c0_24 = arith.constant 0 : index
    %c0_25 = arith.constant 0 : index
    %c0_26 = arith.constant 0 : index
    %16 = vector.load %arg5[%c0_22, %c0_23, %c0_24, %c0_25, %c0_26] : memref<1x4x2x16x16xf32, #tpu.memory_space<vmem>>, vector<1x4x2x16x16xf32>
    %17 = vector.shape_cast %16 : vector<1x4x2x16x16xf32> to vector<4x2x16x16xf32>
    %18 = vector.extract_strided_slice %15 {offsets = [0, 0, 0, 0], sizes = [4, 1, 16, 16], strides = [1, 1, 1, 1]} : vector<4x2x16x16xf32> to vector<4x1x16x16xf32>
    %19 = vector.shape_cast %18 : vector<4x1x16x16xf32> to vector<4x16x16xf32>
    %20 = vector.extract_strided_slice %11 {offsets = [0, 0, 0], sizes = [1, 16, 16], strides = [1, 1, 1]} : vector<2x16x16xf32> to vector<1x16x16xf32>
    %21 = vector.shape_cast %20 : vector<1x16x16xf32> to vector<16x16xf32>
    %22 = vector.shape_cast %21 : vector<16x16xf32> to vector<1x16x16xf32>
    %23 = vector.broadcast %22 : vector<1x16x16xf32> to vector<4x16x16xf32>
    %24 = arith.mulf %19, %23 : vector<4x16x16xf32>
    %25 = vector.extract_strided_slice %17 {offsets = [0, 0, 0, 0], sizes = [4, 1, 16, 16], strides = [1, 1, 1, 1]} : vector<4x2x16x16xf32> to vector<4x1x16x16xf32>
    %26 = vector.shape_cast %25 : vector<4x1x16x16xf32> to vector<4x16x16xf32>
    %27 = vector.extract_strided_slice %13 {offsets = [0, 0, 0], sizes = [1, 16, 16], strides = [1, 1, 1]} : vector<2x16x16xf32> to vector<1x16x16xf32>
    %28 = vector.shape_cast %27 : vector<1x16x16xf32> to vector<16x16xf32>
    %29 = vector.shape_cast %28 : vector<16x16xf32> to vector<1x16x16xf32>
    %30 = vector.broadcast %29 : vector<1x16x16xf32> to vector<4x16x16xf32>
    %31 = arith.mulf %26, %30 : vector<4x16x16xf32>
    %32 = arith.subf %24, %31 : vector<4x16x16xf32>
    %33 = vector.extract_strided_slice %17 {offsets = [0, 0, 0, 0], sizes = [4, 1, 16, 16], strides = [1, 1, 1, 1]} : vector<4x2x16x16xf32> to vector<4x1x16x16xf32>
    %34 = vector.shape_cast %33 : vector<4x1x16x16xf32> to vector<4x16x16xf32>
    %35 = vector.extract_strided_slice %11 {offsets = [0, 0, 0], sizes = [1, 16, 16], strides = [1, 1, 1]} : vector<2x16x16xf32> to vector<1x16x16xf32>
    %36 = vector.shape_cast %35 : vector<1x16x16xf32> to vector<16x16xf32>
    %37 = vector.shape_cast %36 : vector<16x16xf32> to vector<1x16x16xf32>
    %38 = vector.broadcast %37 : vector<1x16x16xf32> to vector<4x16x16xf32>
    %39 = arith.mulf %34, %38 : vector<4x16x16xf32>
    %40 = vector.extract_strided_slice %15 {offsets = [0, 0, 0, 0], sizes = [4, 1, 16, 16], strides = [1, 1, 1, 1]} : vector<4x2x16x16xf32> to vector<4x1x16x16xf32>
    %41 = vector.shape_cast %40 : vector<4x1x16x16xf32> to vector<4x16x16xf32>
    %42 = vector.extract_strided_slice %13 {offsets = [0, 0, 0], sizes = [1, 16, 16], strides = [1, 1, 1]} : vector<2x16x16xf32> to vector<1x16x16xf32>
    %43 = vector.shape_cast %42 : vector<1x16x16xf32> to vector<16x16xf32>
    %44 = vector.shape_cast %43 : vector<16x16xf32> to vector<1x16x16xf32>
    %45 = vector.broadcast %44 : vector<1x16x16xf32> to vector<4x16x16xf32>
    %46 = arith.mulf %41, %45 : vector<4x16x16xf32>
    %47 = arith.addf %39, %46 : vector<4x16x16xf32>
    %48 = vector.extract_strided_slice %15 {offsets = [0, 1, 0, 0], sizes = [4, 1, 16, 16], strides = [1, 1, 1, 1]} : vector<4x2x16x16xf32> to vector<4x1x16x16xf32>
    %49 = vector.shape_cast %48 : vector<4x1x16x16xf32> to vector<4x16x16xf32>
    %50 = vector.extract_strided_slice %11 {offsets = [1, 0, 0], sizes = [1, 16, 16], strides = [1, 1, 1]} : vector<2x16x16xf32> to vector<1x16x16xf32>
    %51 = vector.shape_cast %50 : vector<1x16x16xf32> to vector<16x16xf32>
    %52 = vector.shape_cast %51 : vector<16x16xf32> to vector<1x16x16xf32>
    %53 = vector.broadcast %52 : vector<1x16x16xf32> to vector<4x16x16xf32>
    %54 = arith.mulf %49, %53 : vector<4x16x16xf32>
    %55 = arith.addf %32, %54 : vector<4x16x16xf32>
    %56 = vector.extract_strided_slice %17 {offsets = [0, 1, 0, 0], sizes = [4, 1, 16, 16], strides = [1, 1, 1, 1]} : vector<4x2x16x16xf32> to vector<4x1x16x16xf32>
    %57 = vector.shape_cast %56 : vector<4x1x16x16xf32> to vector<4x16x16xf32>
    %58 = vector.extract_strided_slice %13 {offsets = [1, 0, 0], sizes = [1, 16, 16], strides = [1, 1, 1]} : vector<2x16x16xf32> to vector<1x16x16xf32>
    %59 = vector.shape_cast %58 : vector<1x16x16xf32> to vector<16x16xf32>
    %60 = vector.shape_cast %59 : vector<16x16xf32> to vector<1x16x16xf32>
    %61 = vector.broadcast %60 : vector<1x16x16xf32> to vector<4x16x16xf32>
    %62 = arith.mulf %57, %61 : vector<4x16x16xf32>
    %63 = arith.subf %55, %62 : vector<4x16x16xf32>
    %64 = vector.extract_strided_slice %17 {offsets = [0, 1, 0, 0], sizes = [4, 1, 16, 16], strides = [1, 1, 1, 1]} : vector<4x2x16x16xf32> to vector<4x1x16x16xf32>
    %65 = vector.shape_cast %64 : vector<4x1x16x16xf32> to vector<4x16x16xf32>
    %66 = vector.extract_strided_slice %11 {offsets = [1, 0, 0], sizes = [1, 16, 16], strides = [1, 1, 1]} : vector<2x16x16xf32> to vector<1x16x16xf32>
    %67 = vector.shape_cast %66 : vector<1x16x16xf32> to vector<16x16xf32>
    %68 = vector.shape_cast %67 : vector<16x16xf32> to vector<1x16x16xf32>
    %69 = vector.broadcast %68 : vector<1x16x16xf32> to vector<4x16x16xf32>
    %70 = arith.mulf %65, %69 : vector<4x16x16xf32>
    %71 = arith.addf %47, %70 : vector<4x16x16xf32>
    %72 = vector.extract_strided_slice %15 {offsets = [0, 1, 0, 0], sizes = [4, 1, 16, 16], strides = [1, 1, 1, 1]} : vector<4x2x16x16xf32> to vector<4x1x16x16xf32>
    %73 = vector.shape_cast %72 : vector<4x1x16x16xf32> to vector<4x16x16xf32>
    %74 = vector.extract_strided_slice %13 {offsets = [1, 0, 0], sizes = [1, 16, 16], strides = [1, 1, 1]} : vector<2x16x16xf32> to vector<1x16x16xf32>
    %75 = vector.shape_cast %74 : vector<1x16x16xf32> to vector<16x16xf32>
    %76 = vector.shape_cast %75 : vector<16x16xf32> to vector<1x16x16xf32>
    %77 = vector.broadcast %76 : vector<1x16x16xf32> to vector<4x16x16xf32>
    %78 = arith.mulf %73, %77 : vector<4x16x16xf32>
    %79 = arith.addf %71, %78 : vector<4x16x16xf32>
    %80 = vector.shape_cast %63 : vector<4x16x16xf32> to vector<64x16xf32>
    %81 = vector.shape_cast %79 : vector<4x16x16xf32> to vector<64x16xf32>
    %cst_27 = arith.constant dense<0.000000e+00> : vector<64x16xf32>
    %82 = tpu.matmul %80, %4, %cst_27 {dimension_numbers = #tpu.dot_dimension_numbers<[1], [0], [0], [1], [0, 0, 1, 1], [], []>, precision = #tpu.contract_precision<fp32>} : vector<64x16xf32>, vector<16x16xf32>, vector<64x16xf32> -> vector<64x16xf32>
    %cst_28 = arith.constant dense<0.000000e+00> : vector<64x16xf32>
    %83 = tpu.matmul %81, %5, %cst_28 {dimension_numbers = #tpu.dot_dimension_numbers<[1], [0], [0], [1], [0, 0, 1, 1], [], []>, precision = #tpu.contract_precision<fp32>} : vector<64x16xf32>, vector<16x16xf32>, vector<64x16xf32> -> vector<64x16xf32>
    %84 = arith.subf %82, %83 : vector<64x16xf32>
    %cst_29 = arith.constant dense<0.000000e+00> : vector<64x16xf32>
    %85 = tpu.matmul %80, %5, %cst_29 {dimension_numbers = #tpu.dot_dimension_numbers<[1], [0], [0], [1], [0, 0, 1, 1], [], []>, precision = #tpu.contract_precision<fp32>} : vector<64x16xf32>, vector<16x16xf32>, vector<64x16xf32> -> vector<64x16xf32>
    %cst_30 = arith.constant dense<0.000000e+00> : vector<64x16xf32>
    %86 = tpu.matmul %81, %4, %cst_30 {dimension_numbers = #tpu.dot_dimension_numbers<[1], [0], [0], [1], [0, 0, 1, 1], [], []>, precision = #tpu.contract_precision<fp32>} : vector<64x16xf32>, vector<16x16xf32>, vector<64x16xf32> -> vector<64x16xf32>
    %87 = arith.addf %85, %86 : vector<64x16xf32>
    %88 = vector.shape_cast %84 : vector<64x16xf32> to vector<4x16x16xf32>
    %89 = vector.extract_strided_slice %88 {offsets = [0, 0, 0], sizes = [1, 16, 16], strides = [1, 1, 1]} : vector<4x16x16xf32> to vector<1x16x16xf32>
    %90 = vector.shape_cast %89 : vector<1x16x16xf32> to vector<16x16xf32>
    %91 = tpu.transpose %90, [1, 0] : vector<16x16xf32> -> vector<16x16xf32>
    %92 = vector.extract_strided_slice %88 {offsets = [1, 0, 0], sizes = [1, 16, 16], strides = [1, 1, 1]} : vector<4x16x16xf32> to vector<1x16x16xf32>
    %93 = vector.shape_cast %92 : vector<1x16x16xf32> to vector<16x16xf32>
    %94 = tpu.transpose %93, [1, 0] : vector<16x16xf32> -> vector<16x16xf32>
    %95 = vector.extract_strided_slice %88 {offsets = [2, 0, 0], sizes = [1, 16, 16], strides = [1, 1, 1]} : vector<4x16x16xf32> to vector<1x16x16xf32>
    %96 = vector.shape_cast %95 : vector<1x16x16xf32> to vector<16x16xf32>
    %97 = tpu.transpose %96, [1, 0] : vector<16x16xf32> -> vector<16x16xf32>
    %98 = vector.extract_strided_slice %88 {offsets = [3, 0, 0], sizes = [1, 16, 16], strides = [1, 1, 1]} : vector<4x16x16xf32> to vector<1x16x16xf32>
    %99 = vector.shape_cast %98 : vector<1x16x16xf32> to vector<16x16xf32>
    %100 = tpu.transpose %99, [1, 0] : vector<16x16xf32> -> vector<16x16xf32>
    %101 = tpu.concatenate %91, %94, %97, %100 in 0 : vector<16x16xf32>, vector<16x16xf32>, vector<16x16xf32>, vector<16x16xf32> -> vector<64x16xf32>
    %102 = vector.shape_cast %87 : vector<64x16xf32> to vector<4x16x16xf32>
    %103 = vector.extract_strided_slice %102 {offsets = [0, 0, 0], sizes = [1, 16, 16], strides = [1, 1, 1]} : vector<4x16x16xf32> to vector<1x16x16xf32>
    %104 = vector.shape_cast %103 : vector<1x16x16xf32> to vector<16x16xf32>
    %105 = tpu.transpose %104, [1, 0] : vector<16x16xf32> -> vector<16x16xf32>
    %106 = vector.extract_strided_slice %102 {offsets = [1, 0, 0], sizes = [1, 16, 16], strides = [1, 1, 1]} : vector<4x16x16xf32> to vector<1x16x16xf32>
    %107 = vector.shape_cast %106 : vector<1x16x16xf32> to vector<16x16xf32>
    %108 = tpu.transpose %107, [1, 0] : vector<16x16xf32> -> vector<16x16xf32>
    %109 = vector.extract_strided_slice %102 {offsets = [2, 0, 0], sizes = [1, 16, 16], strides = [1, 1, 1]} : vector<4x16x16xf32> to vector<1x16x16xf32>
    %110 = vector.shape_cast %109 : vector<1x16x16xf32> to vector<16x16xf32>
    %111 = tpu.transpose %110, [1, 0] : vector<16x16xf32> -> vector<16x16xf32>
    %112 = vector.extract_strided_slice %102 {offsets = [3, 0, 0], sizes = [1, 16, 16], strides = [1, 1, 1]} : vector<4x16x16xf32> to vector<1x16x16xf32>
    %113 = vector.shape_cast %112 : vector<1x16x16xf32> to vector<16x16xf32>
    %114 = tpu.transpose %113, [1, 0] : vector<16x16xf32> -> vector<16x16xf32>
    %115 = tpu.concatenate %105, %108, %111, %114 in 0 : vector<16x16xf32>, vector<16x16xf32>, vector<16x16xf32>, vector<16x16xf32> -> vector<64x16xf32>
    %cst_31 = arith.constant dense<0.000000e+00> : vector<64x16xf32>
    %116 = tpu.matmul %101, %2, %cst_31 {dimension_numbers = #tpu.dot_dimension_numbers<[1], [0], [0], [1], [0, 0, 1, 1], [], []>, precision = #tpu.contract_precision<fp32>} : vector<64x16xf32>, vector<16x16xf32>, vector<64x16xf32> -> vector<64x16xf32>
    %cst_32 = arith.constant dense<0.000000e+00> : vector<64x16xf32>
    %117 = tpu.matmul %115, %3, %cst_32 {dimension_numbers = #tpu.dot_dimension_numbers<[1], [0], [0], [1], [0, 0, 1, 1], [], []>, precision = #tpu.contract_precision<fp32>} : vector<64x16xf32>, vector<16x16xf32>, vector<64x16xf32> -> vector<64x16xf32>
    %118 = arith.subf %116, %117 : vector<64x16xf32>
    %cst_33 = arith.constant dense<0.000000e+00> : vector<64x16xf32>
    %119 = tpu.matmul %101, %3, %cst_33 {dimension_numbers = #tpu.dot_dimension_numbers<[1], [0], [0], [1], [0, 0, 1, 1], [], []>, precision = #tpu.contract_precision<fp32>} : vector<64x16xf32>, vector<16x16xf32>, vector<64x16xf32> -> vector<64x16xf32>
    %cst_34 = arith.constant dense<0.000000e+00> : vector<64x16xf32>
    %120 = tpu.matmul %115, %2, %cst_34 {dimension_numbers = #tpu.dot_dimension_numbers<[1], [0], [0], [1], [0, 0, 1, 1], [], []>, precision = #tpu.contract_precision<fp32>} : vector<64x16xf32>, vector<16x16xf32>, vector<64x16xf32> -> vector<64x16xf32>
    %121 = arith.addf %119, %120 : vector<64x16xf32>
    %cst_35 = arith.constant 1.000000e+00 : f32
    %122 = arith.subf %cst_35, %0 : f32
    %c0_36 = arith.constant 0 : index
    %c0_37 = arith.constant 0 : index
    %c0_38 = arith.constant 0 : index
    %123 = vector.load %arg8[%c0_36, %c0_37, %c0_38] : memref<1x16x16xf32, #tpu.memory_space<vmem>>, vector<1x16x16xf32>
    %124 = vector.shape_cast %123 : vector<1x16x16xf32> to vector<16x16xf32>
    %125 = vector.broadcast %122 : f32 to vector<16x16xf32>
    %126 = arith.mulf %125, %124 : vector<16x16xf32>
    %127 = vector.shape_cast %118 : vector<64x16xf32> to vector<4x16x16xf32>
    %128 = vector.shape_cast %121 : vector<64x16xf32> to vector<4x16x16xf32>
    %129 = vector.shape_cast %126 : vector<16x16xf32> to vector<1x16x16xf32>
    %c0_39 = arith.constant 0 : index
    %c0_40 = arith.constant 0 : index
    %c0_41 = arith.constant 0 : index
    %c0_42 = arith.constant 0 : index
    %130 = vector.load %arg6[%c0_39, %c0_40, %c0_41, %c0_42] : memref<1x4x16x16xf32, #tpu.memory_space<vmem>>, vector<1x4x16x16xf32>
    %131 = vector.shape_cast %130 : vector<1x4x16x16xf32> to vector<4x16x16xf32>
    %132 = arith.subf %131, %127 : vector<4x16x16xf32>
    %133 = vector.broadcast %129 : vector<1x16x16xf32> to vector<4x16x16xf32>
    %134 = arith.mulf %133, %132 : vector<4x16x16xf32>
    %135 = arith.addf %127, %134 : vector<4x16x16xf32>
    %136 = vector.shape_cast %126 : vector<16x16xf32> to vector<1x16x16xf32>
    %c0_43 = arith.constant 0 : index
    %c0_44 = arith.constant 0 : index
    %c0_45 = arith.constant 0 : index
    %c0_46 = arith.constant 0 : index
    %137 = vector.load %arg7[%c0_43, %c0_44, %c0_45, %c0_46] : memref<1x4x16x16xf32, #tpu.memory_space<vmem>>, vector<1x4x16x16xf32>
    %138 = vector.shape_cast %137 : vector<1x4x16x16xf32> to vector<4x16x16xf32>
    %139 = arith.subf %138, %128 : vector<4x16x16xf32>
    %140 = vector.broadcast %136 : vector<1x16x16xf32> to vector<4x16x16xf32>
    %141 = arith.mulf %140, %139 : vector<4x16x16xf32>
    %142 = arith.addf %128, %141 : vector<4x16x16xf32>
    %143 = vector.shape_cast %135 : vector<4x16x16xf32> to vector<64x16xf32>
    %144 = vector.shape_cast %142 : vector<4x16x16xf32> to vector<64x16xf32>
    %cst_47 = arith.constant dense<0.000000e+00> : vector<64x16xf32>
    %145 = tpu.matmul %143, %2, %cst_47 {dimension_numbers = #tpu.dot_dimension_numbers<[1], [0], [0], [1], [0, 0, 1, 1], [], []>, precision = #tpu.contract_precision<fp32>} : vector<64x16xf32>, vector<16x16xf32>, vector<64x16xf32> -> vector<64x16xf32>
    %cst_48 = arith.constant dense<0.000000e+00> : vector<64x16xf32>
    %146 = tpu.matmul %144, %7, %cst_48 {dimension_numbers = #tpu.dot_dimension_numbers<[1], [0], [0], [1], [0, 0, 1, 1], [], []>, precision = #tpu.contract_precision<fp32>} : vector<64x16xf32>, vector<16x16xf32>, vector<64x16xf32> -> vector<64x16xf32>
    %147 = arith.subf %145, %146 : vector<64x16xf32>
    %cst_49 = arith.constant dense<0.000000e+00> : vector<64x16xf32>
    %148 = tpu.matmul %143, %7, %cst_49 {dimension_numbers = #tpu.dot_dimension_numbers<[1], [0], [0], [1], [0, 0, 1, 1], [], []>, precision = #tpu.contract_precision<fp32>} : vector<64x16xf32>, vector<16x16xf32>, vector<64x16xf32> -> vector<64x16xf32>
    %cst_50 = arith.constant dense<0.000000e+00> : vector<64x16xf32>
    %149 = tpu.matmul %144, %2, %cst_50 {dimension_numbers = #tpu.dot_dimension_numbers<[1], [0], [0], [1], [0, 0, 1, 1], [], []>, precision = #tpu.contract_precision<fp32>} : vector<64x16xf32>, vector<16x16xf32>, vector<64x16xf32> -> vector<64x16xf32>
    %150 = arith.addf %148, %149 : vector<64x16xf32>
    %151 = vector.shape_cast %147 : vector<64x16xf32> to vector<4x16x16xf32>
    %152 = vector.extract_strided_slice %151 {offsets = [0, 0, 0], sizes = [1, 16, 16], strides = [1, 1, 1]} : vector<4x16x16xf32> to vector<1x16x16xf32>
    %153 = vector.shape_cast %152 : vector<1x16x16xf32> to vector<16x16xf32>
    %154 = tpu.transpose %153, [1, 0] : vector<16x16xf32> -> vector<16x16xf32>
    %155 = vector.extract_strided_slice %151 {offsets = [1, 0, 0], sizes = [1, 16, 16], strides = [1, 1, 1]} : vector<4x16x16xf32> to vector<1x16x16xf32>
    %156 = vector.shape_cast %155 : vector<1x16x16xf32> to vector<16x16xf32>
    %157 = tpu.transpose %156, [1, 0] : vector<16x16xf32> -> vector<16x16xf32>
    %158 = vector.extract_strided_slice %151 {offsets = [2, 0, 0], sizes = [1, 16, 16], strides = [1, 1, 1]} : vector<4x16x16xf32> to vector<1x16x16xf32>
    %159 = vector.shape_cast %158 : vector<1x16x16xf32> to vector<16x16xf32>
    %160 = tpu.transpose %159, [1, 0] : vector<16x16xf32> -> vector<16x16xf32>
    %161 = vector.extract_strided_slice %151 {offsets = [3, 0, 0], sizes = [1, 16, 16], strides = [1, 1, 1]} : vector<4x16x16xf32> to vector<1x16x16xf32>
    %162 = vector.shape_cast %161 : vector<1x16x16xf32> to vector<16x16xf32>
    %163 = tpu.transpose %162, [1, 0] : vector<16x16xf32> -> vector<16x16xf32>
    %164 = tpu.concatenate %154, %157, %160, %163 in 0 : vector<16x16xf32>, vector<16x16xf32>, vector<16x16xf32>, vector<16x16xf32> -> vector<64x16xf32>
    %165 = vector.shape_cast %150 : vector<64x16xf32> to vector<4x16x16xf32>
    %166 = vector.extract_strided_slice %165 {offsets = [0, 0, 0], sizes = [1, 16, 16], strides = [1, 1, 1]} : vector<4x16x16xf32> to vector<1x16x16xf32>
    %167 = vector.shape_cast %166 : vector<1x16x16xf32> to vector<16x16xf32>
    %168 = tpu.transpose %167, [1, 0] : vector<16x16xf32> -> vector<16x16xf32>
    %169 = vector.extract_strided_slice %165 {offsets = [1, 0, 0], sizes = [1, 16, 16], strides = [1, 1, 1]} : vector<4x16x16xf32> to vector<1x16x16xf32>
    %170 = vector.shape_cast %169 : vector<1x16x16xf32> to vector<16x16xf32>
    %171 = tpu.transpose %170, [1, 0] : vector<16x16xf32> -> vector<16x16xf32>
    %172 = vector.extract_strided_slice %165 {offsets = [2, 0, 0], sizes = [1, 16, 16], strides = [1, 1, 1]} : vector<4x16x16xf32> to vector<1x16x16xf32>
    %173 = vector.shape_cast %172 : vector<1x16x16xf32> to vector<16x16xf32>
    %174 = tpu.transpose %173, [1, 0] : vector<16x16xf32> -> vector<16x16xf32>
    %175 = vector.extract_strided_slice %165 {offsets = [3, 0, 0], sizes = [1, 16, 16], strides = [1, 1, 1]} : vector<4x16x16xf32> to vector<1x16x16xf32>
    %176 = vector.shape_cast %175 : vector<1x16x16xf32> to vector<16x16xf32>
    %177 = tpu.transpose %176, [1, 0] : vector<16x16xf32> -> vector<16x16xf32>
    %178 = tpu.concatenate %168, %171, %174, %177 in 0 : vector<16x16xf32>, vector<16x16xf32>, vector<16x16xf32>, vector<16x16xf32> -> vector<64x16xf32>
    %cst_51 = arith.constant dense<0.000000e+00> : vector<64x16xf32>
    %179 = tpu.matmul %164, %4, %cst_51 {dimension_numbers = #tpu.dot_dimension_numbers<[1], [0], [0], [1], [0, 0, 1, 1], [], []>, precision = #tpu.contract_precision<fp32>} : vector<64x16xf32>, vector<16x16xf32>, vector<64x16xf32> -> vector<64x16xf32>
    %cst_52 = arith.constant dense<0.000000e+00> : vector<64x16xf32>
    %180 = tpu.matmul %178, %9, %cst_52 {dimension_numbers = #tpu.dot_dimension_numbers<[1], [0], [0], [1], [0, 0, 1, 1], [], []>, precision = #tpu.contract_precision<fp32>} : vector<64x16xf32>, vector<16x16xf32>, vector<64x16xf32> -> vector<64x16xf32>
    %181 = arith.subf %179, %180 : vector<64x16xf32>
    %cst_53 = arith.constant dense<0.000000e+00> : vector<64x16xf32>
    %182 = tpu.matmul %164, %9, %cst_53 {dimension_numbers = #tpu.dot_dimension_numbers<[1], [0], [0], [1], [0, 0, 1, 1], [], []>, precision = #tpu.contract_precision<fp32>} : vector<64x16xf32>, vector<16x16xf32>, vector<64x16xf32> -> vector<64x16xf32>
    %cst_54 = arith.constant dense<0.000000e+00> : vector<64x16xf32>
    %183 = tpu.matmul %178, %4, %cst_54 {dimension_numbers = #tpu.dot_dimension_numbers<[1], [0], [0], [1], [0, 0, 1, 1], [], []>, precision = #tpu.contract_precision<fp32>} : vector<64x16xf32>, vector<16x16xf32>, vector<64x16xf32> -> vector<64x16xf32>
    %184 = arith.addf %182, %183 : vector<64x16xf32>
    %185 = vector.shape_cast %181 : vector<64x16xf32> to vector<4x16x16xf32>
    %186 = vector.shape_cast %184 : vector<64x16xf32> to vector<4x16x16xf32>
    %cst_55 = arith.constant 1.000000e+00 : f32
    %187 = arith.subf %cst_55, %1 : f32
    %188 = vector.extract_strided_slice %15 {offsets = [0, 0, 0, 0], sizes = [4, 1, 16, 16], strides = [1, 1, 1, 1]} : vector<4x2x16x16xf32> to vector<4x1x16x16xf32>
    %189 = vector.shape_cast %188 : vector<4x1x16x16xf32> to vector<4x16x16xf32>
    %190 = vector.extract_strided_slice %17 {offsets = [0, 0, 0, 0], sizes = [4, 1, 16, 16], strides = [1, 1, 1, 1]} : vector<4x2x16x16xf32> to vector<4x1x16x16xf32>
    %191 = vector.shape_cast %190 : vector<4x1x16x16xf32> to vector<4x16x16xf32>
    %192 = arith.mulf %185, %189 : vector<4x16x16xf32>
    %193 = arith.mulf %186, %191 : vector<4x16x16xf32>
    %194 = arith.addf %192, %193 : vector<4x16x16xf32>
    %cst_56 = arith.constant dense<0.000000e+00> : vector<16x16xf32>
    %195 = vector.multi_reduction <add>, %194, %cst_56 [0] : vector<4x16x16xf32> to vector<16x16xf32>
    %196 = arith.mulf %186, %189 : vector<4x16x16xf32>
    %197 = arith.mulf %185, %191 : vector<4x16x16xf32>
    %198 = arith.subf %196, %197 : vector<4x16x16xf32>
    %cst_57 = arith.constant dense<0.000000e+00> : vector<16x16xf32>
    %199 = vector.multi_reduction <add>, %198, %cst_57 [0] : vector<4x16x16xf32> to vector<16x16xf32>
    %200 = vector.extract_strided_slice %11 {offsets = [0, 0, 0], sizes = [1, 16, 16], strides = [1, 1, 1]} : vector<2x16x16xf32> to vector<1x16x16xf32>
    %201 = vector.shape_cast %200 : vector<1x16x16xf32> to vector<16x16xf32>
    %202 = vector.broadcast %1 : f32 to vector<16x16xf32>
    %203 = arith.mulf %202, %201 : vector<16x16xf32>
    %204 = vector.broadcast %187 : f32 to vector<16x16xf32>
    %205 = arith.mulf %204, %195 : vector<16x16xf32>
    %206 = arith.addf %203, %205 : vector<16x16xf32>
    %c0_58 = arith.constant 0 : index
    %c0_59 = arith.constant 0 : index
    %c0_60 = arith.constant 0 : index
    %c0_61 = arith.constant 0 : index
    %207 = vector.load %arg13[%c0_58, %c0_59, %c0_60, %c0_61] : memref<1x2x16x16xf32, #tpu.memory_space<vmem>>, vector<1x1x16x16xf32>
    %208 = vector.shape_cast %207 : vector<1x1x16x16xf32> to vector<16x16xf32>
    %209 = vector.shape_cast %206 : vector<16x16xf32> to vector<1x1x16x16xf32>
    tpu.vector_store %arg13[%c0_58, %c0_59, %c0_60, %c0_61], %209 {strides = array<i32>} : memref<1x2x16x16xf32, #tpu.memory_space<vmem>>, vector<1x1x16x16xf32>,
    %210 = vector.extract_strided_slice %13 {offsets = [0, 0, 0], sizes = [1, 16, 16], strides = [1, 1, 1]} : vector<2x16x16xf32> to vector<1x16x16xf32>
    %211 = vector.shape_cast %210 : vector<1x16x16xf32> to vector<16x16xf32>
    %212 = vector.broadcast %1 : f32 to vector<16x16xf32>
    %213 = arith.mulf %212, %211 : vector<16x16xf32>
    %214 = vector.broadcast %187 : f32 to vector<16x16xf32>
    %215 = arith.mulf %214, %199 : vector<16x16xf32>
    %216 = arith.addf %213, %215 : vector<16x16xf32>
    %c0_62 = arith.constant 0 : index
    %c0_63 = arith.constant 0 : index
    %c0_64 = arith.constant 0 : index
    %c0_65 = arith.constant 0 : index
    %217 = vector.load %arg14[%c0_62, %c0_63, %c0_64, %c0_65] : memref<1x2x16x16xf32, #tpu.memory_space<vmem>>, vector<1x1x16x16xf32>
    %218 = vector.shape_cast %217 : vector<1x1x16x16xf32> to vector<16x16xf32>
    %219 = vector.shape_cast %216 : vector<16x16xf32> to vector<1x1x16x16xf32>
    tpu.vector_store %arg14[%c0_62, %c0_63, %c0_64, %c0_65], %219 {strides = array<i32>} : memref<1x2x16x16xf32, #tpu.memory_space<vmem>>, vector<1x1x16x16xf32>,
    %220 = vector.extract_strided_slice %15 {offsets = [0, 1, 0, 0], sizes = [4, 1, 16, 16], strides = [1, 1, 1, 1]} : vector<4x2x16x16xf32> to vector<4x1x16x16xf32>
    %221 = vector.shape_cast %220 : vector<4x1x16x16xf32> to vector<4x16x16xf32>
    %222 = vector.extract_strided_slice %17 {offsets = [0, 1, 0, 0], sizes = [4, 1, 16, 16], strides = [1, 1, 1, 1]} : vector<4x2x16x16xf32> to vector<4x1x16x16xf32>
    %223 = vector.shape_cast %222 : vector<4x1x16x16xf32> to vector<4x16x16xf32>
    %224 = arith.mulf %185, %221 : vector<4x16x16xf32>
    %225 = arith.mulf %186, %223 : vector<4x16x16xf32>
    %226 = arith.addf %224, %225 : vector<4x16x16xf32>
    %cst_66 = arith.constant dense<0.000000e+00> : vector<16x16xf32>
    %227 = vector.multi_reduction <add>, %226, %cst_66 [0] : vector<4x16x16xf32> to vector<16x16xf32>
    %228 = arith.mulf %186, %221 : vector<4x16x16xf32>
    %229 = arith.mulf %185, %223 : vector<4x16x16xf32>
    %230 = arith.subf %228, %229 : vector<4x16x16xf32>
    %cst_67 = arith.constant dense<0.000000e+00> : vector<16x16xf32>
    %231 = vector.multi_reduction <add>, %230, %cst_67 [0] : vector<4x16x16xf32> to vector<16x16xf32>
    %232 = vector.extract_strided_slice %11 {offsets = [1, 0, 0], sizes = [1, 16, 16], strides = [1, 1, 1]} : vector<2x16x16xf32> to vector<1x16x16xf32>
    %233 = vector.shape_cast %232 : vector<1x16x16xf32> to vector<16x16xf32>
    %234 = vector.broadcast %1 : f32 to vector<16x16xf32>
    %235 = arith.mulf %234, %233 : vector<16x16xf32>
    %236 = vector.broadcast %187 : f32 to vector<16x16xf32>
    %237 = arith.mulf %236, %227 : vector<16x16xf32>
    %238 = arith.addf %235, %237 : vector<16x16xf32>
    %c0_68 = arith.constant 0 : index
    %c1_69 = arith.constant 1 : index
    %c0_70 = arith.constant 0 : index
    %c0_71 = arith.constant 0 : index
    %239 = vector.load %arg13[%c0_68, %c1_69, %c0_70, %c0_71] : memref<1x2x16x16xf32, #tpu.memory_space<vmem>>, vector<1x1x16x16xf32>
    %240 = vector.shape_cast %239 : vector<1x1x16x16xf32> to vector<16x16xf32>
    %241 = vector.shape_cast %238 : vector<16x16xf32> to vector<1x1x16x16xf32>
    tpu.vector_store %arg13[%c0_68, %c1_69, %c0_70, %c0_71], %241 {strides = array<i32>} : memref<1x2x16x16xf32, #tpu.memory_space<vmem>>, vector<1x1x16x16xf32>,
    %242 = vector.extract_strided_slice %13 {offsets = [1, 0, 0], sizes = [1, 16, 16], strides = [1, 1, 1]} : vector<2x16x16xf32> to vector<1x16x16xf32>
    %243 = vector.shape_cast %242 : vector<1x16x16xf32> to vector<16x16xf32>
    %244 = vector.broadcast %1 : f32 to vector<16x16xf32>
    %245 = arith.mulf %244, %243 : vector<16x16xf32>
    %246 = vector.broadcast %187 : f32 to vector<16x16xf32>
    %247 = arith.mulf %246, %231 : vector<16x16xf32>
    %248 = arith.addf %245, %247 : vector<16x16xf32>
    %c0_72 = arith.constant 0 : index
    %c1_73 = arith.constant 1 : index
    %c0_74 = arith.constant 0 : index
    %c0_75 = arith.constant 0 : index
    %249 = vector.load %arg14[%c0_72, %c1_73, %c0_74, %c0_75] : memref<1x2x16x16xf32, #tpu.memory_space<vmem>>, vector<1x1x16x16xf32>
    %250 = vector.shape_cast %249 : vector<1x1x16x16xf32> to vector<16x16xf32>
    %251 = vector.shape_cast %248 : vector<16x16xf32> to vector<1x1x16x16xf32>
    tpu.vector_store %arg14[%c0_72, %c1_73, %c0_74, %c0_75], %251 {strides = array<i32>} : memref<1x2x16x16xf32, #tpu.memory_space<vmem>>, vector<1x1x16x16xf32>,
    return
  }
  func.func @transform_0(%arg0: i32) -> i32 {
    %c0_i32 = arith.constant 0 : i32
    %c0_i32_0 = arith.constant 0 : i32
    return %c0_i32 : i32
  }
  func.func @transform_1(%arg0: i32) -> (i32, i32, i32, i32) {
    %c0_i32 = arith.constant 0 : i32
    %c0_i32_0 = arith.constant 0 : i32
    %c0_i32_1 = arith.constant 0 : i32
    %c0_i32_2 = arith.constant 0 : i32
    return %arg0, %c0_i32, %c0_i32_0, %c0_i32_1 : i32, i32, i32, i32
  }
  func.func @transform_2(%arg0: i32) -> (i32, i32, i32, i32) {
    %c0_i32 = arith.constant 0 : i32
    %c0_i32_0 = arith.constant 0 : i32
    %c0_i32_1 = arith.constant 0 : i32
    %c0_i32_2 = arith.constant 0 : i32
    return %arg0, %c0_i32, %c0_i32_0, %c0_i32_1 : i32, i32, i32, i32
  }
  func.func @transform_3(%arg0: i32) -> (i32, i32, i32, i32, i32) {
    %c0_i32 = arith.constant 0 : i32
    %c0_i32_0 = arith.constant 0 : i32
    %c0_i32_1 = arith.constant 0 : i32
    %c0_i32_2 = arith.constant 0 : i32
    %c0_i32_3 = arith.constant 0 : i32
    return %arg0, %c0_i32, %c0_i32_0, %c0_i32_1, %c0_i32_2 : i32, i32, i32, i32, i32
  }
  func.func @transform_4(%arg0: i32) -> (i32, i32, i32, i32, i32) {
    %c0_i32 = arith.constant 0 : i32
    %c0_i32_0 = arith.constant 0 : i32
    %c0_i32_1 = arith.constant 0 : i32
    %c0_i32_2 = arith.constant 0 : i32
    %c0_i32_3 = arith.constant 0 : i32
    return %arg0, %c0_i32, %c0_i32_0, %c0_i32_1, %c0_i32_2 : i32, i32, i32, i32, i32
  }
  func.func @transform_5(%arg0: i32) -> (i32, i32, i32, i32) {
    %c0_i32 = arith.constant 0 : i32
    %c0_i32_0 = arith.constant 0 : i32
    %c0_i32_1 = arith.constant 0 : i32
    %c0_i32_2 = arith.constant 0 : i32
    return %arg0, %c0_i32, %c0_i32_0, %c0_i32_1 : i32, i32, i32, i32
  }
  func.func @transform_6(%arg0: i32) -> (i32, i32, i32, i32) {
    %c0_i32 = arith.constant 0 : i32
    %c0_i32_0 = arith.constant 0 : i32
    %c0_i32_1 = arith.constant 0 : i32
    %c0_i32_2 = arith.constant 0 : i32
    return %arg0, %c0_i32, %c0_i32_0, %c0_i32_1 : i32, i32, i32, i32
  }
  func.func @transform_7(%arg0: i32) -> (i32, i32, i32) {
    %c0_i32 = arith.constant 0 : i32
    %c0_i32_0 = arith.constant 0 : i32
    %c0_i32_1 = arith.constant 0 : i32
    return %arg0, %c0_i32, %c0_i32_0 : i32, i32, i32
  }
  func.func @transform_8(%arg0: i32) -> (i32, i32) {
    %c0_i32 = arith.constant 0 : i32
    %c0_i32_0 = arith.constant 0 : i32
    %c0_i32_1 = arith.constant 0 : i32
    return %c0_i32, %c0_i32_0 : i32, i32
  }
  func.func @transform_9(%arg0: i32) -> (i32, i32) {
    %c0_i32 = arith.constant 0 : i32
    %c0_i32_0 = arith.constant 0 : i32
    %c0_i32_1 = arith.constant 0 : i32
    return %c0_i32, %c0_i32_0 : i32, i32
  }
  func.func @transform_10(%arg0: i32) -> (i32, i32) {
    %c0_i32 = arith.constant 0 : i32
    %c0_i32_0 = arith.constant 0 : i32
    %c0_i32_1 = arith.constant 0 : i32
    return %c0_i32, %c0_i32_0 : i32, i32
  }
  func.func @transform_11(%arg0: i32) -> (i32, i32) {
    %c0_i32 = arith.constant 0 : i32
    %c0_i32_0 = arith.constant 0 : i32
    %c0_i32_1 = arith.constant 0 : i32
    return %c0_i32, %c0_i32_0 : i32, i32
  }
  func.func @transform_12(%arg0: i32) -> (i32, i32, i32, i32) {
    %c0_i32 = arith.constant 0 : i32
    %c0_i32_0 = arith.constant 0 : i32
    %c0_i32_1 = arith.constant 0 : i32
    %c0_i32_2 = arith.constant 0 : i32
    return %arg0, %c0_i32, %c0_i32_0, %c0_i32_1 : i32, i32, i32, i32
  }
  func.func @transform_13(%arg0: i32) -> (i32, i32, i32, i32) {
    %c0_i32 = arith.constant 0 : i32
    %c0_i32_0 = arith.constant 0 : i32
    %c0_i32_1 = arith.constant 0 : i32
    %c0_i32_2 = arith.constant 0 : i32
    return %arg0, %c0_i32, %c0_i32_0, %c0_i32_1 : i32, i32, i32, i32
  }
}

</mosaic_0001>

<bundles_post_ra>
// kernel: tpu_custom_call.1
= control target key start
LH: loop header
LB: loop body
LE: loop exit
PB: predicated region body
PF: predicated region fallthrough
CT: control target
= control target key end

     0   :  { %s21457_s0 = inlined_call_operand.hbm [shape: f32[2], index: 0, kind: input, shape index: {}]   ;;  %s21458_s1 = inlined_call_operand.hbm [shape: f32[2,2,16,16], index: 1, kind: input, shape index: {}]   ;;  %s21459_s2 = inlined_call_operand.hbm [shape: f32[2,2,16,16], index: 2, kind: input, shape index: {}]   ;;  %s21460_s3 = inlined_call_operand.hbm [shape: f32[2,4,2,16,16], index: 3, kind: input, shape index: {}]   ;;  %s21461_s4 = inlined_call_operand.hbm [shape: f32[2,4,2,16,16], index: 4, kind: input, shape index: {}]   ;;  %s21462_s5 = inlined_call_operand.hbm [shape: f32[2,4,16,16], index: 5, kind: input, shape index: {}]   ;;  %s21463_s6 = inlined_call_operand.hbm [shape: f32[2,4,16,16], index: 6, kind: input, shape index: {}]   ;;  %s21464_s7 = inlined_call_operand.hbm [shape: f32[2,16,16], index: 7, kind: input, shape index: {}]   ;;  %s21465_s8 = inlined_call_operand.vmem [shape: f32[16,16], index: 8, kind: input, shape index: {}]   ;;  %s21466_s9 = inlined_call_operand.vmem [shape: f32[16,16], index: 9, kind: input, shape index: {}]   ;;  %s21467_s10 = inlined_call_operand.hbm [shape: f32[16,16], index: 10, kind: input, shape index: {}]   ;;  %s21468_s11 = inlined_call_operand.hbm [shape: f32[16,16], index: 11, kind: input, shape index: {}]   ;;  %s21469_s12 = inlined_call_operand.hbm [shape: f32[2,2,16,16], index: 12, kind: output, shape index: {0}]   ;;  %s21470_s13 = inlined_call_operand.hbm [shape: f32[2,2,16,16], index: 13, kind: output, shape index: {1}]  }
   0x1   :  { %21576 = sst [smem:[#allocation60_spill]] %s21459_s2 }
   0x2   :  { %21577 = sst [smem:[#allocation61_spill]] %s21461_s4 }
   0x3   :  { %21578 = sst [smem:[#allocation62_spill]] %s21463_s6 }
   0x4   :  { %21579 = sst [smem:[#allocation63_spill]] %s21464_s7 }
   0x5   :  { %21580 = sst [smem:[#allocation64_spill]] %s21465_s8 }
   0x6   :  { %21581 = sst [smem:[#allocation65_spill]] %s21466_s9 }
   0x7   :  { %21582 = sst [smem:[#allocation66_spill]] %s21467_s10 }
   0x8   :  { %21583 = sst [smem:[#allocation67_spill]] %s21469_s12 }
   0x9   :  { %21584 = sst [smem:[#allocation68_spill]] %s21470_s13 }
   0xa   :  { %19 = vsyncpa [#allocation5], 0 }
   0xb   :  { %20 = vsyncpa [#allocation3], 0 }
   0xc   :  { %22 = vsyncpa [#allocation3 + $0x1], 0 }
   0xd   :  { %23 = vsyncpa [#allocation8], 0 }
   0xe   :  { %25 = vsyncpa [#allocation8 + $0x1], 0 }
   0xf   :  { %26 = vsyncpa [#allocation11], 0 }
  0x10   :  { %28 = vsyncpa [#allocation11 + $0x1], 0 }
  0x11   :  { %29 = vsyncpa [#allocation14], 0 }
  0x12   :  { %31 = vsyncpa [#allocation14 + $0x1], 0 }
  0x13   :  { %32 = vsyncpa [#allocation17], 0 }
  0x14   :  { %33 = vsyncpa [#allocation4], 0 }
  0x15   :  { %35 = vsyncpa [#allocation4 + $0x1], 0 }
  0x16   :  { %36 = vsyncpa [#allocation21], 0 }
  0x17   :  { %38 = vsyncpa [#allocation21 + $0x1], 0  ;;  %s18622_s25 = smov 0   ;;  %s18624_s26 = smov 0  }
  0x18   :  { %s18626_s27 = smov 0   ;;  %s18628_s28 = smov 0  }
  0x19 LB: > { %21585 = sst [smem:[#allocation30_spill]] %s18522_s25  ;;  %s18643_s29 = sadd.s32 4294967295, %s18534_s28   ;;  %s18534_s28 = sphi %s18628_s28, %s21759_s28   ;;  %s18530_s27 = sphi %s18626_s27, %s21762_s27   ;;  %s18526_s26 = sphi %s18624_s26, %s21761_s26   ;;  %s18522_s25 = sphi %s18622_s25, %s21760_s25  }
  0x1a   : > { %21586 = sst [smem:[#allocation31_spill]] %s18526_s26  ;;  %s14364_s30 = sadd.s32 4294967294, %s18534_s28  }
  0x1b   : > { %21587 = sst [smem:[#allocation32_spill]] %s18530_s27  ;;  %s18647_s14 = sadd.s32 1, %s18534_s28  }
  0x1c   : > { %21588 = sst [smem:[#allocation33_spill]] %s18643_s29  ;;  %s72_s15 = sadd.s32 1, %s18530_s27 }
  0x1d   : > { %21589 = sst [smem:[#allocation34_spill]] %s18647_s14  ;;  %s69_s16 = ssub.s32 %s18534_s28, %s18647_s14 }
  0x1e   : > { %p79_p0 = scmp.ne.s32.totalorder %s18530_s27, %s18526_s26  ;;  %p70_p1 = scmp.eq.s32.totalorder %s69_s16, 0 }
  0x1f   : > { %p80_p2 = scmp.eq.s32.totalorder %s18534_s28, 0  ;;  %p85_p3 = scmp.ne.s32.totalorder %s18526_s26, %s18522_s25 }
  0x20   : > { %p21478_p4 = scmp.eq.s32.totalorder %s18643_s29, 0  ;;  %p349_p7 = scmp.eq.s32.totalorder %s18643_s29, 1 }
  0x21   : > { %s18659_s17 = scalar_select %p70_p1, %s18530_s27, %s72_s15  }
  0x22   : > { %p18661_p5 = por %p80_p2, %p79_p0  ;;  %p18667_p6 = por %p21478_p4, %p85_p3 }
  0x23   : > { %21590 = sst [smem:[#allocation35_spill]] %s18659_s17  ;;  %p355_p8 = scmp.eq.s32.totalorder %s14364_s30, 1 }
  0x24   : > { %s21591_s18 = scalar_select %p18661_p5, 1, 0 }
  0x25   : > { %s21592_s19 = scalar_select %p18667_p6, 1, 0 }
  0x26   : > { %p14365_p9 = scmp.ge.s32.totalorder %s18534_s28, 1  ;;  %p388_p10 = scmp.lt.s32.totalorder %s18534_s28, 3 }
  0x27   : > { %21593 = sst [smem:[#allocation36_spill]] %s21592_s19  ;;  %p18674_p11 = por %p349_p7, %p79_p0 }
  0x28   : > { %p18678_p12 = por %p355_p8, %p85_p3  ;;  %p18682_p13 = pnand %p14365_p9, %p388_p10 }
  0x29   : > { %s21594_s20 = scalar_select %p18674_p11, 1, 0 }
  0x2a   : > { %s21596_s21 = scalar_select %p18678_p12, 1, 0 }
  0x2b   : > { %21595 = sst [smem:[#allocation37_spill]] %s21594_s20  ;;  %p18008_p1 = pneg %p18682_p13 }
  0x2c   : > { %21597 = sst [smem:[#allocation38_spill]] %s21596_s21  ;;  %s18536_s23 = smov [#allocation16]  }
  0x2d   : > { %s21598_s22 = scalar_select %p18682_p13, 1, 0 }
  0x2e   : > { %s415_s24 = sshll.u32 %s18536_s23, 4  ;;  %p18690_p2 = pnand %p18008_p1, %p21478_p4  ;;  %s416_s24 = int_to_ptr.vmem [resolvable:$true] %s415_s24 }
  0x2f   : > { %21599 = sst [smem:[#allocation39_spill]] %s21598_s22  ;;  %s18697_s15 = sand.u32 1, %s18530_s27  }
  0x30   : > { %s21600_s30 = scalar_select %p18690_p2, 1, 0 }
  0x31   : > { %s21601_s10 = sld [smem:[#allocation66_spill]]  ;;  %p18708_p8 = pneg %p18690_p2 }
  0x33   : > { %s21602_s23 = scalar_select %p18708_p8, 1, 0 }
  0x37   : > { %s18137_s21 = scalar_lea.hbm %s21601_s10, 256 }
  0x38   : > { %p18138_p7 = scmp.ne.s32.totalorder %s21601_s10, %s18137_s21  ;;  %p18144_p1 = scmp.lt.u32.totalorder %s18137_s21, %s21601_s10 }
  0x3a   : > { %p18140_p9 = pnand %p18708_p8, %p18138_p7 }
  0x3c   : > { %p18141_p10 = pneg %p18140_p9 }
  0x3e   : > { %p18146_p0 = pnand %p18144_p1, %p18141_p10 }
  0x40   : > { %18149 = shalt.err (!%p18146_p0)
}
  0x41   : > { %s18150_s14 = scalar_lea.vmem %s416_s24, 256  ;;  %p18158_p11 = scmp.lt.s32.totalorder %s416_s24, %s416_s24 }
  0x42   : > { %p18151_p4 = scmp.ne.s32.totalorder %s416_s24, %s18150_s14  ;;  %p18159_p6 = scmp.lt.s32.totalorder %s18150_s14, %s18150_s14 }
  0x44   : > { %p18153_p3 = pnand %p18151_p4, %p18708_p8  ;;  %p18160_p13 = por %p18159_p6, %p18158_p11 }
  0x46   : > { %p18154_p12 = pneg %p18153_p3 }
  0x48   : > { %p18161_p5 = pnand %p18160_p13, %p18154_p12 }
  0x4a   : > { %18164 = shalt.err (!%p18161_p5)
}
  0x4b   : > { %s21486_s13 = smov 128   ;;  %s21488_s12 = smov 8  }
  0x4c   : > { %18014 = dma.hbm_to_vmem [thread:$0]  (!%p18690_p2), %s21601_s10, 256, %s416_s24, [#allocation17], %s21486_s13, %s21486_s13, %s21488_s12  }
  0x4d   : > { %p21603_p4 = scmp.ne.s32.totalorder %s21591_s18, 0  ;;  %p21604_p5 = scmp.lt.s32.totalorder %s18534_s28, 2 }
  0x4e   : > { %s21490_s21 = sshll.u32 %s18534_s28, 9  ;;  %s18737_s14 = sand.u32 1, %s18534_s28  }
  0x4f   : > { %p18731_p6 = pnand %p21604_p5, %p21603_p4  ;;  %s21606_s2 = sld [smem:[#allocation60_spill]] }
  0x50   : > { %s21607_s8 = sshll.u32 %s18697_s15, 5  ;;  %s21501_s27 = scalar_lea.sflag [#allocation8], %s18737_s14 }
  0x51   : > { %s21605_s17 = scalar_select %p18731_p6, 1, 0 }
  0x52   : > { %s467_s18 = scalar_lea.vmem [#allocation7], %s21607_s8  ;;  %p18756_p12 = pneg %p18731_p6 }
  0x53   : > { %s474_s24 = sshll.u32 %s467_s18, 4  ;;  %s18748_s24 = int_to_ptr.vmem [resolvable:$true] %s474_s24 }
  0x54   : > { %s21608_s12 = scalar_select %p18756_p12, 1, 0 }
  0x55   : > { %s18744_s9 = scalar_lea.hbm %s21606_s2, %s21490_s21  ;;  %s18170_s8 = scalar_lea.hbm %s21606_s2, 1024 }
  0x56   : > { %s18165_s13 = scalar_lea.hbm %s18744_s9, 512  ;;  %p18171_p3 = scmp.lt.u32.totalorder %s18744_s9, %s21606_s2 }
  0x57   : > { %p18166_p11 = scmp.ne.s32.totalorder %s18744_s9, %s18165_s13  ;;  %p18172_p7 = scmp.lt.u32.totalorder %s18170_s8, %s18165_s13 }
  0x58   : > { %p18174_p10 = scmp.lt.u32.totalorder %s18165_s13, %s18744_s9 }
  0x59   : > { %p18168_p13 = pnand %p18756_p12, %p18166_p11  ;;  %p18173_p9 = por %p18172_p7, %p18171_p3 }
  0x5b   : > { %p18169_p0 = pneg %p18168_p13  ;;  %p18175_p1 = por %p18174_p10, %p18173_p9 }
  0x5d   : > { %p18176_p4 = pnand %p18175_p1, %p18169_p0 }
  0x5f   : > { %18179 = shalt.err (!%p18176_p4)
}
  0x60   : > { %s18180_s25 = scalar_lea.vmem %s18748_s24, 512  ;;  %s18539_s20 = smov [#allocation7]  }
  0x61   : > { %p18181_p5 = scmp.ne.s32.totalorder %s18748_s24, %s18180_s25  ;;  %s18185_s16 = sshll.u32 %s18539_s20, 4  ;;  %s18186_s16 = int_to_ptr.vmem [resolvable:$false] %s18185_s16 }
  0x62   : > { %s18187_s21 = scalar_lea.vmem %s18186_s16, 1024  ;;  %p18188_p2 = scmp.lt.s32.totalorder %s18748_s24, %s18186_s16 }
  0x63   : > { %p18183_p11 = pnand %p18181_p5, %p18756_p12  ;;  %p18189_p8 = scmp.lt.s32.totalorder %s18187_s21, %s18180_s25 }
  0x65   : > { %p18184_p13 = pneg %p18183_p11  ;;  %p18190_p3 = por %p18189_p8, %p18188_p2 }
  0x67   : > { %p18191_p7 = pnand %p18190_p3, %p18184_p13 }
  0x69   : > { %18194 = shalt.err (!%p18191_p7)
}
  0x6a   : > { %s21609_s13 = smov 8   ;;  %s21610_s8 = smov 128  }
  0x6b   : > { %18024 = dma.hbm_to_vmem [thread:$0]  (!%p18731_p6), %s18744_s9, 512, %s18748_s24, %s21501_s27, %s21610_s8, %s21610_s8, %s21609_s13  }
  0x6c   : > { %s14419_s25 = sshll.u32 %s18534_s28, 11  ;;  %s21611_s21 = sshll.u32 %s18697_s15, 7 }
  0x6d   : > { %s18788_s16 = scalar_lea.hbm %s21460_s3, %s14419_s25  ;;  %s488_s2 = scalar_lea.vmem [#allocation9], %s21611_s21 }
  0x6e   : > { %s495_s10 = sshll.u32 %s488_s2, 4  ;;  %s21612_s4 = sld [smem:[#allocation61_spill]]  ;;  %s18792_s10 = int_to_ptr.vmem [resolvable:$true] %s495_s10 }
  0x6f   : > { %s21613_s22 = smov %s21611_s21  ;;  %s14382_s18 = sshll.u32 %s18697_s15, 6 }
  0x70   : > { %s509_s9 = scalar_lea.vmem [#allocation10], %s21613_s22  ;;  %s21502_s20 = scalar_lea.sflag [#allocation11], %s18737_s14 }
  0x71   : > { %s516_s24 = sshll.u32 %s509_s9, 4  ;;  %s18802_s24 = int_to_ptr.vmem [resolvable:$true] %s516_s24 }
  0x74   : > { %s18797_s29 = scalar_lea.hbm %s21612_s4, %s14419_s25  ;;  %s18200_s19 = scalar_lea.hbm %s21612_s4, 4096 }
  0x75   : > { %s18195_s21 = scalar_lea.hbm %s18797_s29, 2048  ;;  %p18201_p9 = scmp.lt.u32.totalorder %s18797_s29, %s21612_s4 }
  0x76   : > { %p18196_p2 = scmp.ne.s32.totalorder %s18797_s29, %s18195_s21  ;;  %p18202_p10 = scmp.lt.u32.totalorder %s18200_s19, %s18195_s21 }
  0x77   : > { %p18204_p4 = scmp.lt.u32.totalorder %s18195_s21, %s18797_s29 }
  0x78   : > { %p18198_p8 = pnand %p18196_p2, %p18756_p12  ;;  %p18203_p1 = por %p18202_p10, %p18201_p9 }
  0x7a   : > { %p18199_p0 = pneg %p18198_p8  ;;  %p18205_p5 = por %p18204_p4, %p18203_p1 }
  0x7c   : > { %p18206_p11 = pnand %p18205_p5, %p18199_p0 }
  0x7e   : > { %18209 = shalt.err (!%p18206_p11)
}
  0x7f   : > { %s18210_s22 = scalar_lea.vmem %s18802_s24, 2048  ;;  %s18540_s9 = smov [#allocation10]  }
  0x80   : > { %p18211_p13 = scmp.ne.s32.totalorder %s18802_s24, %s18210_s22  ;;  %s18215_s2 = sshll.u32 %s18540_s9, 4  ;;  %s18216_s2 = int_to_ptr.vmem [resolvable:$false] %s18215_s2 }
  0x81   : > { %s18217_s27 = scalar_lea.vmem %s18216_s2, 4096  ;;  %p18218_p2 = scmp.lt.s32.totalorder %s18802_s24, %s18216_s2 }
  0x82   : > { %p18213_p3 = pnand %p18211_p13, %p18756_p12  ;;  %p18219_p8 = scmp.lt.s32.totalorder %s18217_s27, %s18210_s22 }
  0x84   : > { %p18214_p7 = pneg %p18213_p3  ;;  %p18220_p9 = por %p18219_p8, %p18218_p2 }
  0x86   : > { %p18221_p10 = pnand %p18220_p9, %p18214_p7 }
  0x88   : > { %18224 = shalt.err (!%p18221_p10)
}
  0x89   : > { %18030 = dma.hbm_to_vmem [thread:$0]  (!%p18731_p6), %s18797_s29, 2048, %s18802_s24, %s21502_s20, %s21610_s8, %s21610_s8, %s21609_s13  }
  0x8a   : > { %s14421_s21 = sshll.u32 %s18534_s28, 10  ;;  %s530_s26 = scalar_lea.vmem [#allocation12], %s14382_s18 }
  0x8b   : > { %s537_s19 = sshll.u32 %s530_s26, 4  ;;  %s18837_s9 = scalar_lea.hbm %s21462_s5, %s14421_s21  ;;  %s18839_s19 = int_to_ptr.vmem [resolvable:$true] %s537_s19 }
  0x8c   : > { %21614 = sst [smem:[#allocation40_spill]] %s18839_s19  ;;  %s21615_s6 = sld [smem:[#allocation62_spill]] }
  0x8d   : > { %s551_s29 = scalar_lea.vmem [#allocation13], %s14382_s18  ;;  %s21503_s26 = scalar_lea.sflag [#allocation14], %s18737_s14 }
  0x8e   : > { %s558_s24 = sshll.u32 %s551_s29, 4  ;;  %s18848_s24 = int_to_ptr.vmem [resolvable:$true] %s558_s24 }
  0x92   : > { %s18844_s4 = scalar_lea.hbm %s21615_s6, %s14421_s21  ;;  %s18230_s21 = scalar_lea.hbm %s21615_s6, 2048 }
  0x93   : > { %s18225_s25 = scalar_lea.hbm %s18844_s4, 1024  ;;  %p18231_p5 = scmp.lt.u32.totalorder %s18844_s4, %s21615_s6 }
  0x94   : > { %p18226_p0 = scmp.ne.s32.totalorder %s18844_s4, %s18225_s25  ;;  %p18232_p11 = scmp.lt.u32.totalorder %s18230_s21, %s18225_s25 }
  0x95   : > { %p18234_p3 = scmp.lt.u32.totalorder %s18225_s25, %s18844_s4 }
  0x96   : > { %p18228_p1 = pnand %p18226_p0, %p18756_p12  ;;  %p18233_p13 = por %p18232_p11, %p18231_p5 }
  0x98   : > { %p18229_p4 = pneg %p18228_p1  ;;  %p18235_p7 = por %p18234_p3, %p18233_p13 }
  0x9a   : > { %p18236_p2 = pnand %p18235_p7, %p18229_p4 }
  0x9c   : > { %18239 = shalt.err (!%p18236_p2)
}
  0x9d   : > { %s18240_s18 = scalar_lea.vmem %s18848_s24, 1024  ;;  %s18541_s20 = smov [#allocation13]  }
  0x9e   : > { %p18241_p8 = scmp.ne.s32.totalorder %s18848_s24, %s18240_s18  ;;  %s18245_s29 = sshll.u32 %s18541_s20, 4  ;;  %s18246_s29 = int_to_ptr.vmem [resolvable:$false] %s18245_s29 }
  0x9f   : > { %s18247_s22 = scalar_lea.vmem %s18246_s29, 2048  ;;  %p18248_p0 = scmp.lt.s32.totalorder %s18848_s24, %s18246_s29 }
  0xa0   : > { %p18243_p9 = pnand %p18241_p8, %p18756_p12  ;;  %p18249_p1 = scmp.lt.s32.totalorder %s18247_s22, %s18240_s18 }
  0xa2   : > { %p18244_p10 = pneg %p18243_p9  ;;  %p18250_p5 = por %p18249_p1, %p18248_p0 }
  0xa4   : > { %p18251_p11 = pnand %p18250_p5, %p18244_p10 }
  0xa6   : > { %18254 = shalt.err (!%p18251_p11)
}
  0xa7   : > { %18036 = dma.hbm_to_vmem [thread:$0]  (!%p18731_p6), %s18844_s4, 1024, %s18848_s24, %s21503_s26, %s21610_s8, %s21610_s8, %s21609_s13  }
  0xa8   : > { %s18255_s2 = scalar_lea.hbm %s21457_s0, 16  ;;  %p21616_p13 = scmp.ne.s32.totalorder %s21602_s23, 0 }
  0xa9   : > { %p18256_p4 = scmp.ne.s32.totalorder %s21457_s0, %s18255_s2  ;;  %p18262_p2 = scmp.lt.u32.totalorder %s18255_s2, %s21457_s0 }
  0xab   : > { %p18258_p3 = pnand %p18256_p4, %p21616_p13 }
  0xad   : > { %p18259_p7 = pneg %p18258_p3 }
  0xaf   : > { %p18264_p8 = pnand %p18262_p2, %p18259_p7 }
  0xb1   : > { %18267 = shalt.err (!%p18264_p8)
}
  0xb2   : > { %s18542_s22 = smov [#allocation2]   ;;  %p21617_p9 = scmp.ne.s32.totalorder %s21600_s30, 0 }
  0xb3   : > { %s18543_s25 = smov [#allocation18]   ;;  %s21618_s27 = sshll.u32 %s18534_s28, 9 }
  0xb4   : > { %18011 = dma.hbm_to_smem (!%p21617_p9), %s21457_s0, 16, %s18542_s22, [#allocation5]  }
  0xb5   : > { %s428_s21 = sshll.u32 %s18543_s25, 4  ;;  %s18898_s20 = scalar_lea.hbm %s21458_s1, %s21618_s27  ;;  %s429_s21 = int_to_ptr.vmem [resolvable:$true] %s428_s21 }
  0xb6   : > { %s18268_s6 = scalar_lea.hbm %s21468_s11, 256 }
  0xb7   : > { %p18269_p10 = scmp.ne.s32.totalorder %s21468_s11, %s18268_s6  ;;  %p18275_p5 = scmp.lt.u32.totalorder %s18268_s6, %s21468_s11 }
  0xb9   : > { %p18271_p0 = pnand %p18269_p10, %p21616_p13 }
  0xbb   : > { %p18272_p1 = pneg %p18271_p0 }
  0xbd   : > { %p18277_p11 = pnand %p18275_p5, %p18272_p1 }
  0xbf   : > { %18280 = shalt.err (!%p18277_p11)
}
  0xc0   : > { %s18281_s26 = scalar_lea.vmem %s429_s21, 256  ;;  %p18289_p2 = scmp.lt.s32.totalorder %s429_s21, %s429_s21 }
  0xc1   : > { %p18282_p4 = scmp.ne.s32.totalorder %s429_s21, %s18281_s26  ;;  %p18290_p8 = scmp.lt.s32.totalorder %s18281_s26, %s18281_s26 }
  0xc3   : > { %p18284_p3 = pnand %p18282_p4, %p21616_p13  ;;  %p18291_p6 = por %p18290_p8, %p18289_p2 }
  0xc5   : > { %p18285_p7 = pneg %p18284_p3 }
  0xc7   : > { %p18292_p12 = pnand %p18291_p6, %p18285_p7 }
  0xc9   : > { %18295 = shalt.err (!%p18292_p12)
}
  0xca   : > { %18017 = dma.hbm_to_vmem [thread:$0]  (!%p21617_p9), %s21468_s11, 256, %s429_s21, [#allocation17], %s21610_s8, %s21610_s8, %s21609_s13  }
  0xcb   : > { %s21619_s23 = sshll.u32 %s18697_s15, 5  ;;  %s14388_s25 = sshll.u32 %s18697_s15, 4 }
  0xcc   : > { %s446_s19 = scalar_lea.vmem [#allocation6], %s21619_s23  ;;  %s443_s30 = scalar_lea.sflag [#allocation3], %s18697_s15 }
  0xcd   : > { %s453_s24 = sshll.u32 %s446_s19, 4  ;;  %s18296_s27 = scalar_lea.hbm %s18898_s20, 512  ;;  %s18924_s24 = int_to_ptr.vmem [resolvable:$true] %s453_s24 }
  0xce   : > { %p18297_p6 = scmp.ne.s32.totalorder %s18898_s20, %s18296_s27  ;;  %p21620_p12 = scmp.ne.s32.totalorder %s21608_s12, 0 }
  0xcf   : > { %s18301_s29 = scalar_lea.hbm %s21458_s1, 1024  ;;  %p18302_p9 = scmp.lt.u32.totalorder %s18898_s20, %s21458_s1 }
  0xd0   : > { %p18299_p13 = pnand %p18297_p6, %p21620_p12  ;;  %p18303_p0 = scmp.lt.u32.totalorder %s18301_s29, %s18296_s27 }
  0xd1   : > { %p18305_p5 = scmp.lt.u32.totalorder %s18296_s27, %s18898_s20 }
  0xd2   : > { %p18300_p10 = pneg %p18299_p13  ;;  %p18304_p1 = por %p18303_p0, %p18302_p9 }
  0xd4   : > { %p18306_p11 = por %p18305_p5, %p18304_p1 }
  0xd6   : > { %p18307_p4 = pnand %p18306_p11, %p18300_p10 }
  0xd8   : > { %18310 = shalt.err (!%p18307_p4)
}
  0xd9   : > { %s18311_s21 = scalar_lea.vmem %s18924_s24, 512  ;;  %s18544_s26 = smov [#allocation6]  }
  0xda   : > { %p18312_p3 = scmp.ne.s32.totalorder %s18924_s24, %s18311_s21  ;;  %s18316_s7 = sshll.u32 %s18544_s26, 4  ;;  %s18317_s7 = int_to_ptr.vmem [resolvable:$false] %s18316_s7 }
  0xdb   : > { %s18318_s6 = scalar_lea.vmem %s18317_s7, 1024  ;;  %p18319_p8 = scmp.lt.s32.totalorder %s18924_s24, %s18317_s7 }
  0xdc   : > { %p18314_p7 = pnand %p18312_p3, %p21620_p12  ;;  %p18320_p6 = scmp.lt.s32.totalorder %s18318_s6, %s18311_s21 }
  0xde   : > { %p18315_p2 = pneg %p18314_p7  ;;  %p18321_p13 = por %p18320_p6, %p18319_p8 }
  0xe0   : > { %p18322_p9 = pnand %p18321_p13, %p18315_p2 }
  0xe2   : > { %18325 = shalt.err (!%p18322_p9)
}
  0xe3   : > { %p21621_p10 = scmp.ne.s32.totalorder %s21605_s17, 0  ;;  %s18326_s23 = scalar_lea.hbm %s18788_s16, 2048 }
  0xe4   : > { %p18327_p0 = scmp.ne.s32.totalorder %s18788_s16, %s18326_s23  ;;  %s18331_s18 = scalar_lea.hbm %s21460_s3, 4096 }
  0xe5   : > { %18021 = dma.hbm_to_vmem [thread:$0]  (!%p21621_p10), %s18898_s20, 512, %s18924_s24, %s443_s30, %s21610_s8, %s21610_s8, %s21609_s13  }
  0xe6   : > { %p18329_p1 = pnand %p18327_p0, %p21620_p12  ;;  %p18332_p11 = scmp.lt.u32.totalorder %s18788_s16, %s21460_s3 }
  0xe7   : > { %p18333_p4 = scmp.lt.u32.totalorder %s18331_s18, %s18326_s23  ;;  %p18335_p7 = scmp.lt.u32.totalorder %s18326_s23, %s18788_s16 }
  0xe8   : > { %p18330_p5 = pneg %p18329_p1 }
  0xe9   : > { %p18334_p3 = por %p18333_p4, %p18332_p11 }
  0xeb   : > { %p18336_p2 = por %p18335_p7, %p18334_p3 }
  0xed   : > { %p18337_p8 = pnand %p18336_p2, %p18330_p5 }
  0xef   : > { %18340 = shalt.err (!%p18337_p8)
}
  0xf0   : > { %s18341_s20 = scalar_lea.vmem %s18792_s10, 2048  ;;  %s18545_s24 = smov [#allocation9]  }
  0xf1   : > { %p18342_p6 = scmp.ne.s32.totalorder %s18792_s10, %s18341_s20  ;;  %s18346_s30 = sshll.u32 %s18545_s24, 4  ;;  %s18347_s30 = int_to_ptr.vmem [resolvable:$false] %s18346_s30 }
  0xf2   : > { %s18348_s22 = scalar_lea.vmem %s18347_s30, 4096  ;;  %p18349_p0 = scmp.lt.s32.totalorder %s18792_s10, %s18347_s30 }
  0xf3   : > { %p18344_p13 = pnand %p18342_p6, %p21620_p12  ;;  %p18350_p1 = scmp.lt.s32.totalorder %s18348_s22, %s18341_s20 }
  0xf5   : > { %p18345_p9 = pneg %p18344_p13  ;;  %p18351_p11 = por %p18350_p1, %p18349_p0 }
  0xf7   : > { %p18352_p4 = pnand %p18351_p11, %p18345_p9 }
  0xf9   : > { %18355 = shalt.err (!%p18352_p4)
}
  0xfa   : > { %s21622_s4 = scalar_lea.sflag [#allocation8], %s18737_s14  ;;  %s18356_s21 = scalar_lea.hbm %s18837_s9, 1024 }
  0xfb   : > { %18027 = dma.hbm_to_vmem [thread:$0]  (!%p21621_p10), %s18788_s16, 2048, %s18792_s10, %s21622_s4, %s21610_s8, %s21610_s8, %s21609_s13  }
  0xfc   : > { %p18357_p5 = scmp.ne.s32.totalorder %s18837_s9, %s18356_s21  ;;  %s18361_s6 = scalar_lea.hbm %s21462_s5, 2048 }
  0xfd   : > { %p18362_p2 = scmp.lt.u32.totalorder %s18837_s9, %s21462_s5  ;;  %p18363_p8 = scmp.lt.u32.totalorder %s18361_s6, %s18356_s21 }
  0xfe   : > { %p18359_p3 = pnand %p18357_p5, %p21620_p12  ;;  %p18365_p13 = scmp.lt.u32.totalorder %s18356_s21, %s18837_s9 }
  0xff   : > { %p18364_p6 = por %p18363_p8, %p18362_p2 }
 0x100   : > { %p18360_p7 = pneg %p18359_p3 }
 0x101   : > { %p18366_p9 = por %p18365_p13, %p18364_p6 }
 0x103   : > { %p18367_p0 = pnand %p18366_p9, %p18360_p7 }
 0x105   : > { %18370 = shalt.err (!%p18367_p0)
}
 0x106   : > { %s21623_s10 = sld [smem:[#allocation40_spill]]  ;;  %s18546_s27 = smov [#allocation12]  }
 0x107   : > { %s18376_s18 = sshll.u32 %s18546_s27, 4  ;;  %s18377_s18 = int_to_ptr.vmem [resolvable:$false] %s18376_s18 }
 0x108   : > { %s18378_s2 = scalar_lea.vmem %s18377_s18, 2048 }
 0x10c   : > { %s18371_s16 = scalar_lea.vmem %s21623_s10, 1024  ;;  %p18379_p5 = scmp.lt.s32.totalorder %s21623_s10, %s18377_s18 }
 0x10d   : > { %p18372_p1 = scmp.ne.s32.totalorder %s21623_s10, %s18371_s16  ;;  %p18380_p3 = scmp.lt.s32.totalorder %s18378_s2, %s18371_s16 }
 0x10f   : > { %p18374_p11 = pnand %p18372_p1, %p21620_p12  ;;  %p18381_p2 = por %p18380_p3, %p18379_p5 }
 0x111   : > { %p18375_p4 = pneg %p18374_p11 }
 0x113   : > { %p18382_p8 = pnand %p18381_p2, %p18375_p4 }
 0x115   : > { %18385 = shalt.err (!%p18382_p8)
}
 0x116   : > { %s21624_s29 = scalar_lea.sflag [#allocation11], %s18737_s14  ;;  %s14423_s20 = sshll.u32 %s18534_s28, 8 }
 0x117   : > { %18033 = dma.hbm_to_vmem [thread:$0]  (!%p21621_p10), %s18837_s9, 1024, %s21623_s10, %s21624_s29, %s21610_s8, %s21610_s8, %s21609_s13  }
 0x118   : > { %s572_s24 = scalar_lea.vmem [#allocation15], %s14388_s25  ;;  %s21625_s21 = sld [smem:[#allocation63_spill]] }
 0x119   : > { %s579_s30 = sshll.u32 %s572_s24, 4  ;;  %s19013_s30 = int_to_ptr.vmem [resolvable:$true] %s579_s30 }
 0x11e   : > { %s19011_s26 = scalar_lea.hbm %s21625_s21, %s14423_s20  ;;  %s18391_s25 = scalar_lea.hbm %s21625_s21, 512 }
 0x11f   : > { %s18386_s7 = scalar_lea.hbm %s19011_s26, 256  ;;  %p18392_p9 = scmp.lt.u32.totalorder %s19011_s26, %s21625_s21 }
 0x120   : > { %p18387_p7 = scmp.ne.s32.totalorder %s19011_s26, %s18386_s7  ;;  %p18393_p0 = scmp.lt.u32.totalorder %s18391_s25, %s18386_s7 }
 0x121   : > { %p18395_p11 = scmp.lt.u32.totalorder %s18386_s7, %s19011_s26 }
 0x122   : > { %p18389_p6 = pnand %p18387_p7, %p21620_p12  ;;  %p18394_p1 = por %p18393_p0, %p18392_p9 }
 0x124   : > { %p18390_p13 = pneg %p18389_p6  ;;  %p18396_p4 = por %p18395_p11, %p18394_p1 }
 0x126   : > { %p18397_p5 = pnand %p18396_p4, %p18390_p13 }
 0x128   : > { %18400 = shalt.err (!%p18397_p5)
}
 0x129   : > { %s18401_s19 = scalar_lea.vmem %s19013_s30, 256  ;;  %s18547_s10 = smov [#allocation15]  }
 0x12a   : > { %p18402_p3 = scmp.ne.s32.totalorder %s19013_s30, %s18401_s19  ;;  %s18406_s16 = sshll.u32 %s18547_s10, 4  ;;  %s18407_s16 = int_to_ptr.vmem [resolvable:$false] %s18406_s16 }
 0x12b   : > { %s18408_s27 = scalar_lea.vmem %s18407_s16, 512  ;;  %p18409_p7 = scmp.lt.s32.totalorder %s19013_s30, %s18407_s16 }
 0x12c   : > { %p18404_p2 = pnand %p18402_p3, %p21620_p12  ;;  %p18410_p6 = scmp.lt.s32.totalorder %s18408_s27, %s18401_s19 }
 0x12e   : > { %p18405_p8 = pneg %p18404_p2  ;;  %p18411_p9 = por %p18410_p6, %p18409_p7 }
 0x130   : > { %p18412_p0 = pnand %p18411_p9, %p18405_p8 }
 0x132   : > { %18415 = shalt.err (!%p18412_p0)
}
 0x133   : > { %s21626_s18 = scalar_lea.sflag [#allocation14], %s18737_s14  ;;  %s21627_s12 = sld [smem:[#allocation39_spill]] }
 0x134   : > { %18039 = dma.hbm_to_vmem [thread:$0]  (!%p21621_p10), %s19011_s26, 256, %s19013_s30, %s21626_s18, %s21610_s8, %s21610_s8, %s21609_s13  }
 0x139   : > { %p21628_p12 = scmp.ne.s32.totalorder %s21627_s12, 0 }
 0x13b   : > { %591 = sbr.rel (%p21628_p12) target bundleno = 2404 (0x964), region = 68 }
 0x142   : > { %s21629_s2 = sld [smem:[#allocation33_spill]] }
 0x148   : > { %p21630_p13 = scmp.eq.s32.totalorder %s21629_s2, 0 }
 0x14a   : > { %18489 = dma.done.wait (%p21630_p13), [#allocation5], 16   ;;  %p21631_p1 = pmov %p21630_p13 }
 0x14b   : > { %s21632_s29 = sld [smem:[#allocation31_spill]]  ;;  %s21633_s20 = sld [smem:[#allocation36_spill]] }
 0x14c   : > { %18491 = vsyncadd (%p21631_p1), [#allocation5], 4294967280 }
 0x151   : > { %s19048_s17 = sand.u32 1, %s21632_s29   ;;  %p21634_p10 = scmp.ne.s32.totalorder %s21633_s20, 0 }
 0x152   : > { %s19051_s24 = sshll.u32 %s19048_s17, 5  ;;  %s598_s14 = scalar_lea.sflag [#allocation3], %s19048_s17 }
 0x153   : > { %s19055_s13 = scalar_lea.vmem [#allocation6], %s19051_s24 }
 0x154   : > { %18493 = dma.done.wait (%p21634_p10), %s598_s14, 512  }
 0x155   : > { %18495 = vsyncadd (%p21634_p10), %s598_s14, 4294966784  ;;  %s606_s8 = sand.u32 1, %s21629_s2   ;;  %s19063_s22 = scalar_lea.vmem [#allocation7], %s19051_s24 }
 0x156   : > { %s607_s30 = scalar_lea.sflag [#allocation8], %s606_s8 }
 0x157   : > { %18497 = dma.done.wait (%p21634_p10), %s607_s30, 2560  }
 0x158   : > { %18499 = vsyncadd (%p21634_p10), %s607_s30, 4294964736  ;;  %s14395_s4 = sshll.u32 %s19048_s17, 7  ;;  %s625_s7 = scalar_lea.sflag [#allocation11], %s606_s8 }
 0x159   : > { %s19070_s26 = scalar_lea.vmem [#allocation9], %s14395_s4  ;;  %s19072_s9 = scalar_lea.vmem [#allocation10], %s14395_s4 }
 0x15a   : > { %18501 = dma.done.wait (%p21634_p10), %s625_s7, 3072  }
 0x15b   : > { %18503 = vsyncadd (%p21634_p10), %s625_s7, 4294964224  ;;  %s14397_s15 = sshll.u32 %s19048_s17, 6  ;;  %s643_s6 = scalar_lea.sflag [#allocation14], %s606_s8 }
 0x15c   : > { %s19079_s25 = scalar_lea.vmem [#allocation12], %s14397_s15  ;;  %s19081_s23 = scalar_lea.vmem [#allocation13], %s14397_s15 }
 0x15d   : > { %18505 = dma.done.wait (%p21634_p10), %s643_s6, 1280  }
 0x15e   : > { %18507 = vsyncadd (%p21634_p10), %s643_s6, 4294966016  ;;  %s14399_s19 = sshll.u32 %s19048_s17, 4  ;;  %p21635_p11 = pmov %p21631_p1 }
 0x15f   : > { %s19088_s10 = scalar_lea.vmem [#allocation15], %s14399_s19 }
 0x160   : > { %18509 = dma.done.wait (%p21635_p11), [#allocation17], 512   ;;  %p21636_p4 = pmov %p21631_p1 }
 0x162   : > { %18511 = vsyncadd (%p21636_p4), [#allocation17], 4294966784 }
 0x163   : > { %668 = sfence }
 0x164   : > { %v748_v0 = vld [vmem:[#allocation16] sm:$0xff]  ;;  %v749_v1 = vld [vmem:[#allocation16 + $0x8] sm:$0xff]  ;;  %v19098_v5 = vld [vmem:[%s19055_s13 + $0x10] sm:$0xff]  ;;  %vm908_vm0 = vcmask 130048   ;;  %s21674_s18 = sld [smem:[#allocation64_spill]]  ;;  %s21688_s8 = sld [smem:[#allocation65_spill]] }
 0x165   : > { %v19095_v2 = vld [vmem:[%s19055_s13] sm:$0xff]  ;;  %v934_v3 = vand.u32 4294901760, %v748_v0  ;;  %v937_v4 = vand.u32 4294901760, %v749_v1  ;;  %v19104_v7 = vld [vmem:[%s19063_s22 + $0x10] sm:$0xff]  ;;  %v19116_v16 = vld [vmem:[%s19055_s13 + $0x8] sm:$0xff]  ;;  %s742_s7 = sld [smem:[#allocation2]] }
 0x166   : > { %v19101_v6 = vld [vmem:[%s19063_s22] sm:$0xff]  ;;  %v766_v9 = vld [vmem:[%s19070_s26 + $0x10] sm:$0xff]  ;;  %v19125_v21 = vld [vmem:[%s19055_s13 + $0x18] sm:$0xff]  ;;  %s21332_s19 = scalar_lea.vmem [#allocation20], %s19051_s24  ;;  %s21752_s16 = sld [smem:[#allocation67_spill]] }
 0x167   : > { %v764_v8 = vld [vmem:[%s19070_s26] sm:$0xff]  ;;  %v19109_v11 = vpack.c.bf16 %v937_v4, %v934_v3  ;;  %v782_v12 = vld [vmem:[%s19072_s9 + $0x10] sm:$0xff]  ;;  %v844_v15 = vmul.f32 %v766_v9, %v19098_v5  ;;  %v19119_v18 = vsub.f32 %v748_v0, %v934_v3  ;;  %v19121_v19 = vsub.f32 %v749_v1, %v937_v4  ;;  %v19128_v22 = vld [vmem:[%s19063_s22 + $0x8] sm:$0xff]  ;;  %s21753_s29 = sld [smem:[#allocation68_spill]]  ;;  %s14065_s14 = scalar_lea.sflag [#allocation4], %s19048_s17 }
 0x168   : > { %v780_v10 = vld [vmem:[%s19072_s9] sm:$0xff]  ;;  %v796_v13 = vmul.f32 %v764_v8, %v19095_v2  ;;  %v860_v17 = vmul.f32 %v782_v12, %v19104_v7  ;;  %v765_v23 = vld [vmem:[%s19070_s26 + $0x8] sm:$0xff]  ;;  %v828_v25 = vmul.f32 %v764_v8, %v19101_v6  ;;  %v876_v26 = vmul.f32 %v782_v12, %v19098_v5  ;;  %v19136_v27 = vld [vmem:[%s19063_s22 + $0x18] sm:$0xff]  ;;  %s18548_s4 = smov [#allocation19]  }
 0x169   : > { %21637 = vst [vmem:[#allocation41_spill] sm:$0xff] %v19109_v11  ;;  %v804_v14 = vmul.f32 %v780_v10, %v19101_v6  ;;  %v820_v20 = vmul.f32 %v780_v10, %v19095_v2  ;;  %16923 = vmatprep.subr.bf16.mxu1 %v19109_v11  ;;  %16971 = vmatprep.subr.bf16.mxu0 %v19109_v11  ;;  %v767_v28 = vld [vmem:[%s19070_s26 + $0x18] sm:$0xff]  ;;  %v781_v29 = vld [vmem:[%s19072_s9 + $0x8] sm:$0xff]  ;;  %v21511_v30 = vand.u32 4294901760, %v19119_v18  ;;  %v21510_v31 = vand.u32 4294901760, %v19121_v19  ;;  %v768_v47 = vld [vmem:[%s19070_s26 + $0x20] sm:$0xff] }
 0x16a   : > { %16925 = vmatpush3.bf16.msra.mxu1 %v19109_v11  ;;  %16973 = vmatpush3.bf16.msra.mxu0 %v19109_v11  ;;  %v892_v32 = vmul.f32 %v766_v9, %v19104_v7  ;;  %v797_v33 = vmul.f32 %v765_v23, %v19116_v16  ;;  %v783_v36 = vld [vmem:[%s19072_s9 + $0x18] sm:$0xff]  ;;  %v805_v37 = vmul.f32 %v781_v29, %v19128_v22  ;;  %v784_v48 = vld [vmem:[%s19072_s9 + $0x20] sm:$0xff]  ;;  %v770_v53 = vld [vmem:[%s19070_s26 + $0x30] sm:$0xff] }
 0x16b   : > { %v812_v24 = vsub.f32 %v796_v13, %v804_v14  ;;  %v836_v35 = vadd.f32 %v828_v25, %v820_v20  ;;  %v845_v38 = vmul.f32 %v767_v28, %v19125_v21  ;;  %v1084_v39 = vsub.f32 %v19119_v18, %v21511_v30  ;;  %v786_v1 = vld [vmem:[%s19072_s9 + $0x30] sm:$0xff]  ;;  %v769_v25 = vld [vmem:[%s19070_s26 + $0x28] sm:$0xff]  ;;  %s7357_s15 = ssub.f32 1.0, %s742_s7  ;;  %s18420_s7 = sshll.u32 %s18548_s4, 4  ;;  %s18421_s7 = int_to_ptr.vmem [resolvable:$false] %s18420_s7 }
 0x16c   : > { %v1091_v40 = vsub.f32 %v19121_v19, %v21510_v31  ;;  %v861_v41 = vmul.f32 %v783_v36, %v19136_v27  ;;  %v821_v42 = vmul.f32 %v781_v29, %v19116_v16  ;;  %v813_v45 = vsub.f32 %v797_v33, %v805_v37  ;;  %v776_v31 = vld [vmem:[%s19070_s26 + $0x60] sm:$0xff]  ;;  %v778_v30 = vld [vmem:[%s19070_s26 + $0x70] sm:$0xff] }
 0x16d   : > { %v852_v34 = vadd.f32 %v844_v15, %v812_v24  ;;  %v884_v44 = vadd.f32 %v876_v26, %v836_v35  ;;  %v829_v46 = vmul.f32 %v765_v23, %v19128_v22  ;;  %v1085_v49 = vand.u32 4294901760, %v1084_v39  ;;  %v785_v26 = vld [vmem:[%s19072_s9 + $0x28] sm:$0xff] }
 0x16e   : > { %v1092_v50 = vand.u32 4294901760, %v1091_v40  ;;  %v877_v51 = vmul.f32 %v783_v36, %v19125_v21  ;;  %v893_v52 = vmul.f32 %v767_v28, %v19136_v27  ;;  %v853_v56 = vadd.f32 %v845_v38, %v813_v45  ;;  %v771_v38 = vld [vmem:[%s19070_s26 + $0x38] sm:$0xff] }
 0x16f   : > { %v868_v43 = vsub.f32 %v852_v34, %v860_v17  ;;  %v900_v55 = vadd.f32 %v892_v32, %v884_v44  ;;  %v837_v57 = vadd.f32 %v829_v46, %v821_v42  ;;  %v798_v60 = vmul.f32 %v768_v47, %v19095_v2 }
 0x170   : > { %v19166_v59 = vpack.c.bf16 %v1092_v50, %v1085_v49  ;;  %v806_v61 = vmul.f32 %v784_v48, %v19101_v6  ;;  %v869_v63 = vsub.f32 %v853_v56, %v861_v41  ;;  %v846_v3 = vmul.f32 %v770_v53, %v19098_v5 }
 0x171   : > { %v910_v54 = vsel %vm908_vm0, %v868_v43, 0  ;;  %v1694_v62 = vsel %vm908_vm0, %v900_v55, 0  ;;  %v885_v0 = vadd.f32 %v877_v51, %v837_v57  ;;  %v862_v10 = vmul.f32 %v786_v1, %v19104_v7  ;;  %v787_v55 = vld [vmem:[%s19072_s9 + $0x38] sm:$0xff] }
 0x172   : > { %v19164_v58 = vand.u32 4294901760, %v910_v54  ;;  %21638 = vst [vmem:[#allocation42_spill] sm:$0xff] %v19166_v59  ;;  %16927 = vmatprep.subr.bf16.mxu1 %v19166_v59  ;;  %v19177_v8 = vand.u32 4294901760, %v1694_v62  ;;  %16975 = vmatprep.subr.bf16.mxu0 %v19166_v59  ;;  %v814_v9 = vsub.f32 %v798_v60, %v806_v61  ;;  %v913_v12 = vsel %vm908_vm0, %v869_v63, 0 }
 0x173   : > { %v901_v13 = vadd.f32 %v893_v52, %v885_v0  ;;  %v822_v14 = vmul.f32 %v784_v48, %v19095_v2  ;;  %v830_v15 = vmul.f32 %v768_v47, %v19101_v6  ;;  %v19190_v23 = vand.u32 4294901760, %v913_v12 }
 0x174   : > { %v19174_v4 = vsub.f32 %v910_v54, %v19164_v58  ;;  %v19188_v20 = vsub.f32 %v1694_v62, %v19177_v8  ;;  %v854_v24 = vadd.f32 %v846_v3, %v814_v9  ;;  %v878_v32 = vmul.f32 %v786_v1, %v19098_v5  ;;  %v772_v62 = vld [vmem:[%s19070_s26 + $0x40] sm:$0xff]  ;;  %v774_v9 = vld [vmem:[%s19070_s26 + $0x50] sm:$0xff] }
 0x175   : > { %v1697_v28 = vsel %vm908_vm0, %v901_v13, 0  ;;  %v838_v29 = vadd.f32 %v830_v15, %v822_v14  ;;  %v894_v33 = vmul.f32 %v770_v53, %v19104_v7  ;;  %v19203_v36 = vsub.f32 %v913_v12, %v19190_v23 }
 0x176   : > { %v19185_v17 = vand.u32 4294901760, %v19174_v4  ;;  %v19200_v35 = vand.u32 4294901760, %v19188_v20  ;;  %v19205_v37 = vand.u32 4294901760, %v1697_v28  ;;  %v870_v39 = vsub.f32 %v854_v24, %v862_v10  ;;  %v788_v10 = vld [vmem:[%s19072_s9 + $0x40] sm:$0xff] }
 0x177   : > { %v886_v40 = vadd.f32 %v878_v32, %v838_v29  ;;  %v799_v41 = vmul.f32 %v769_v25, %v19116_v16  ;;  %v807_v42 = vmul.f32 %v785_v26, %v19128_v22  ;;  %v19215_v45 = vand.u32 4294901760, %v19203_v36 }
 0x178   : > { %v1003_v34 = vsub.f32 %v19174_v4, %v19185_v17  ;;  %v1787_v44 = vsub.f32 %v19188_v20, %v19200_v35  ;;  %v19218_v46 = vsub.f32 %v1697_v28, %v19205_v37  ;;  %v916_v47 = vsel %vm908_vm0, %v870_v39, 0 }
 0x179   : > { %v902_v48 = vadd.f32 %v894_v33, %v886_v40  ;;  %v815_v49 = vsub.f32 %v799_v41, %v807_v42  ;;  %v847_v50 = vmul.f32 %v771_v38, %v19125_v21  ;;  %v1013_v52 = vsub.f32 %v19203_v36, %v19215_v45  ;;  %v790_v33 = vld [vmem:[%s19072_s9 + $0x50] sm:$0xff] }
 0x17a   : > { %v19210_v43 = vand.u32 4294901760, %v1003_v34  ;;  %v19223_v51 = vand.u32 4294901760, %v1787_v44  ;;  %v19228_v53 = vand.u32 4294901760, %v19218_v46  ;;  %v19230_v54 = vand.u32 4294901760, %v916_v47 }
 0x17b   : > { %v1700_v56 = vsel %vm908_vm0, %v902_v48, 0  ;;  %v855_v57 = vadd.f32 %v847_v50, %v815_v49  ;;  %v863_v60 = vmul.f32 %v787_v55, %v19136_v27  ;;  %v823_v61 = vmul.f32 %v785_v26, %v19116_v16  ;;  %v773_v50 = vld [vmem:[%s19070_s26 + $0x48] sm:$0xff] }
 0x17c   : > { %21639 = vst [vmem:[#allocation43_spill] sm:$0xff] %v19210_v43  ;;  %15390 = vmatprep.mubr.f32.mxu1 %v19210_v43  ;;  %21640 = vst [vmem:[#allocation44_spill] sm:$0xff] %v19223_v51  ;;  %15582 = vmatprep.mubr.f32.mxu0 %v19223_v51  ;;  %v19238_v63 = vand.u32 4294901760, %v1013_v52  ;;  %v1797_v0 = vsub.f32 %v19218_v46, %v19228_v53  ;;  %v19243_v1 = vsub.f32 %v916_v47, %v19230_v54  ;;  %v789_v52 = vld [vmem:[%s19072_s9 + $0x48] sm:$0xff] }
 0x17d   : > { %v19245_v3 = vand.u32 4294901760, %v1700_v56  ;;  %v871_v12 = vsub.f32 %v855_v57, %v863_v60  ;;  %v831_v13 = vmul.f32 %v769_v25, %v19128_v22  ;;  %v879_v14 = vmul.f32 %v787_v55, %v19125_v21 }
 0x17e   : > { %21641 = vst [vmem:[#allocation45_spill] sm:$0xff] %v19238_v63  ;;  %v895_v15 = vmul.f32 %v771_v38, %v19136_v27  ;;  %15391 = vmatmul.mubr.f32.vlgmr.msra.gmra.mrb[0].mxu1 %v19238_v63  ;;  %v19253_v24 = vand.u32 4294901760, %v1797_v0  ;;  %v19256_v26 = vand.u32 4294901760, %v19243_v1  ;;  %v800_v29 = vmul.f32 %v772_v62, %v19095_v2 }
 0x17f   : > { %v19259_v28 = vsub.f32 %v1700_v56, %v19245_v3  ;;  %16929 = vmatpush3.bf16.msra.mxu1 %v19166_v59  ;;  %v919_v25 = vsel %vm908_vm0, %v871_v12, 0  ;;  %v839_v32 = vadd.f32 %v831_v13, %v823_v61  ;;  %v808_v34 = vmul.f32 %v788_v10, %v19101_v6  ;;  %v775_v61 = vld [vmem:[%s19070_s26 + $0x58] sm:$0xff] }
 0x180   : > { %21642 = vst [vmem:[#allocation46_spill] sm:$0xff] %v19253_v24  ;;  %v848_v38 = vmul.f32 %v774_v9, %v19098_v5  ;;  %15583 = vmatmul.mubr.f32.vlgmr.msra.gmra.mrb[0].mxu0 %v19253_v24  ;;  %v1023_v39 = vsub.f32 %v19243_v1, %v19256_v26  ;;  %v19273_v41 = vand.u32 4294901760, %v919_v25  ;;  %v864_v42 = vmul.f32 %v790_v33, %v19104_v7 }
 0x181   : > { %v19271_v40 = vand.u32 4294901760, %v19259_v28  ;;  %16977 = vmatpush3.bf16.msra.mxu0 %v19166_v59  ;;  %v887_v44 = vadd.f32 %v879_v14, %v839_v32  ;;  %v816_v47 = vsub.f32 %v800_v29, %v808_v34  ;;  %v824_v48 = vmul.f32 %v788_v10, %v19095_v2 }
 0x182   : > { %v832_v49 = vmul.f32 %v772_v62, %v19101_v6  ;;  %v19281_v55 = vand.u32 4294901760, %v1023_v39  ;;  %v19286_v57 = vsub.f32 %v919_v25, %v19273_v41  ;;  %v880_v60 = vmul.f32 %v790_v33, %v19098_v5 }
 0x183   : > { %v1807_v56 = vsub.f32 %v19259_v28, %v19271_v40  ;;  %v903_v0 = vadd.f32 %v895_v15, %v887_v44  ;;  %v856_v12 = vadd.f32 %v848_v38, %v816_v47  ;;  %v896_v10 = vmul.f32 %v774_v9, %v19104_v7  ;;  %v791_v15 = vld [vmem:[%s19072_s9 + $0x58] sm:$0xff] }
 0x184   : > { %21643 = vst [vmem:[#allocation47_spill] sm:$0xff] %v19281_v55  ;;  %v840_v13 = vadd.f32 %v832_v49, %v824_v48  ;;  %15393 = vmatprep.mubr.f32.mxu1 %v19281_v55  ;;  %v19295_v14 = vand.u32 4294901760, %v19286_v57  ;;  %v801_v29 = vmul.f32 %v773_v50, %v19116_v16  ;;  %v809_v25 = vmul.f32 %v789_v52, %v19128_v22 }
 0x185   : > { %v19292_v62 = vand.u32 4294901760, %v1807_v56  ;;  %v1703_v32 = vsel %vm908_vm0, %v903_v0, 0  ;;  %v872_v33 = vsub.f32 %v856_v12, %v864_v42  ;;  %v849_v9 = vmul.f32 %v775_v61, %v19125_v21 }
 0x186   : > { %v888_v34 = vadd.f32 %v880_v60, %v840_v13  ;;  %v1033_v38 = vsub.f32 %v19286_v57, %v19295_v14  ;;  %v19305_v39 = vand.u32 4294901760, %v1703_v32  ;;  %v817_v44 = vsub.f32 %v801_v29, %v809_v25  ;;  %v792_v29 = vld [vmem:[%s19072_s9 + $0x60] sm:$0xff] }
 0x187   : > { %21644 = vst [vmem:[#allocation48_spill] sm:$0xff] %v19292_v62  ;;  %15585 = vmatprep.mubr.f32.mxu0 %v19292_v62  ;;  %v865_v47 = vmul.f32 %v791_v15, %v19136_v27  ;;  %v922_v48 = vsel %vm908_vm0, %v872_v33, 0  ;;  %v825_v49 = vmul.f32 %v789_v52, %v19116_v16  ;;  %v833_v56 = vmul.f32 %v773_v50, %v19128_v22 }
 0x188   : > { %v904_v42 = vadd.f32 %v896_v10, %v888_v34  ;;  %v19311_v60 = vand.u32 4294901760, %v1033_v38  ;;  %v19314_v0 = vsub.f32 %v1703_v32, %v19305_v39  ;;  %v19316_v12 = vand.u32 4294901760, %v922_v48 }
 0x189   : > { %v857_v13 = vadd.f32 %v849_v9, %v817_v44  ;;  %v841_v59 = vadd.f32 %v833_v56, %v825_v49  ;;  %v881_v10 = vmul.f32 %v791_v15, %v19125_v21  ;;  %v897_v52 = vmul.f32 %v775_v61, %v19136_v27 }
 0x18a   : > { %21645 = vst [vmem:[#allocation49_spill] sm:$0xff] %v19311_v60  ;;  %v1706_v25 = vsel %vm908_vm0, %v904_v42, 0  ;;  %15394 = vmatmul.mubr.f32.gmra.mrb[2].mxu1 %v19311_v60  ;;  %v19326_v50 = vand.u32 4294901760, %v19314_v0  ;;  %v19329_v32 = vsub.f32 %v922_v48, %v19316_v12  ;;  %v802_v38 = vmul.f32 %v776_v31, %v19095_v2 }
 0x18b   : > { %v19331_v33 = vand.u32 4294901760, %v1706_v25  ;;  %v873_v34 = vsub.f32 %v857_v13, %v865_v47  ;;  %v889_v9 = vadd.f32 %v881_v10, %v841_v59  ;;  %v810_v44 = vmul.f32 %v792_v29, %v19101_v6  ;;  %v794_v59 = vld [vmem:[%s19072_s9 + $0x70] sm:$0xff] }
 0x18c   : > { %v850_v15 = vmul.f32 %v778_v30, %v19098_v5  ;;  %v1817_v61 = vsub.f32 %v19314_v0, %v19326_v50  ;;  %v19339_v42 = vand.u32 4294901760, %v19329_v32  ;;  %v866_v10 = vmul.f32 %v794_v59, %v19104_v7 }
 0x18d   : > { %v19342_v48 = vsub.f32 %v1706_v25, %v19331_v33  ;;  %v925_v47 = vsel %vm908_vm0, %v873_v34, 0  ;;  %v905_v56 = vadd.f32 %v897_v52, %v889_v9  ;;  %v818_v13 = vsub.f32 %v802_v38, %v810_v44  ;;  %v777_v38 = vld [vmem:[%s19070_s26 + $0x68] sm:$0xff] }
 0x18e   : > { %v19346_v49 = vand.u32 4294901760, %v925_v47  ;;  %v19349_v60 = vand.u32 4294901760, %v1817_v61  ;;  %v1043_v55 = vsub.f32 %v19329_v32, %v19339_v42  ;;  %v826_v25 = vmul.f32 %v792_v29, %v19095_v2  ;;  %v793_v44 = vld [vmem:[%s19072_s9 + $0x68] sm:$0xff]  ;;  %v779_v29 = vld [vmem:[%s19070_s26 + $0x78] sm:$0xff] }
 0x18f   : > { %v19354_v63 = vand.u32 4294901760, %v19342_v48  ;;  %v1709_v62 = vsel %vm908_vm0, %v905_v56, 0  ;;  %v858_v52 = vadd.f32 %v850_v15, %v818_v13  ;;  %v834_v9 = vmul.f32 %v776_v31, %v19101_v6 }
 0x190   : > { %21646 = vst [vmem:[#allocation50_spill] sm:$0xff] %v19349_v60  ;;  %v19358_v34 = vsub.f32 %v925_v47, %v19346_v49  ;;  %15586 = vmatmul.mubr.f32.gmra.mrb[2].mxu0 %v19349_v60  ;;  %v19365_v61 = vand.u32 4294901760, %v1043_v55  ;;  %v19369_v43 = vand.u32 4294901760, %v1709_v62  ;;  %v882_v2 = vmul.f32 %v794_v59, %v19098_v5 }
 0x191   : > { %v1827_v24 = vsub.f32 %v19342_v48, %v19354_v63  ;;  %v874_v15 = vsub.f32 %v858_v52, %v866_v10  ;;  %v842_v6 = vadd.f32 %v834_v9, %v826_v25  ;;  %v898_v31 = vmul.f32 %v778_v30, %v19104_v7  ;;  %v795_v25 = vld [vmem:[%s19072_s9 + $0x78] sm:$0xff] }
 0x192   : > { %21647 = vst [vmem:[#allocation51_spill] sm:$0xff] %v19365_v61  ;;  %v19374_v47 = vand.u32 4294901760, %v19358_v34  ;;  %15396 = vmatprep.mubr.f32.mxu1 %v19365_v61  ;;  %v19381_v56 = vsub.f32 %v1709_v62, %v19369_v43  ;;  %v803_v13 = vmul.f32 %v777_v38, %v19116_v16  ;;  %v811_v60 = vmul.f32 %v793_v44, %v19128_v22 }
 0x193   : > { %v19378_v55 = vand.u32 4294901760, %v1827_v24  ;;  %v928_v59 = vsel %vm908_vm0, %v874_v15, 0  ;;  %v890_v10 = vadd.f32 %v882_v2, %v842_v6  ;;  %v851_v7 = vmul.f32 %v779_v29, %v19125_v21 }
 0x194   : > { %21648 = vst [vmem:[#allocation52_spill] sm:$0xff] %v19374_v47  ;;  %v1053_v5 = vsub.f32 %v19358_v34, %v19374_v47  ;;  %v19392_v30 = vand.u32 4294901760, %v19381_v56  ;;  %v19394_v24 = vand.u32 4294901760, %v928_v59  ;;  %v819_v62 = vsub.f32 %v803_v13, %v811_v60 }
 0x195   : > { %21649 = vst [vmem:[#allocation53_spill] sm:$0xff] %v19378_v55  ;;  %15588 = vmatprep.mubr.f32.mxu0 %v19378_v55  ;;  %v867_v52 = vmul.f32 %v795_v25, %v19136_v27  ;;  %v906_v61 = vadd.f32 %v898_v31, %v890_v10  ;;  %v827_v51 = vmul.f32 %v793_v44, %v19116_v16 }
 0x196   : > { %v19397_v9 = vand.u32 4294901760, %v1053_v5  ;;  %v835_v2 = vmul.f32 %v777_v38, %v19128_v22  ;;  %v1837_v15 = vsub.f32 %v19381_v56, %v19392_v30  ;;  %v19404_v6 = vsub.f32 %v928_v59, %v19394_v24 }
 0x197   : > { %v859_v55 = vadd.f32 %v851_v7, %v819_v62  ;;  %v883_v47 = vmul.f32 %v795_v25, %v19125_v21  ;;  %v1712_v60 = vsel %vm908_vm0, %v906_v61, 0  ;;  %v899_v31 = vmul.f32 %v779_v29, %v19136_v27 }
 0x198   : > { %15397 = vmatmul.mubr.f32.gmra.mrb[4].mxu1 %v19397_v9  ;;  %v843_v13 = vadd.f32 %v835_v2, %v827_v51  ;;  %v19412_v16 = vpack.c.bf16 %v19121_v19, %v19119_v18  ;;  %v19414_v22 = vand.u32 4294901760, %v1837_v15  ;;  %v19417_v38 = vand.u32 4294901760, %v19404_v6 }
 0x199   : > { %v19419_v44 = vand.u32 4294901760, %v1712_v60  ;;  %v875_v5 = vsub.f32 %v859_v55, %v867_v52  ;;  %v21652_v51 = vand.u32 4294901760, %v19119_v18  ;;  %v21653_v27 = vand.u32 4294901760, %v19121_v19 }
 0x19a   : > { %21650 = vst [vmem:[#allocation54_spill] sm:$0xff] %v19412_v16  ;;  %21651 = vst [vmem:[#allocation55_spill] sm:$0xff] %v19417_v38  ;;  %v891_v21 = vadd.f32 %v883_v47, %v843_v13  ;;  %16931 = vmatprep.subr.bf16.mxu1 %v19412_v16  ;;  %16979 = vmatprep.subr.bf16.mxu0 %v19412_v16  ;;  %v1063_v29 = vsub.f32 %v19404_v6, %v19417_v38 }
 0x19b   : > { %v19427_v61 = vpack.c.bf16 %v21653_v27, %v21652_v51  ;;  %15589 = vmatmul.mubr.f32.gmra.mrb[4].mxu0 %v19414_v22  ;;  %v19433_v59 = vsub.f32 %v1712_v60, %v19419_v44  ;;  %v931_v47 = vsel %vm908_vm0, %v875_v5, 0  ;;  %v750_v27 = vld [vmem:[#allocation18] sm:$0xff] }
 0x19c   : > { %v19436_v55 = vand.u32 4294901760, %v931_v47  ;;  %v907_v10 = vadd.f32 %v899_v31, %v891_v21  ;;  %v19438_v25 = vand.u32 4294901760, %v1063_v29  ;;  %v751_v29 = vld [vmem:[#allocation18 + $0x8] sm:$0xff] }
 0x19d   : > { %21654 = vst [vmem:[#allocation56_spill] sm:$0xff] %v19427_v61  ;;  %v19441_v18 = vand.u32 4294901760, %v19433_v59 }
 0x19e   : > { %v19444_v19 = vsub.f32 %v931_v47, %v19436_v55  ;;  %v1715_v7 = vsel %vm908_vm0, %v907_v10, 0  ;;  %15399 = vmatprep.mubr.f32.mxu1 %v19438_v25  ;;  %v21657_v47 = vld [vmem:[#allocation52_spill] sm:$0xff]  ;;  %v1718_v10 = vand.u32 4294901760, %v750_v27 }
 0x19f   : > { %v1847_v62 = vsub.f32 %v19433_v59, %v19441_v18  ;;  %v19450_v52 = vand.u32 4294901760, %v1715_v7 }
 0x1a0   : > { %v19453_v2 = vand.u32 4294901760, %v19444_v19 }
 0x1a1   : > { %v19455_v15 = vand.u32 4294901760, %v1847_v62  ;;  %v19458_v60 = vsub.f32 %v1715_v7, %v19450_v52  ;;  %v1721_v7 = vand.u32 4294901760, %v751_v29 }
 0x1a2   : > { %21655 = vst [vmem:[#allocation57_spill] sm:$0xff] %v19453_v2  ;;  %v1073_v13 = vsub.f32 %v19444_v19, %v19453_v2 }
 0x1a3   : > { %15591 = vmatprep.mubr.f32.mxu0 %v19455_v15  ;;  %v19464_v31 = vand.u32 4294901760, %v19458_v60  ;;  %v19535_v62 = vpack.c.bf16 %v1721_v7, %v1718_v10 }
 0x1a4   : > { %v19466_v5 = vand.u32 4294901760, %v1073_v13  ;;  %v19537_v13 = vsub.f32 %v750_v27, %v1718_v10 }
 0x1a5   : > { %21656 = vst [vmem:[#allocation58_spill] sm:$0xff] %v19464_v31  ;;  %v1857_v21 = vsub.f32 %v19458_v60, %v19464_v31 }
 0x1a6   : > { %15400 = vmatmul.mubr.f32.gmra.mrb[6].mxu1 %v19466_v5 }
 0x1a7   : > { %v19471_v51 = vand.u32 4294901760, %v1857_v21  ;;  %15406 = vmatprep.mubr.f32.mxu1 %v19164_v58  ;;  %v19539_v21 = vsub.f32 %v751_v29, %v1721_v7 }
 0x1a9   : > { %15592 = vmatmul.mubr.f32.gmra.mrb[6].mxu0 %v19471_v51 }
 0x1aa   : > { %15598 = vmatprep.mubr.f32.mxu0 %v19177_v8  ;;  %15407 = vmatmul.mubr.f32.vlgmr.msra.gmra.mrb[0].mxu1 %v19190_v23 }
 0x1ab   : > { %16933 = vmatpush3.bf16.msra.mxu1 %v19412_v16  ;;  %15409 = vmatprep.mubr.f32.mxu1 %v19230_v54 }
 0x1ac   : > { %16935 = vmatprep.subr.bf16.mxu1 %v19109_v11 }
 0x1ad   : > { %15599 = vmatmul.mubr.f32.vlgmr.msra.gmra.mrb[0].mxu0 %v19205_v37 }
 0x1ae   : > { %16981 = vmatpush3.bf16.msra.mxu0 %v19412_v16  ;;  %15601 = vmatprep.mubr.f32.mxu0 %v19245_v3  ;;  %v21531_v16 = vand.u32 4294901760, %v19539_v21 }
 0x1af   : > { %15410 = vmatmul.mubr.f32.gmra.mrb[2].mxu1 %v19273_v41  ;;  %16983 = vmatprep.subr.bf16.mxu0 %v19109_v11 }
 0x1b0   : > { %15412 = vmatprep.mubr.f32.mxu1 %v19316_v12  ;;  %v1875_v29 = vsub.f32 %v19539_v21, %v21531_v16  ;;  %v21661_v16 = vld [vmem:[#allocation48_spill] sm:$0xff] }
 0x1b1   : > { %15602 = vmatmul.mubr.f32.gmra.mrb[2].mxu0 %v19305_v39 }
 0x1b2   : > { %15604 = vmatprep.mubr.f32.mxu0 %v19331_v33  ;;  %v1876_v7 = vand.u32 4294901760, %v1875_v29  ;;  %v16954_v29 = vpack.c.bf16 %v19539_v21, %v19537_v13 }
 0x1b3   : > { %15413 = vmatmul.mubr.f32.gmra.mrb[4].mxu1 %v19346_v49 }
 0x1b4   : > { %15415 = vmatprep.mubr.f32.mxu1 %v19394_v24 }
 0x1b5   : > { %15605 = vmatmul.mubr.f32.gmra.mrb[4].mxu0 %v19369_v43 }
 0x1b6   : > { %15607 = vmatprep.mubr.f32.mxu0 %v19419_v44 }
 0x1b7   : > { %15416 = vmatmul.mubr.f32.gmra.mrb[6].mxu1 %v19436_v55 }
 0x1b8   : > { %15422 = vmatprep.mubr.f32.mxu1 %v19174_v4 }
 0x1b9   : > { %15608 = vmatmul.mubr.f32.gmra.mrb[6].mxu0 %v19450_v52 }
 0x1ba   : > { %15614 = vmatprep.mubr.f32.mxu0 %v19188_v20 }
 0x1bb   : > { %15423 = vmatmul.mubr.f32.vlgmr.msra.gmra.mrb[0].mxu1 %v19203_v36 }
 0x1bc   : > { %16937 = vmatpush3.bf16.msra.mxu1 %v19109_v11  ;;  %15425 = vmatprep.mubr.f32.mxu1 %v19243_v1 }
 0x1bd   : > { %15615 = vmatmul.mubr.f32.vlgmr.msra.gmra.mrb[0].mxu0 %v19218_v46  ;;  %16939 = vmatprep.subr.bf16.mxu1 %v19427_v61 }
 0x1be   : > { %16985 = vmatpush3.bf16.msra.mxu0 %v19109_v11  ;;  %15617 = vmatprep.mubr.f32.mxu0 %v19259_v28 }
 0x1bf   : > { %15426 = vmatmul.mubr.f32.gmra.mrb[2].mxu1 %v19286_v57  ;;  %16987 = vmatprep.subr.bf16.mxu0 %v19427_v61 }
 0x1c0   : > { %15428 = vmatprep.mubr.f32.mxu1 %v19329_v32 }
 0x1c1   : > { %15618 = vmatmul.mubr.f32.gmra.mrb[2].mxu0 %v19314_v0 }
 0x1c2   : > { %15620 = vmatprep.mubr.f32.mxu0 %v19342_v48 }
 0x1c3   : > { %15429 = vmatmul.mubr.f32.gmra.mrb[4].mxu1 %v19358_v34 }
 0x1c4   : > { %15431 = vmatprep.mubr.f32.mxu1 %v19404_v6 }
 0x1c5   : > { %15621 = vmatmul.mubr.f32.gmra.mrb[4].mxu0 %v19381_v56 }
 0x1c6   : > { %15623 = vmatprep.mubr.f32.mxu0 %v19433_v59 }
 0x1c7   : > { %15432 = vmatmul.mubr.f32.gmra.mrb[6].mxu1 %v19444_v19 }
 0x1c8   : > { %15438 = vmatprep.mubr.f32.mxu1 %v19185_v17 }
 0x1c9   : > { %15624 = vmatmul.mubr.f32.gmra.mrb[6].mxu0 %v19458_v60 }
 0x1ca   : > { %15630 = vmatprep.mubr.f32.mxu0 %v19200_v35 }
 0x1cb   : > { %15439 = vmatmul.mubr.f32.vlgmr.msra.gmra.mrb[0].mxu1 %v19215_v45 }
 0x1cc   : > { %16941 = vmatpush3.bf16.msra.mxu1 %v19427_v61  ;;  %15441 = vmatprep.mubr.f32.mxu1 %v19256_v26 }
 0x1cd   : > { %15631 = vmatmul.mubr.f32.vlgmr.msra.gmra.mrb[0].mxu0 %v19228_v53  ;;  %16943 = vmatprep.subr.bf16.mxu1 %v19109_v11 }
 0x1ce   : > { %16989 = vmatpush3.bf16.msra.mxu0 %v19427_v61  ;;  %15633 = vmatprep.mubr.f32.mxu0 %v19271_v40  ;;  %v21530_v61 = vand.u32 4294901760, %v19537_v13 }
 0x1cf   : > { %15442 = vmatmul.mubr.f32.gmra.mrb[2].mxu1 %v19295_v14  ;;  %16991 = vmatprep.subr.bf16.mxu0 %v19109_v11 }
 0x1d0   : > { %15444 = vmatprep.mubr.f32.mxu1 %v19339_v42  ;;  %v1868_v27 = vsub.f32 %v19537_v13, %v21530_v61 }
 0x1d1   : > { %15634 = vmatmul.mubr.f32.gmra.mrb[2].mxu0 %v19326_v50 }
 0x1d2   : > { %15636 = vmatprep.mubr.f32.mxu0 %v19354_v63  ;;  %v1869_v10 = vand.u32 4294901760, %v1868_v27  ;;  %v21658_v27 = vld [vmem:[#allocation44_spill] sm:$0xff] }
 0x1d3   : > { %15445 = vmatmul.mubr.f32.gmra.mrb[4].mxu1 %v21657_v47  ;;  %v21667_v47 = vld [vmem:[#allocation51_spill] sm:$0xff] }
 0x1d4   : > { %15447 = vmatprep.mubr.f32.mxu1 %v19417_v38  ;;  %v16950_v61 = vpack.c.bf16 %v1876_v7, %v1869_v10  ;;  %v21659_v10 = vld [vmem:[#allocation43_spill] sm:$0xff]  ;;  %v21660_v7 = vld [vmem:[#allocation46_spill] sm:$0xff]  ;;  %v21666_v38 = vld [vmem:[#allocation49_spill] sm:$0xff] }
 0x1d5   : > { %15637 = vmatmul.mubr.f32.gmra.mrb[4].mxu0 %v19392_v30 }
 0x1d6   : > { %15639 = vmatprep.mubr.f32.mxu0 %v19441_v18 }
 0x1d7   : > { %15448 = vmatmul.mubr.f32.gmra.mrb[6].mxu1 %v19453_v2  ;;  %v21663_v2 = vld [vmem:[#allocation47_spill] sm:$0xff] }
 0x1d8   : > { %15454 = vmatprep.mubr.f32.mxu1 %v19164_v58 }
 0x1d9   : > { %15640 = vmatmul.mubr.f32.gmra.mrb[6].mxu0 %v19464_v31  ;;  %v21664_v31 = vld [vmem:[#allocation50_spill] sm:$0xff] }
 0x1da   : > { %15646 = vmatprep.mubr.f32.mxu0 %v19177_v8 }
 0x1db   : > { %15455 = vmatmul.mubr.f32.vlgmr.msra.gmra.mrb[0].mxu1 %v19190_v23 }
 0x1dc   : > { %16945 = vmatpush3.bf16.msra.mxu1 %v19109_v11  ;;  %15457 = vmatprep.mubr.f32.mxu1 %v19230_v54 }
 0x1dd   : > { %15647 = vmatmul.mubr.f32.vlgmr.msra.gmra.mrb[0].mxu0 %v19205_v37  ;;  %16947 = vmatprep.subr.bf16.mxu1 %v19535_v62 }
 0x1de   : > { %16993 = vmatpush3.bf16.msra.mxu0 %v19109_v11  ;;  %15649 = vmatprep.mubr.f32.mxu0 %v19245_v3  ;;  %v21662_v11 = vld [vmem:[#allocation45_spill] sm:$0xff] }
 0x1df   : > { %15458 = vmatmul.mubr.f32.gmra.mrb[2].mxu1 %v19273_v41  ;;  %16995 = vmatprep.subr.bf16.mxu0 %v19535_v62 }
 0x1e0   : > { %15460 = vmatprep.mubr.f32.mxu1 %v19316_v12 }
 0x1e1   : > { %15650 = vmatmul.mubr.f32.gmra.mrb[2].mxu0 %v19305_v39 }
 0x1e2   : > { %15652 = vmatprep.mubr.f32.mxu0 %v19331_v33 }
 0x1e3   : > { %15461 = vmatmul.mubr.f32.gmra.mrb[4].mxu1 %v19346_v49 }
 0x1e4   : > { %15463 = vmatprep.mubr.f32.mxu1 %v19394_v24 }
 0x1e5   : > { %15653 = vmatmul.mubr.f32.gmra.mrb[4].mxu0 %v19369_v43 }
 0x1e6   : > { %15655 = vmatprep.mubr.f32.mxu0 %v19419_v44 }
 0x1e7   : > { %15464 = vmatmul.mubr.f32.gmra.mrb[6].mxu1 %v19436_v55 }
 0x1e8   : > { %15470 = vmatprep.mubr.f32.mxu1 %v19164_v58 }
 0x1e9   : > { %15656 = vmatmul.mubr.f32.gmra.mrb[6].mxu0 %v19450_v52 }
 0x1ea   : > { %15662 = vmatprep.mubr.f32.mxu0 %v19177_v8 }
 0x1eb   : > { %15471 = vmatmul.mubr.f32.vlgmr.msra.gmra.mrb[0].mxu1 %v19190_v23 }
 0x1ec   : > { %16949 = vmatpush3.bf16.msra.mxu1 %v19535_v62  ;;  %15473 = vmatprep.mubr.f32.mxu1 %v19230_v54 }
 0x1ed   : > { %15663 = vmatmul.mubr.f32.vlgmr.msra.gmra.mrb[0].mxu0 %v19205_v37  ;;  %16951 = vmatprep.subr.bf16.mxu1 %v16950_v61 }
 0x1ee   : > { %16997 = vmatpush3.bf16.msra.mxu0 %v19535_v62  ;;  %15665 = vmatprep.mubr.f32.mxu0 %v19245_v3 }
 0x1ef   : > { %15474 = vmatmul.mubr.f32.gmra.mrb[2].mxu1 %v19273_v41  ;;  %16999 = vmatprep.subr.bf16.mxu0 %v16950_v61 }
 0x1f0   : > { %15476 = vmatprep.mubr.f32.mxu1 %v19316_v12 }
 0x1f1   : > { %15666 = vmatmul.mubr.f32.gmra.mrb[2].mxu0 %v19305_v39 }
 0x1f2   : > { %15668 = vmatprep.mubr.f32.mxu0 %v19331_v33 }
 0x1f3   : > { %15477 = vmatmul.mubr.f32.gmra.mrb[4].mxu1 %v19346_v49 }
 0x1f4   : > { %15479 = vmatprep.mubr.f32.mxu1 %v19394_v24 }
 0x1f5   : > { %15669 = vmatmul.mubr.f32.gmra.mrb[4].mxu0 %v19369_v43 }
 0x1f6   : > { %15671 = vmatprep.mubr.f32.mxu0 %v19419_v44 }
 0x1f7   : > { %15480 = vmatmul.mubr.f32.gmra.mrb[6].mxu1 %v19436_v55 }
 0x1f8   : > { %15486 = vmatprep.mubr.f32.mxu1 %v21658_v27  ;;  %v21665_v27 = vld [vmem:[#allocation53_spill] sm:$0xff] }
 0x1f9   : > { %15672 = vmatmul.mubr.f32.gmra.mrb[6].mxu0 %v19450_v52 }
 0x1fa   : > { %15678 = vmatprep.mubr.f32.mxu0 %v21659_v10 }
 0x1fb   : > { %15487 = vmatmul.mubr.f32.vlgmr.msra.gmra.mrb[8].mxu1 %v21660_v7 }
 0x1fc   : > { %16953 = vmatpush3.bf16.msra.mxu1 %v16950_v61  ;;  %15489 = vmatprep.mubr.f32.mxu1 %v21661_v16 }
 0x1fd   : > { %15679 = vmatmul.mubr.f32.vlgmr.msra.gmra.mrb[0].mxu0 %v21662_v11  ;;  %16955 = vmatprep.subr.bf16.mxu1 %v16954_v29  ;;  %v21668_v11 = vand.u32 4294901760, %v19537_v13 }
 0x1fe   : > { %17001 = vmatpush3.bf16.msra.mxu0 %v16950_v61  ;;  %15681 = vmatprep.mubr.f32.mxu0 %v21663_v2 }
 0x1ff   : > { %15490 = vmatmul.mubr.f32.gmra.mrb[10].mxu1 %v21664_v31  ;;  %17003 = vmatprep.subr.bf16.mxu0 %v16954_v29 }
 0x200   : > { %15492 = vmatprep.mubr.f32.mxu1 %v21665_v27 }
 0x201   : > { %15682 = vmatmul.mubr.f32.gmra.mrb[2].mxu0 %v21666_v38 }
 0x202   : > { %15684 = vmatprep.mubr.f32.mxu0 %v21667_v47 }
 0x203   : > { %15493 = vmatmul.mubr.f32.gmra.mrb[12].mxu1 %v19414_v22 }
 0x204   : > { %15495 = vmatprep.mubr.f32.mxu1 %v19455_v15 }
 0x205   : > { %15685 = vmatmul.mubr.f32.gmra.mrb[4].mxu0 %v19397_v9  ;;  %v21669_v9 = vand.u32 4294901760, %v19539_v21 }
 0x206   : > { %15687 = vmatprep.mubr.f32.mxu0 %v19438_v25 }
 0x207   : > { %15496 = vmatmul.mubr.f32.gmra.mrb[14].mxu1 %v19471_v51  ;;  %v16962_v16 = vpack.c.bf16 %v21669_v9, %v21668_v11 }
 0x208   : > { %15502 = vmatprep.mubr.f32.mxu1 %v19177_v8 }
 0x209   : > { %15688 = vmatmul.mubr.f32.gmra.mrb[6].mxu0 %v19466_v5 }
 0x20a   : > { %15694 = vmatprep.mubr.f32.mxu0 %v19164_v58 }
 0x20b   : > { %15503 = vmatmul.mubr.f32.vlgmr.msra.gmra.mrb[8].mxu1 %v19205_v37 }
 0x20c   : > { %16957 = vmatpush3.bf16.msra.mxu1 %v16954_v29  ;;  %15505 = vmatprep.mubr.f32.mxu1 %v19245_v3 }
 0x20d   : > { %15695 = vmatmul.mubr.f32.vlgmr.msra.gmra.mrb[0].mxu0 %v19190_v23  ;;  %16959 = vmatprep.subr.bf16.mxu1 %v19535_v62 }
 0x20e   : > { %17005 = vmatpush3.bf16.msra.mxu0 %v16954_v29  ;;  %15697 = vmatprep.mubr.f32.mxu0 %v19230_v54 }
 0x20f   : > { %15506 = vmatmul.mubr.f32.gmra.mrb[10].mxu1 %v19305_v39  ;;  %17007 = vmatprep.subr.bf16.mxu0 %v19535_v62 }
 0x210   : > { %15508 = vmatprep.mubr.f32.mxu1 %v19331_v33 }
 0x211   : > { %15698 = vmatmul.mubr.f32.gmra.mrb[2].mxu0 %v19273_v41 }
 0x212   : > { %15700 = vmatprep.mubr.f32.mxu0 %v19316_v12 }
 0x213   : > { %15509 = vmatmul.mubr.f32.gmra.mrb[12].mxu1 %v19369_v43 }
 0x214   : > { %15511 = vmatprep.mubr.f32.mxu1 %v19419_v44 }
 0x215   : > { %15701 = vmatmul.mubr.f32.gmra.mrb[4].mxu0 %v19346_v49 }
 0x216   : > { %15703 = vmatprep.mubr.f32.mxu0 %v19394_v24 }
 0x217   : > { %15512 = vmatmul.mubr.f32.gmra.mrb[14].mxu1 %v19450_v52 }
 0x218   : > { %15518 = vmatprep.mubr.f32.mxu1 %v19188_v20  ;;  %v21672_v20 = vld [vmem:[#allocation58_spill] sm:$0xff] }
 0x219   : > { %15704 = vmatmul.mubr.f32.gmra.mrb[6].mxu0 %v19436_v55 }
 0x21a   : > { %15710 = vmatprep.mubr.f32.mxu0 %v19174_v4  ;;  %v21670_v4 = vld [vmem:[#allocation52_spill] sm:$0xff] }
 0x21b   : > { %15519 = vmatmul.mubr.f32.vlgmr.msra.gmra.mrb[8].mxu1 %v19218_v46 }
 0x21c   : > { %16961 = vmatpush3.bf16.msra.mxu1 %v19535_v62  ;;  %15521 = vmatprep.mubr.f32.mxu1 %v19259_v28 }
 0x21d   : > { %15711 = vmatmul.mubr.f32.vlgmr.msra.gmra.mrb[0].mxu0 %v19203_v36  ;;  %16963 = vmatprep.subr.bf16.mxu1 %v16962_v16 }
 0x21e   : > { %17009 = vmatpush3.bf16.msra.mxu0 %v19535_v62  ;;  %15713 = vmatprep.mubr.f32.mxu0 %v19243_v1 }
 0x21f   : > { %15522 = vmatmul.mubr.f32.gmra.mrb[10].mxu1 %v19314_v0  ;;  %17011 = vmatprep.subr.bf16.mxu0 %v16962_v16 }
 0x220   : > { %15524 = vmatprep.mubr.f32.mxu1 %v19342_v48  ;;  %v744_v48 = vld [vmem:[%s21674_s18] sm:$0xff] }
 0x221   : > { %15714 = vmatmul.mubr.f32.gmra.mrb[2].mxu0 %v19286_v57 }
 0x222   : > { %15716 = vmatprep.mubr.f32.mxu0 %v19329_v32 }
 0x223   : > { %15525 = vmatmul.mubr.f32.gmra.mrb[12].mxu1 %v19381_v56  ;;  %v4286_v56 = vand.u32 4294901760, %v744_v48 }
 0x224   : > { %15527 = vmatprep.mubr.f32.mxu1 %v19433_v59 }
 0x225   : > { %15717 = vmatmul.mubr.f32.gmra.mrb[4].mxu0 %v19358_v34  ;;  %v4434_v59 = vsub.f32 %v744_v48, %v4286_v56 }
 0x226   : > { %15719 = vmatprep.mubr.f32.mxu0 %v19404_v6 }
 0x227   : > { %15528 = vmatmul.mubr.f32.gmra.mrb[14].mxu1 %v19458_v60  ;;  %v4435_v25 = vand.u32 4294901760, %v4434_v59 }
 0x228   : > { %15534 = vmatprep.mubr.f32.mxu1 %v19200_v35  ;;  %v21673_v35 = vld [vmem:[#allocation57_spill] sm:$0xff] }
 0x229   : > { %15720 = vmatmul.mubr.f32.gmra.mrb[6].mxu0 %v19444_v19  ;;  %v4436_v19 = vsub.f32 %v4434_v59, %v4435_v25 }
 0x22a   : > { %15726 = vmatprep.mubr.f32.mxu0 %v19185_v17  ;;  %v21671_v17 = vld [vmem:[#allocation55_spill] sm:$0xff] }
 0x22b   : > { %15535 = vmatmul.mubr.f32.vlgmr.msra.gmra.mrb[8].mxu1 %v19228_v53  ;;  %v4437_v2 = vand.u32 4294901760, %v4436_v19 }
 0x22c   : > { %16965 = vmatpush3.bf16.msra.mxu1 %v16962_v16  ;;  %15537 = vmatprep.mubr.f32.mxu1 %v19271_v40 }
 0x22d   : > { %15727 = vmatmul.mubr.f32.vlgmr.msra.gmra.mrb[0].mxu0 %v19215_v45  ;;  %16967 = vmatprep.subr.bf16.mxu1 %v19535_v62 }
 0x22e   : > { %17013 = vmatpush3.bf16.msra.mxu0 %v16962_v16  ;;  %15729 = vmatprep.mubr.f32.mxu0 %v19256_v26 }
 0x22f   : > { %15538 = vmatmul.mubr.f32.gmra.mrb[10].mxu1 %v19326_v50  ;;  %17015 = vmatprep.subr.bf16.mxu0 %v19535_v62 }
 0x230   : > { %15540 = vmatprep.mubr.f32.mxu1 %v19354_v63 }
 0x231   : > { %15730 = vmatmul.mubr.f32.gmra.mrb[2].mxu0 %v19295_v14 }
 0x232   : > { %15732 = vmatprep.mubr.f32.mxu0 %v19339_v42 }
 0x233   : > { %15541 = vmatmul.mubr.f32.gmra.mrb[12].mxu1 %v19392_v30 }
 0x234   : > { %15543 = vmatprep.mubr.f32.mxu1 %v19441_v18 }
 0x235   : > { %15733 = vmatmul.mubr.f32.gmra.mrb[4].mxu0 %v21670_v4 }
 0x236   : > { %15735 = vmatprep.mubr.f32.mxu0 %v21671_v17 }
 0x237   : > { %15544 = vmatmul.mubr.f32.gmra.mrb[14].mxu1 %v21672_v20 }
 0x238   : > { %15550 = vmatprep.mubr.f32.mxu1 %v19177_v8 }
 0x239   : > { %15736 = vmatmul.mubr.f32.gmra.mrb[6].mxu0 %v21673_v35 }
 0x23a   : > { %15742 = vmatprep.mubr.f32.mxu0 %v19164_v58 }
 0x23b   : > { %15551 = vmatmul.mubr.f32.vlgmr.msra.gmra.mrb[8].mxu1 %v19205_v37 }
 0x23c   : > { %16969 = vmatpush3.bf16.msra.mxu1 %v19535_v62  ;;  %15553 = vmatprep.mubr.f32.mxu1 %v19245_v3 }
 0x23d   : > { %15743 = vmatmul.mubr.f32.vlgmr.msra.gmra.mrb[0].mxu0 %v19190_v23 }
 0x23e   : > { %17017 = vmatpush3.bf16.msra.mxu0 %v19535_v62  ;;  %15745 = vmatprep.mubr.f32.mxu0 %v19230_v54 }
 0x23f   : > { %15554 = vmatmul.mubr.f32.gmra.mrb[10].mxu1 %v19305_v39 }
 0x240   : > { %15556 = vmatprep.mubr.f32.mxu1 %v19331_v33 }
 0x241   : > { %15746 = vmatmul.mubr.f32.gmra.mrb[2].mxu0 %v19273_v41 }
 0x242   : > { %15748 = vmatprep.mubr.f32.mxu0 %v19316_v12 }
 0x243   : > { %15557 = vmatmul.mubr.f32.gmra.mrb[12].mxu1 %v19369_v43 }
 0x244   : > { %15559 = vmatprep.mubr.f32.mxu1 %v19419_v44 }
 0x245   : > { %15749 = vmatmul.mubr.f32.gmra.mrb[4].mxu0 %v19346_v49 }
 0x246   : > { %15751 = vmatprep.mubr.f32.mxu0 %v19394_v24 }
 0x247   : > { %15560 = vmatmul.mubr.f32.gmra.mrb[14].mxu1 %v19450_v52 }
 0x248   : > { %15566 = vmatprep.mubr.f32.mxu1 %v19177_v8 }
 0x249   : > { %15752 = vmatmul.mubr.f32.gmra.mrb[6].mxu0 %v19436_v55 }
 0x24a   : > { %15758 = vmatprep.mubr.f32.mxu0 %v19164_v58 }
 0x24b   : > { %15567 = vmatmul.mubr.f32.vlgmr.msra.gmra.mrb[8].mxu1 %v19205_v37 }
 0x24c   : > { %15569 = vmatprep.mubr.f32.mxu1 %v19245_v3 }
 0x24d   : > { %15759 = vmatmul.mubr.f32.vlgmr.msra.gmra.mrb[0].mxu0 %v19190_v23 }
 0x24e   : > { %15761 = vmatprep.mubr.f32.mxu0 %v19230_v54 }
 0x24f   : > { %15570 = vmatmul.mubr.f32.gmra.mrb[10].mxu1 %v19305_v39 }
 0x250   : > { %15572 = vmatprep.mubr.f32.mxu1 %v19331_v33 }
 0x251   : > { %15762 = vmatmul.mubr.f32.gmra.mrb[2].mxu0 %v19273_v41 }
 0x252   : > { %15764 = vmatprep.mubr.f32.mxu0 %v19316_v12 }
 0x253   : > { %15573 = vmatmul.mubr.f32.gmra.mrb[12].mxu1 %v19369_v43 }
 0x254   : > { %15575 = vmatprep.mubr.f32.mxu1 %v19419_v44 }
 0x255   : > { %15765 = vmatmul.mubr.f32.gmra.mrb[4].mxu0 %v19346_v49  ;;  %v745_v49 = vld [vmem:[%s21674_s18 + $0x8] sm:$0xff] }
 0x256   : > { %15767 = vmatprep.mubr.f32.mxu0 %v19394_v24  ;;  %v4289_v30 = vand.u32 4294901760, %v745_v49 }
 0x257   : > { %15576 = vmatmul.mubr.f32.gmra.mrb[14].mxu1 %v19450_v52 }
 0x258   : > { %v19702_v44 = vpack.c.bf16 %v4289_v30, %v4286_v56 }
 0x259   : > { %15768 = vmatmul.mubr.f32.gmra.mrb[6].mxu0 %v19436_v55  ;;  %v4441_v55 = vsub.f32 %v745_v49, %v4289_v30 }
 0x25a   : > { %17019 = vmatprep.subr.bf16.mxu1 %v19702_v44  ;;  %17067 = vmatprep.subr.bf16.mxu0 %v19702_v44 }
 0x25b   : > { %17021 = vmatpush3.bf16.msra.mxu1 %v19702_v44  ;;  %17069 = vmatpush3.bf16.msra.mxu0 %v19702_v44  ;;  %v4442_v18 = vand.u32 4294901760, %v4441_v55  ;;  %v19712_v31 = vpack.c.bf16 %v4441_v55, %v4434_v59 }
 0x25d   : > { %v4443_v52 = vsub.f32 %v4441_v55, %v4442_v18  ;;  %21676 = vst [vmem:[#allocation43_spill] sm:$0xff] %v19712_v31  ;;  %v19714_v5 = vpack.c.bf16 %v4442_v18, %v4435_v25 }
 0x25f   : > { %v4444_v15 = vand.u32 4294901760, %v4443_v52  ;;  %21677 = vst [vmem:[#allocation46_spill] sm:$0xff] %v19714_v5 }
 0x261   : > { %v19708_v60 = vpack.c.bf16 %v4444_v15, %v4437_v2 }
 0x263   : > { %21675 = vst [vmem:[#allocation44_spill] sm:$0xff] %v19708_v60  ;;  %17023 = vmatprep.subr.bf16.mxu1 %v19708_v60  ;;  %17071 = vmatprep.subr.bf16.mxu0 %v19708_v60 }
 0x2be   : > { %v15472_v58 = vpop.f32.mrb[0].mxu1 }
 0x2bf   : > { %v1647_v8 = vpop.f32.mrb[1].mxu1 }
 0x2c2   : > { %v15475_v23 = vpop.f32.mrb[2].mxu1 }
 0x2c3   : > { %v1659_v36 = vpop.f32.mrb[3].mxu1 }
 0x2c6   : > { %v15478_v37 = vpop.f32.mrb[4].mxu1 }
 0x2c7   : > { %v1671_v45 = vpop.f32.mrb[5].mxu1 }
 0x2ca   : > { %v15481_v46 = vpop.f32.mrb[6].mxu1 }
 0x2cb   : > { %v1683_v53 = vpop.f32.mrb[7].mxu1 }
 0x31e   : > { %v15568_v54 = vpop.f32.mrb[8].mxu1 }
 0x31f   : > { %v2478_v43 = vsub.f32 %v15472_v58, %v15568_v54  ;;  %v2431_v63 = vpop.f32.mrb[9].mxu1 }
 0x320   : > { %v15760_v1 = vpop.f32.mrb[0].mxu0  ;;  %v2477_v3 = vsub.f32 %v1647_v8, %v2431_v63 }
 0x321   : > { %v3959_v26 = vpop.f32.mrb[1].mxu0 }
 0x322   : > { %4133 = vxpose.xlu0.b32.start [1/2] (short) (narrow) %v3959_v26, 16  ;;  %v15571_v28 = vpop.f32.mrb[10].mxu1 }
 0x323   : > { %v2480_v40 = vsub.f32 %v15475_v23, %v15571_v28  ;;  %v2443_v41 = vpop.f32.mrb[11].mxu1 }
 0x324   : > { %v15763_v57 = vpop.f32.mrb[2].mxu0  ;;  %v2479_v14 = vsub.f32 %v1659_v36, %v2443_v41 }
 0x325   : > { %v3971_v39 = vpop.f32.mrb[3].mxu0 }
 0x326   : > { %4134 = vxpose.xlu0.b32.end [2/2] (short) (narrow) %v15760_v1, 16  ;;  %4037 = vxpose.xlu1.b32.start [1/2] (short) (narrow) %v2479_v14, 16  ;;  %v15574_v0 = vpop.f32.mrb[12].mxu1 }
 0x327   : > { %v2482_v12 = vsub.f32 %v15478_v37, %v15574_v0  ;;  %v2455_v50 = vpop.f32.mrb[13].mxu1 }
 0x328   : > { %v15766_v32 = vpop.f32.mrb[4].mxu0  ;;  %v2481_v33 = vsub.f32 %v1671_v45, %v2455_v50 }
 0x329   : > { %v3983_v42 = vpop.f32.mrb[5].mxu0 }
 0x32a   : > { %4005 = vxpose.xlu0.b32.start [1/2] (short) (narrow) %v2477_v3, 16  ;;  %4038 = vxpose.xlu1.b32.end [2/2] (short) (narrow) %v2480_v40, 16  ;;  %v15577_v34 = vpop.f32.mrb[14].mxu1 }
 0x32b   : > { %v2484_v24 = vsub.f32 %v15481_v46, %v15577_v34  ;;  %v2467_v6 = vpop.f32.mrb[15].mxu1 }
 0x32c   : > { %v15769_v22 = vpop.f32.mrb[6].mxu0  ;;  %v2483_v38 = vsub.f32 %v1683_v53, %v2467_v6 }
 0x32d   : > { %v3995_v61 = vpop.f32.mrb[7].mxu0 }
 0x32e   : > { %4006 = vxpose.xlu0.b32.end [2/2] (short) (narrow) %v2478_v43, 16  ;;  %4069 = vxpose.xlu1.b32.start [1/2] (short) (narrow) %v2481_v33, 16 }
 0x332   : > { %4165 = vxpose.xlu0.b32.start [1/2] (short) (narrow) %v3971_v39, 16  ;;  %4070 = vxpose.xlu1.b32.end [2/2] (short) (narrow) %v2482_v12, 16 }
 0x336   : > { %4166 = vxpose.xlu0.b32.end [2/2] (short) (narrow) %v15763_v57, 16  ;;  %4101 = vxpose.xlu1.b32.start [1/2] (short) (narrow) %v2483_v38, 16 }
 0x33a   : > { %4197 = vxpose.xlu0.b32.start [1/2] (short) (narrow) %v3983_v42, 16  ;;  %4102 = vxpose.xlu1.b32.end [2/2] (short) (narrow) %v2484_v24, 16 }
 0x33e   : > { %4198 = vxpose.xlu0.b32.end [2/2] (short) (narrow) %v15766_v32, 16  ;;  %4229 = vxpose.xlu1.b32.start [1/2] (short) (narrow) %v3995_v61, 16 }
 0x342   : > { %4230 = vxpose.xlu1.b32.end [2/2] (short) (narrow) %v15769_v22, 16 }
 0x3a2   : > { %v4149_v51 = vpop.trf.xlu0 }
 0x3a3   : > { %v5046_v47 = vsel %vm908_vm0, %v4149_v51, 0 }
 0x3a4   : > { %v19717_v62 = vand.u32 4294901760, %v5046_v47 }
 0x3a6   : > { %v19720_v13 = vsub.f32 %v5046_v47, %v19717_v62  ;;  %v4150_v21 = vpop.trf.xlu0  ;;  %v4053_v29 = vpop.trf.xlu1 }
 0x3a7   : > { %v5049_v10 = vsel %vm908_vm0, %v4150_v21, 0  ;;  %v4268_v7 = vsel %vm908_vm0, %v4053_v29, 0 }
 0x3a8   : > { %v19724_v27 = vand.u32 4294901760, %v5049_v10  ;;  %v19727_v11 = vand.u32 4294901760, %v19720_v13  ;;  %v19729_v9 = vand.u32 4294901760, %v4268_v7 }
 0x3aa   : > { %v19732_v16 = vsub.f32 %v5049_v10, %v19724_v27  ;;  %v4021_v4 = vpop.trf.xlu0  ;;  %v4054_v17 = vpop.trf.xlu1  ;;  %v5139_v20 = vsub.f32 %v19720_v13, %v19727_v11  ;;  %v19748_v45 = vsub.f32 %v4268_v7, %v19729_v9 }
 0x3ab   : > { %v4262_v35 = vsel %vm908_vm0, %v4021_v4, 0  ;;  %v4271_v58 = vsel %vm908_vm0, %v4054_v17, 0 }
 0x3ac   : > { %v19739_v8 = vand.u32 4294901760, %v19732_v16  ;;  %v19741_v23 = vand.u32 4294901760, %v4262_v35  ;;  %v19743_v36 = vand.u32 4294901760, %v4271_v58  ;;  %v19745_v37 = vand.u32 4294901760, %v5139_v20 }
 0x3ad   : > { %v19771_v57 = vand.u32 4294901760, %v19748_v45 }
 0x3ae   : > { %v5149_v46 = vsub.f32 %v19732_v16, %v19739_v8  ;;  %v19753_v53 = vsub.f32 %v4262_v35, %v19741_v23  ;;  %15966 = vmatprep.mubr.f32.mxu0 %v19745_v37  ;;  %v4022_v54 = vpop.trf.xlu0  ;;  %v4085_v43 = vpop.trf.xlu1  ;;  %v19757_v63 = vsub.f32 %v4271_v58, %v19743_v36 }
 0x3af   : > { %v4265_v1 = vsel %vm908_vm0, %v4022_v54, 0  ;;  %v4274_v3 = vsel %vm908_vm0, %v4085_v43, 0  ;;  %v4375_v30 = vsub.f32 %v19748_v45, %v19771_v57 }
 0x3b0   : > { %v19761_v26 = vand.u32 4294901760, %v5149_v46  ;;  %v19763_v28 = vand.u32 4294901760, %v4265_v1  ;;  %v19765_v40 = vand.u32 4294901760, %v4274_v3  ;;  %v19768_v41 = vand.u32 4294901760, %v19753_v53 }
 0x3b1   : > { %v19785_v42 = vand.u32 4294901760, %v19757_v63  ;;  %v19825_v51 = vand.u32 4294901760, %v4375_v30 }
 0x3b2   : > { %v19774_v14 = vsub.f32 %v4265_v1, %v19763_v28  ;;  %v19777_v39 = vsub.f32 %v4274_v3, %v19765_v40  ;;  %v4181_v0 = vpop.trf.xlu0  ;;  %15967 = vmatmul.mubr.f32.vlgmr.msra.gmra.mrb[8].mxu0 %v19761_v26  ;;  %v4086_v12 = vpop.trf.xlu1  ;;  %v4355_v50 = vsub.f32 %v19753_v53, %v19768_v41 }
 0x3b3   : > { %v5052_v32 = vsel %vm908_vm0, %v4181_v0, 0  ;;  %v4277_v33 = vsel %vm908_vm0, %v4086_v12, 0  ;;  %17073 = vmatpush3.bf16.msra.mxu0 %v19708_v60  ;;  %v4385_v18 = vsub.f32 %v19757_v63, %v19785_v42  ;;  %21679 = vst [vmem:[#allocation45_spill] sm:$0xff] %v19825_v51 }
 0x3b4   : > { %v19789_v48 = vand.u32 4294901760, %v19774_v14  ;;  %v19791_v49 = vand.u32 4294901760, %v5052_v32  ;;  %v19793_v34 = vand.u32 4294901760, %v4277_v33  ;;  %v19795_v56 = vand.u32 4294901760, %v4355_v50  ;;  %17075 = vmatprep.subr.bf16.mxu0 %v19712_v31 }
 0x3b5   : > { %v19801_v24 = vand.u32 4294901760, %v19777_v39  ;;  %v19844_v58 = vand.u32 4294901760, %v4385_v18 }
 0x3b6   : > { %v4365_v6 = vsub.f32 %v19774_v14, %v19789_v48  ;;  %v19806_v22 = vsub.f32 %v5052_v32, %v19791_v49  ;;  %v19809_v38 = vsub.f32 %v4277_v33, %v19793_v34  ;;  %15774 = vmatprep.mubr.f32.mxu1 %v19795_v56  ;;  %v4182_v61 = vpop.trf.xlu0  ;;  %v4117_v59 = vpop.trf.xlu1 }
 0x3b7   : > { %21678 = vst [vmem:[#allocation48_spill] sm:$0xff] %v19801_v24  ;;  %v5055_v55 = vsel %vm908_vm0, %v4182_v61, 0  ;;  %v4280_v25 = vsel %vm908_vm0, %v4117_v59, 0  ;;  %v4395_v47 = vsub.f32 %v19777_v39, %v19801_v24  ;;  %21681 = vst [vmem:[#allocation50_spill] sm:$0xff] %v19844_v58 }
 0x3b8   : > { %v19816_v19 = vand.u32 4294901760, %v4365_v6  ;;  %v19818_v52 = vand.u32 4294901760, %v5055_v55  ;;  %v19820_v2 = vand.u32 4294901760, %v4280_v25  ;;  %v19823_v15 = vand.u32 4294901760, %v19806_v22 }
 0x3b9   : > { %v19830_v21 = vand.u32 4294901760, %v19809_v38  ;;  %v19859_v0 = vand.u32 4294901760, %v4395_v47 }
 0x3ba   : > { %v19833_v29 = vsub.f32 %v5055_v55, %v19818_v52  ;;  %v19836_v10 = vsub.f32 %v4280_v25, %v19820_v2  ;;  %v4213_v7 = vpop.trf.xlu0  ;;  %15775 = vmatmul.mubr.f32.vlgmr.msra.gmra.mrb[16].mxu1 %v19816_v19  ;;  %v4118_v4 = vpop.trf.xlu1  ;;  %v5159_v17 = vsub.f32 %v19806_v22, %v19823_v15 }
 0x3bb   : > { %21680 = vst [vmem:[#allocation47_spill] sm:$0xff] %v19830_v21  ;;  %v5058_v20 = vsel %vm908_vm0, %v4213_v7, 0  ;;  %15777 = vmatprep.mubr.f32.mxu1 %v19825_v51  ;;  %v4283_v35 = vsel %vm908_vm0, %v4118_v4, 0  ;;  %17025 = vmatpush3.bf16.msra.mxu1 %v19708_v60  ;;  %v4405_v46 = vsub.f32 %v19809_v38, %v19830_v21  ;;  %21682 = vst [vmem:[#allocation53_spill] sm:$0xff] %v19859_v0 }
 0x3bc   : > { %v19849_v54 = vand.u32 4294901760, %v5058_v20  ;;  %v19851_v43 = vand.u32 4294901760, %v4283_v35  ;;  %v19853_v1 = vand.u32 4294901760, %v5159_v17  ;;  %v19856_v3 = vand.u32 4294901760, %v19833_v29  ;;  %17027 = vmatprep.subr.bf16.mxu1 %v19712_v31 }
 0x3bd   : > { %v19862_v12 = vand.u32 4294901760, %v19836_v10  ;;  %v19877_v55 = vand.u32 4294901760, %v4405_v46 }
 0x3be   : > { %v19865_v50 = vsub.f32 %v5058_v20, %v19849_v54  ;;  %v19868_v32 = vsub.f32 %v4283_v35, %v19851_v43  ;;  %v4214_v33 = vpop.trf.xlu0  ;;  %15778 = vmatmul.mubr.f32.gmra.mrb[18].mxu1 %v19844_v58  ;;  %15969 = vmatprep.mubr.f32.mxu0 %v19853_v1  ;;  %v4245_v30 = vpop.trf.xlu1  ;;  %v5169_v6 = vsub.f32 %v19833_v29, %v19856_v3 }
 0x3bf   : > { %21683 = vst [vmem:[#allocation49_spill] sm:$0xff] %v19862_v12  ;;  %v5061_v61 = vsel %vm908_vm0, %v4214_v33, 0  ;;  %15780 = vmatprep.mubr.f32.mxu1 %v19859_v0  ;;  %v5064_v59 = vsel %vm908_vm0, %v4245_v30, 0  ;;  %21684 = vst [vmem:[#allocation51_spill] sm:$0xff] %v19877_v55  ;;  %v4415_v25 = vsub.f32 %v19836_v10, %v19862_v12 }
 0x3c0   : > { %v19881_v18 = vand.u32 4294901760, %v5061_v61  ;;  %v19883_v47 = vand.u32 4294901760, %v5064_v59  ;;  %v19885_v7 = vand.u32 4294901760, %v5169_v6  ;;  %v19888_v4 = vand.u32 4294901760, %v19865_v50 }
 0x3c1   : > { %v19890_v17 = vand.u32 4294901760, %v4415_v25  ;;  %v19893_v20 = vand.u32 4294901760, %v19868_v32 }
 0x3c2   : > { %v19896_v35 = vsub.f32 %v5061_v61, %v19881_v18  ;;  %v19899_v46 = vsub.f32 %v5064_v59, %v19883_v47  ;;  %15781 = vmatmul.mubr.f32.gmra.mrb[20].mxu1 %v19877_v55  ;;  %15970 = vmatmul.mubr.f32.gmra.mrb[10].mxu0 %v19885_v7  ;;  %v4246_v33 = vpop.trf.xlu1  ;;  %v5179_v30 = vsub.f32 %v19865_v50, %v19888_v4 }
 0x3c3   : > { %21685 = vst [vmem:[#allocation52_spill] sm:$0xff] %v19890_v17  ;;  %21686 = vst [vmem:[#allocation55_spill] sm:$0xff] %v19893_v20  ;;  %v5067_v6 = vsel %vm908_vm0, %v4246_v33, 0  ;;  %15783 = vmatprep.mubr.f32.mxu1 %v19890_v17  ;;  %v4425_v25 = vsub.f32 %v19868_v32, %v19893_v20 }
 0x3c4   : > { %v19909_v61 = vand.u32 4294901760, %v5067_v6  ;;  %v19911_v60 = vand.u32 4294901760, %v5179_v30  ;;  %v19914_v59 = vand.u32 4294901760, %v19896_v35  ;;  %v19917_v55 = vand.u32 4294901760, %v19899_v46 }
 0x3c5   : > { %v19919_v0 = vand.u32 4294901760, %v4425_v25 }
 0x3c6   : > { %v19922_v58 = vsub.f32 %v5067_v6, %v19909_v61  ;;  %15972 = vmatprep.mubr.f32.mxu0 %v19911_v60  ;;  %v5189_v33 = vsub.f32 %v19896_v35, %v19914_v59  ;;  %v5199_v30 = vsub.f32 %v19899_v46, %v19917_v55 }
 0x3c7   : > { %15784 = vmatmul.mubr.f32.gmra.mrb[22].mxu1 %v19919_v0 }
 0x3c8   : > { %15790 = vmatprep.mubr.f32.mxu1 %v19741_v23  ;;  %v19931_v17 = vand.u32 4294901760, %v5189_v33  ;;  %v19933_v51 = vand.u32 4294901760, %v5199_v30  ;;  %v19936_v25 = vand.u32 4294901760, %v19922_v58  ;;  %v19996_v30 = vld [vmem:[%s21688_s8] sm:$0xff] }
 0x3c9   : > { %21689 = vst [vmem:[#allocation57_spill] sm:$0xff] %v19996_v30 }
 0x3ca   : > { %21687 = vst [vmem:[#allocation58_spill] sm:$0xff] %v19936_v25  ;;  %15973 = vmatmul.mubr.f32.gmra.mrb[12].mxu0 %v19931_v17  ;;  %v5209_v6 = vsub.f32 %v19922_v58, %v19936_v25 }
 0x3cb   : > { %15791 = vmatmul.mubr.f32.vlgmr.msra.gmra.mrb[16].mxu1 %v19763_v28  ;;  %15975 = vmatprep.mubr.f32.mxu0 %v19933_v51 }
 0x3cc   : > { %15793 = vmatprep.mubr.f32.mxu1 %v19729_v9  ;;  %17029 = vmatpush3.bf16.msra.mxu1 %v19712_v31  ;;  %v19945_v33 = vand.u32 4294901760, %v5209_v6  ;;  %v20001_v6 = vld [vmem:[%s21688_s8 + $0x8] sm:$0xff] }
 0x3cd   : > { %17031 = vmatprep.subr.bf16.mxu1 %v19702_v44  ;;  %21690 = vst [vmem:[#allocation59_spill] sm:$0xff] %v20001_v6 }
 0x3ce   : > { %15976 = vmatmul.mubr.f32.gmra.mrb[14].mxu0 %v19945_v33 }
 0x3cf   : > { %15794 = vmatmul.mubr.f32.gmra.mrb[18].mxu1 %v19743_v36  ;;  %15982 = vmatprep.mubr.f32.mxu0 %v19717_v62 }
 0x3d0   : > { %15796 = vmatprep.mubr.f32.mxu1 %v19765_v40 }
 0x3d2   : > { %15983 = vmatmul.mubr.f32.vlgmr.msra.gmra.mrb[8].mxu0 %v19724_v27 }
 0x3d3   : > { %15797 = vmatmul.mubr.f32.gmra.mrb[20].mxu1 %v19793_v34  ;;  %17077 = vmatpush3.bf16.msra.mxu0 %v19712_v31  ;;  %v5070_v31 = vand.u32 4294901760, %v19996_v30 }
 0x3d4   : > { %15799 = vmatprep.mubr.f32.mxu1 %v19820_v2  ;;  %15985 = vmatprep.mubr.f32.mxu0 %v19791_v49 }
 0x3d5   : > { %17079 = vmatprep.subr.bf16.mxu0 %v19702_v44 }
 0x3d6   : > { %15986 = vmatmul.mubr.f32.gmra.mrb[10].mxu0 %v19818_v52 }
 0x3d7   : > { %15800 = vmatmul.mubr.f32.gmra.mrb[22].mxu1 %v19851_v43  ;;  %15988 = vmatprep.mubr.f32.mxu0 %v19849_v54 }
 0x3d8   : > { %15806 = vmatprep.mubr.f32.mxu1 %v19753_v53 }
 0x3da   : > { %15989 = vmatmul.mubr.f32.gmra.mrb[12].mxu0 %v19881_v18 }
 0x3db   : > { %15807 = vmatmul.mubr.f32.vlgmr.msra.gmra.mrb[16].mxu1 %v19774_v14  ;;  %15991 = vmatprep.mubr.f32.mxu0 %v19883_v47 }
 0x3dc   : > { %15809 = vmatprep.mubr.f32.mxu1 %v19748_v45  ;;  %17033 = vmatpush3.bf16.msra.mxu1 %v19702_v44 }
 0x3dd   : > { %17035 = vmatprep.subr.bf16.mxu1 %v19714_v5 }
 0x3de   : > { %15992 = vmatmul.mubr.f32.gmra.mrb[14].mxu0 %v19909_v61 }
 0x3df   : > { %15810 = vmatmul.mubr.f32.gmra.mrb[18].mxu1 %v19757_v63  ;;  %15998 = vmatprep.mubr.f32.mxu0 %v19720_v13 }
 0x3e0   : > { %15812 = vmatprep.mubr.f32.mxu1 %v19777_v39 }
 0x3e2   : > { %15999 = vmatmul.mubr.f32.vlgmr.msra.gmra.mrb[8].mxu0 %v19732_v16 }
 0x3e3   : > { %15813 = vmatmul.mubr.f32.gmra.mrb[20].mxu1 %v19809_v38  ;;  %17081 = vmatpush3.bf16.msra.mxu0 %v19702_v44 }
 0x3e4   : > { %15815 = vmatprep.mubr.f32.mxu1 %v19836_v10  ;;  %16001 = vmatprep.mubr.f32.mxu0 %v19806_v22 }
 0x3e5   : > { %17083 = vmatprep.subr.bf16.mxu0 %v19714_v5 }
 0x3e6   : > { %16002 = vmatmul.mubr.f32.gmra.mrb[10].mxu0 %v19833_v29 }
 0x3e7   : > { %15816 = vmatmul.mubr.f32.gmra.mrb[22].mxu1 %v19868_v32  ;;  %16004 = vmatprep.mubr.f32.mxu0 %v19865_v50 }
 0x3e8   : > { %15822 = vmatprep.mubr.f32.mxu1 %v19768_v41 }
 0x3ea   : > { %16005 = vmatmul.mubr.f32.gmra.mrb[12].mxu0 %v19896_v35 }
 0x3eb   : > { %15823 = vmatmul.mubr.f32.vlgmr.msra.gmra.mrb[16].mxu1 %v19789_v48  ;;  %16007 = vmatprep.mubr.f32.mxu0 %v19899_v46 }
 0x3ec   : > { %15825 = vmatprep.mubr.f32.mxu1 %v19771_v57  ;;  %17037 = vmatpush3.bf16.msra.mxu1 %v19714_v5 }
 0x3ed   : > { %17039 = vmatprep.subr.bf16.mxu1 %v19702_v44 }
 0x3ee   : > { %16008 = vmatmul.mubr.f32.gmra.mrb[14].mxu0 %v19922_v58 }
 0x3ef   : > { %15826 = vmatmul.mubr.f32.gmra.mrb[18].mxu1 %v19785_v42  ;;  %16014 = vmatprep.mubr.f32.mxu0 %v19727_v11 }
 0x3f0   : > { %15828 = vmatprep.mubr.f32.mxu1 %v19801_v24  ;;  %v5073_v24 = vand.u32 4294901760, %v20001_v6 }
 0x3f2   : > { %16015 = vmatmul.mubr.f32.vlgmr.msra.gmra.mrb[8].mxu0 %v19739_v8 }
 0x3f3   : > { %15829 = vmatmul.mubr.f32.gmra.mrb[20].mxu1 %v19830_v21  ;;  %17085 = vmatpush3.bf16.msra.mxu0 %v19714_v5  ;;  %v20014_v21 = vpack.c.bf16 %v5073_v24, %v5070_v31  ;;  %v20017_v5 = vsub.f32 %v19996_v30, %v5070_v31 }
 0x3f4   : > { %15831 = vmatprep.mubr.f32.mxu1 %v19862_v12  ;;  %16017 = vmatprep.mubr.f32.mxu0 %v19823_v15  ;;  %v20020_v12 = vsub.f32 %v20001_v6, %v5073_v24 }
 0x3f5   : > { %17087 = vmatprep.subr.bf16.mxu0 %v19702_v44 }
 0x3f6   : > { %16018 = vmatmul.mubr.f32.gmra.mrb[10].mxu0 %v19856_v3  ;;  %v21555_v31 = vand.u32 4294901760, %v20020_v12 }
 0x3f7   : > { %15832 = vmatmul.mubr.f32.gmra.mrb[22].mxu1 %v19893_v20  ;;  %16020 = vmatprep.mubr.f32.mxu0 %v19888_v4  ;;  %v5219_v20 = vand.u32 4294901760, %v20017_v5 }
 0x3f8   : > { %15838 = vmatprep.mubr.f32.mxu1 %v19741_v23  ;;  %v5227_v6 = vsub.f32 %v20020_v12, %v21555_v31 }
 0x3f9   : > { %v5220_v24 = vsub.f32 %v20017_v5, %v5219_v20 }
 0x3fa   : > { %16021 = vmatmul.mubr.f32.gmra.mrb[12].mxu0 %v19914_v59 }
 0x3fb   : > { %15839 = vmatmul.mubr.f32.vlgmr.msra.gmra.mrb[16].mxu1 %v19763_v28  ;;  %16023 = vmatprep.mubr.f32.mxu0 %v19917_v55  ;;  %v5221_v30 = vand.u32 4294901760, %v5220_v24 }
 0x3fc   : > { %15841 = vmatprep.mubr.f32.mxu1 %v19729_v9  ;;  %17041 = vmatpush3.bf16.msra.mxu1 %v19702_v44 }
 0x3fd   : > { %17043 = vmatprep.subr.bf16.mxu1 %v20014_v21 }
 0x3fe   : > { %16024 = vmatmul.mubr.f32.gmra.mrb[14].mxu0 %v19936_v25  ;;  %v5228_v25 = vand.u32 4294901760, %v5227_v6 }
 0x3ff   : > { %15842 = vmatmul.mubr.f32.gmra.mrb[18].mxu1 %v19743_v36  ;;  %16030 = vmatprep.mubr.f32.mxu0 %v19717_v62 }
 0x400   : > { %15844 = vmatprep.mubr.f32.mxu1 %v19765_v40  ;;  %v17046_v31 = vpack.c.bf16 %v5228_v25, %v5221_v30  ;;  %v17050_v25 = vpack.c.bf16 %v20020_v12, %v20017_v5  ;;  %v21697_v5 = vld [vmem:[#allocation58_spill] sm:$0xff] }
 0x402   : > { %16031 = vmatmul.mubr.f32.vlgmr.msra.gmra.mrb[8].mxu0 %v19724_v27 }
 0x403   : > { %15845 = vmatmul.mubr.f32.gmra.mrb[20].mxu1 %v19793_v34  ;;  %17089 = vmatpush3.bf16.msra.mxu0 %v19702_v44 }
 0x404   : > { %15847 = vmatprep.mubr.f32.mxu1 %v19820_v2  ;;  %16033 = vmatprep.mubr.f32.mxu0 %v19791_v49 }
 0x405   : > { %17091 = vmatprep.subr.bf16.mxu0 %v20014_v21 }
 0x406   : > { %16034 = vmatmul.mubr.f32.gmra.mrb[10].mxu0 %v19818_v52 }
 0x407   : > { %15848 = vmatmul.mubr.f32.gmra.mrb[22].mxu1 %v19851_v43  ;;  %16036 = vmatprep.mubr.f32.mxu0 %v19849_v54 }
 0x408   : > { %15854 = vmatprep.mubr.f32.mxu1 %v19741_v23 }
 0x40a   : > { %16037 = vmatmul.mubr.f32.gmra.mrb[12].mxu0 %v19881_v18 }
 0x40b   : > { %15855 = vmatmul.mubr.f32.vlgmr.msra.gmra.mrb[16].mxu1 %v19763_v28  ;;  %16039 = vmatprep.mubr.f32.mxu0 %v19883_v47 }
 0x40c   : > { %15857 = vmatprep.mubr.f32.mxu1 %v19729_v9  ;;  %17045 = vmatpush3.bf16.msra.mxu1 %v20014_v21 }
 0x40d   : > { %17047 = vmatprep.subr.bf16.mxu1 %v17046_v31 }
 0x40e   : > { %16040 = vmatmul.mubr.f32.gmra.mrb[14].mxu0 %v19909_v61 }
 0x40f   : > { %15858 = vmatmul.mubr.f32.gmra.mrb[18].mxu1 %v19743_v36  ;;  %16046 = vmatprep.mubr.f32.mxu0 %v19717_v62 }
 0x410   : > { %15860 = vmatprep.mubr.f32.mxu1 %v19765_v40 }
 0x412   : > { %16047 = vmatmul.mubr.f32.vlgmr.msra.gmra.mrb[8].mxu0 %v19724_v27 }
 0x413   : > { %15861 = vmatmul.mubr.f32.gmra.mrb[20].mxu1 %v19793_v34  ;;  %17093 = vmatpush3.bf16.msra.mxu0 %v20014_v21 }
 0x414   : > { %15863 = vmatprep.mubr.f32.mxu1 %v19820_v2  ;;  %16049 = vmatprep.mubr.f32.mxu0 %v19791_v49 }
 0x415   : > { %17095 = vmatprep.subr.bf16.mxu0 %v17046_v31 }
 0x416   : > { %16050 = vmatmul.mubr.f32.gmra.mrb[10].mxu0 %v19818_v52 }
 0x417   : > { %15864 = vmatmul.mubr.f32.gmra.mrb[22].mxu1 %v19851_v43  ;;  %16052 = vmatprep.mubr.f32.mxu0 %v19849_v54 }
 0x418   : > { %15870 = vmatprep.mubr.f32.mxu1 %v19745_v37  ;;  %v21691_v37 = vld [vmem:[#allocation45_spill] sm:$0xff] }
 0x41a   : > { %16053 = vmatmul.mubr.f32.gmra.mrb[12].mxu0 %v19881_v18 }
 0x41b   : > { %15871 = vmatmul.mubr.f32.vlgmr.msra.gmra.mrb[24].mxu1 %v19761_v26  ;;  %16055 = vmatprep.mubr.f32.mxu0 %v19883_v47  ;;  %v21692_v26 = vld [vmem:[#allocation50_spill] sm:$0xff] }
 0x41c   : > { %15873 = vmatprep.mubr.f32.mxu1 %v19853_v1  ;;  %17049 = vmatpush3.bf16.msra.mxu1 %v17046_v31  ;;  %v21693_v1 = vld [vmem:[#allocation53_spill] sm:$0xff] }
 0x41d   : > { %17051 = vmatprep.subr.bf16.mxu1 %v17050_v25 }
 0x41e   : > { %16056 = vmatmul.mubr.f32.gmra.mrb[14].mxu0 %v19909_v61 }
 0x41f   : > { %15874 = vmatmul.mubr.f32.gmra.mrb[26].mxu1 %v19885_v7  ;;  %16062 = vmatprep.mubr.f32.mxu0 %v19795_v56  ;;  %v21694_v56 = vld [vmem:[#allocation51_spill] sm:$0xff] }
 0x420   : > { %15876 = vmatprep.mubr.f32.mxu1 %v19911_v60  ;;  %v21695_v60 = vld [vmem:[#allocation52_spill] sm:$0xff] }
 0x422   : > { %16063 = vmatmul.mubr.f32.vlgmr.msra.gmra.mrb[8].mxu0 %v19816_v19  ;;  %v21696_v19 = vand.u32 4294901760, %v20020_v12  ;;  %v7395_v12 = vld [vmem:[%s19081_s23] sm:$0xff] }
 0x423   : > { %15877 = vmatmul.mubr.f32.gmra.mrb[28].mxu1 %v19931_v17  ;;  %17097 = vmatpush3.bf16.msra.mxu0 %v17046_v31 }
 0x424   : > { %15879 = vmatprep.mubr.f32.mxu1 %v19933_v51  ;;  %16065 = vmatprep.mubr.f32.mxu0 %v21691_v37  ;;  %v17058_v51 = vpack.c.bf16 %v21696_v19, %v5219_v20 }
 0x425   : > { %17099 = vmatprep.subr.bf16.mxu0 %v17050_v25 }
 0x426   : > { %16066 = vmatmul.mubr.f32.gmra.mrb[10].mxu0 %v21692_v26 }
 0x427   : > { %15880 = vmatmul.mubr.f32.gmra.mrb[30].mxu1 %v19945_v33  ;;  %16068 = vmatprep.mubr.f32.mxu0 %v21693_v1 }
 0x428   : > { %15886 = vmatprep.mubr.f32.mxu1 %v19717_v62 }
 0x42a   : > { %16069 = vmatmul.mubr.f32.gmra.mrb[12].mxu0 %v21694_v56 }
 0x42b   : > { %15887 = vmatmul.mubr.f32.vlgmr.msra.gmra.mrb[24].mxu1 %v19724_v27  ;;  %16071 = vmatprep.mubr.f32.mxu0 %v21695_v60 }
 0x42c   : > { %15889 = vmatprep.mubr.f32.mxu1 %v19791_v49  ;;  %17053 = vmatpush3.bf16.msra.mxu1 %v17050_v25 }
 0x42d   : > { %17055 = vmatprep.subr.bf16.mxu1 %v20014_v21 }
 0x42e   : > { %16072 = vmatmul.mubr.f32.gmra.mrb[14].mxu0 %v19919_v0 }
 0x42f   : > { %15890 = vmatmul.mubr.f32.gmra.mrb[26].mxu1 %v19818_v52  ;;  %16078 = vmatprep.mubr.f32.mxu0 %v19741_v23 }
 0x430   : > { %15892 = vmatprep.mubr.f32.mxu1 %v19849_v54 }
 0x432   : > { %16079 = vmatmul.mubr.f32.vlgmr.msra.gmra.mrb[8].mxu0 %v19763_v28 }
 0x433   : > { %15893 = vmatmul.mubr.f32.gmra.mrb[28].mxu1 %v19881_v18  ;;  %17101 = vmatpush3.bf16.msra.mxu0 %v17050_v25  ;;  %v7367_v25 = vld [vmem:[%s19079_s25 + $0x20] sm:$0xff] }
 0x434   : > { %15895 = vmatprep.mubr.f32.mxu1 %v19883_v47  ;;  %16081 = vmatprep.mubr.f32.mxu0 %v19729_v9 }
 0x435   : > { %17103 = vmatprep.subr.bf16.mxu0 %v20014_v21 }
 0x436   : > { %16082 = vmatmul.mubr.f32.gmra.mrb[10].mxu0 %v19743_v36 }
 0x437   : > { %15896 = vmatmul.mubr.f32.gmra.mrb[30].mxu1 %v19909_v61  ;;  %16084 = vmatprep.mubr.f32.mxu0 %v19765_v40 }
 0x438   : > { %15902 = vmatprep.mubr.f32.mxu1 %v19720_v13  ;;  %v21698_v13 = vld [vmem:[#allocation48_spill] sm:$0xff] }
 0x43a   : > { %16085 = vmatmul.mubr.f32.gmra.mrb[12].mxu0 %v19793_v34 }
 0x43b   : > { %15903 = vmatmul.mubr.f32.vlgmr.msra.gmra.mrb[24].mxu1 %v19732_v16  ;;  %16087 = vmatprep.mubr.f32.mxu0 %v19820_v2  ;;  %v21700_v16 = vld [vmem:[#allocation49_spill] sm:$0xff] }
 0x43c   : > { %15905 = vmatprep.mubr.f32.mxu1 %v19806_v22  ;;  %17057 = vmatpush3.bf16.msra.mxu1 %v20014_v21 }
 0x43d   : > { %17059 = vmatprep.subr.bf16.mxu1 %v17058_v51 }
 0x43e   : > { %16088 = vmatmul.mubr.f32.gmra.mrb[14].mxu0 %v19851_v43 }
 0x43f   : > { %15906 = vmatmul.mubr.f32.gmra.mrb[26].mxu1 %v19833_v29  ;;  %16094 = vmatprep.mubr.f32.mxu0 %v19753_v53 }
 0x440   : > { %15908 = vmatprep.mubr.f32.mxu1 %v19865_v50 }
 0x442   : > { %16095 = vmatmul.mubr.f32.vlgmr.msra.gmra.mrb[8].mxu0 %v19774_v14 }
 0x443   : > { %15909 = vmatmul.mubr.f32.gmra.mrb[28].mxu1 %v19896_v35  ;;  %17105 = vmatpush3.bf16.msra.mxu0 %v20014_v21 }
 0x444   : > { %15911 = vmatprep.mubr.f32.mxu1 %v19899_v46  ;;  %16097 = vmatprep.mubr.f32.mxu0 %v19748_v45  ;;  %v21702_v45 = vld [vmem:[#allocation44_spill] sm:$0xff] }
 0x445   : > { %17107 = vmatprep.subr.bf16.mxu0 %v17058_v51 }
 0x446   : > { %16098 = vmatmul.mubr.f32.gmra.mrb[10].mxu0 %v19757_v63 }
 0x447   : > { %15912 = vmatmul.mubr.f32.gmra.mrb[30].mxu1 %v19922_v58  ;;  %16100 = vmatprep.mubr.f32.mxu0 %v19777_v39  ;;  %v7364_v39 = vld [vmem:[%s19079_s25 + $0x8] sm:$0xff] }
 0x448   : > { %15918 = vmatprep.mubr.f32.mxu1 %v19727_v11  ;;  %v21699_v11 = vld [vmem:[#allocation47_spill] sm:$0xff] }
 0x44a   : > { %16101 = vmatmul.mubr.f32.gmra.mrb[12].mxu0 %v19809_v38 }
 0x44b   : > { %15919 = vmatmul.mubr.f32.vlgmr.msra.gmra.mrb[24].mxu1 %v19739_v8  ;;  %16103 = vmatprep.mubr.f32.mxu0 %v19836_v10  ;;  %v21701_v8 = vld [vmem:[#allocation55_spill] sm:$0xff] }
 0x44c   : > { %15921 = vmatprep.mubr.f32.mxu1 %v19823_v15  ;;  %17061 = vmatpush3.bf16.msra.mxu1 %v17058_v51 }
 0x44d   : > { %17063 = vmatprep.subr.bf16.mxu1 %v20014_v21 }
 0x44e   : > { %16104 = vmatmul.mubr.f32.gmra.mrb[14].mxu0 %v19868_v32 }
 0x44f   : > { %15922 = vmatmul.mubr.f32.gmra.mrb[26].mxu1 %v19856_v3  ;;  %16110 = vmatprep.mubr.f32.mxu0 %v19768_v41  ;;  %v7360_v41 = vstv %s7357_s15  ;;  %s18422_s15 = scalar_lea.vmem %s18421_s7, 1024 }
 0x450   : > { %15924 = vmatprep.mubr.f32.mxu1 %v19888_v4  ;;  %v7368_v4 = vld [vmem:[%s19079_s25 + $0x28] sm:$0xff] }
 0x452   : > { %16111 = vmatmul.mubr.f32.vlgmr.msra.gmra.mrb[8].mxu0 %v19789_v48 }
 0x453   : > { %15925 = vmatmul.mubr.f32.gmra.mrb[28].mxu1 %v19914_v59  ;;  %17109 = vmatpush3.bf16.msra.mxu0 %v17058_v51 }
 0x454   : > { %15927 = vmatprep.mubr.f32.mxu1 %v19917_v55  ;;  %16113 = vmatprep.mubr.f32.mxu0 %v19771_v57  ;;  %v7358_v57 = vld [vmem:[%s19088_s10] sm:$0xff] }
 0x455   : > { %17111 = vmatprep.subr.bf16.mxu0 %v20014_v21  ;;  %v20196_v38 = vmul.f32 %v7360_v41, %v7358_v57 }
 0x456   : > { %16114 = vmatmul.mubr.f32.gmra.mrb[10].mxu0 %v19785_v42 }
 0x457   : > { %15928 = vmatmul.mubr.f32.gmra.mrb[30].mxu1 %v21697_v5  ;;  %16116 = vmatprep.mubr.f32.mxu0 %v21698_v13 }
 0x458   : > { %15934 = vmatprep.mubr.f32.mxu1 %v19717_v62 }
 0x45a   : > { %16117 = vmatmul.mubr.f32.gmra.mrb[12].mxu0 %v21699_v11 }
 0x45b   : > { %15935 = vmatmul.mubr.f32.vlgmr.msra.gmra.mrb[24].mxu1 %v19724_v27  ;;  %16119 = vmatprep.mubr.f32.mxu0 %v21700_v16 }
 0x45c   : > { %15937 = vmatprep.mubr.f32.mxu1 %v19791_v49  ;;  %17065 = vmatpush3.bf16.msra.mxu1 %v20014_v21 }
 0x45d   : > { %17115 = vmatprep.subr.bf16.mxu1 %v19702_v44 }
 0x45e   : > { %16120 = vmatmul.mubr.f32.gmra.mrb[14].mxu0 %v21701_v8 }
 0x45f   : > { %15938 = vmatmul.mubr.f32.gmra.mrb[26].mxu1 %v19818_v52  ;;  %16126 = vmatprep.mubr.f32.mxu0 %v19741_v23 }
 0x460   : > { %15940 = vmatprep.mubr.f32.mxu1 %v19849_v54 }
 0x462   : > { %16127 = vmatmul.mubr.f32.vlgmr.msra.gmra.mrb[8].mxu0 %v19763_v28 }
 0x463   : > { %15941 = vmatmul.mubr.f32.gmra.mrb[28].mxu1 %v19881_v18  ;;  %17113 = vmatpush3.bf16.msra.mxu0 %v20014_v21  ;;  %v7366_v21 = vld [vmem:[%s19079_s25 + $0x18] sm:$0xff] }
 0x464   : > { %15943 = vmatprep.mubr.f32.mxu1 %v19883_v47  ;;  %16129 = vmatprep.mubr.f32.mxu0 %v19729_v9 }
 0x465   : > { %17163 = vmatprep.subr.bf16.mxu0 %v19702_v44 }
 0x466   : > { %16130 = vmatmul.mubr.f32.gmra.mrb[10].mxu0 %v19743_v36 }
 0x467   : > { %15944 = vmatmul.mubr.f32.gmra.mrb[30].mxu1 %v19909_v61  ;;  %16132 = vmatprep.mubr.f32.mxu0 %v19765_v40 }
 0x468   : > { %15950 = vmatprep.mubr.f32.mxu1 %v19717_v62 }
 0x46a   : > { %16133 = vmatmul.mubr.f32.gmra.mrb[12].mxu0 %v19793_v34 }
 0x46b   : > { %15951 = vmatmul.mubr.f32.vlgmr.msra.gmra.mrb[24].mxu1 %v19724_v27  ;;  %16135 = vmatprep.mubr.f32.mxu0 %v19820_v2 }
 0x46c   : > { %15953 = vmatprep.mubr.f32.mxu1 %v19791_v49  ;;  %17117 = vmatpush3.bf16.msra.mxu1 %v19702_v44 }
 0x46d   : > { %17119 = vmatprep.subr.bf16.mxu1 %v21702_v45 }
 0x46e   : > { %16136 = vmatmul.mubr.f32.gmra.mrb[14].mxu0 %v19851_v43 }
 0x46f   : > { %15954 = vmatmul.mubr.f32.gmra.mrb[26].mxu1 %v19818_v52  ;;  %16142 = vmatprep.mubr.f32.mxu0 %v19741_v23 }
 0x470   : > { %15956 = vmatprep.mubr.f32.mxu1 %v19849_v54  ;;  %v7365_v54 = vld [vmem:[%s19079_s25 + $0x10] sm:$0xff] }
 0x472   : > { %16143 = vmatmul.mubr.f32.vlgmr.msra.gmra.mrb[8].mxu0 %v19763_v28 }
 0x473   : > { %15957 = vmatmul.mubr.f32.gmra.mrb[28].mxu1 %v19881_v18  ;;  %16145 = vmatprep.mubr.f32.mxu0 %v19729_v9 }
 0x474   : > { %15959 = vmatprep.mubr.f32.mxu1 %v19883_v47  ;;  %17165 = vmatpush3.bf16.msra.mxu0 %v19702_v44 }
 0x475   : > { %17167 = vmatprep.subr.bf16.mxu0 %v21702_v45 }
 0x476   : > { %16146 = vmatmul.mubr.f32.gmra.mrb[10].mxu0 %v19743_v36 }
 0x477   : > { %15960 = vmatmul.mubr.f32.gmra.mrb[30].mxu1 %v19909_v61  ;;  %16148 = vmatprep.mubr.f32.mxu0 %v19765_v40  ;;  %v7359_v40 = vld [vmem:[%s19088_s10 + $0x8] sm:$0xff] }
 0x478   : > { %v20193_v48 = vmul.f32 %v7360_v41, %v7359_v40 }
 0x47a   : > { %16149 = vmatmul.mubr.f32.gmra.mrb[12].mxu0 %v19793_v34  ;;  %v7363_v34 = vld [vmem:[%s19079_s25] sm:$0xff] }
 0x47b   : > { %16151 = vmatprep.mubr.f32.mxu0 %v19820_v2 }
 0x47e   : > { %16152 = vmatmul.mubr.f32.gmra.mrb[14].mxu0 %v19851_v43  ;;  %v7396_v43 = vld [vmem:[%s19081_s23 + $0x8] sm:$0xff] }
 0x4de   : > { %v15856_v62 = vpop.f32.mrb[16].mxu1 }
 0x4df   : > { %v4999_v27 = vpop.f32.mrb[17].mxu1 }
 0x4e2   : > { %v15859_v9 = vpop.f32.mrb[18].mxu1 }
 0x4e3   : > { %v5011_v23 = vpop.f32.mrb[19].mxu1 }
 0x4e6   : > { %v15862_v53 = vpop.f32.mrb[20].mxu1 }
 0x4e7   : > { %v5023_v36 = vpop.f32.mrb[21].mxu1 }
 0x4ea   : > { %v20186_v63 = vpop.f32.mrb[22].mxu1 }
 0x4eb   : > { %v20188_v28 = vpop.f32.mrb[23].mxu1 }
 0x53e   : > { %v15952_v14 = vpop.f32.mrb[24].mxu1 }
 0x53f   : > { %v5830_v42 = vsub.f32 %v15856_v62, %v15952_v14  ;;  %v5783_v49 = vpop.f32.mrb[25].mxu1 }
 0x540   : > { %v5829_v22 = vsub.f32 %v4999_v27, %v5783_v49  ;;  %v7370_v49 = vld [vmem:[%s19079_s25 + $0x38] sm:$0xff] }
 0x541   : > { %v7372_v52 = vsub.f32 %v7364_v39, %v5830_v42 }
 0x542   : > { %v7371_v2 = vsub.f32 %v7363_v34, %v5829_v22  ;;  %v15955_v15 = vpop.f32.mrb[26].mxu1 }
 0x543   : > { %v7380_v29 = vmul.f32 %v7372_v52, %v20193_v48  ;;  %v5832_v10 = vsub.f32 %v15859_v9, %v15955_v15  ;;  %v5795_v58 = vpop.f32.mrb[27].mxu1  ;;  %v7398_v9 = vld [vmem:[%s19081_s23 + $0x18] sm:$0xff] }
 0x544   : > { %v7379_v3 = vmul.f32 %v7371_v2, %v20196_v38  ;;  %v5831_v0 = vsub.f32 %v5011_v23, %v5795_v58 }
 0x545   : > { %v7388_v50 = vadd.f32 %v7380_v29, %v5830_v42  ;;  %v7374_v32 = vsub.f32 %v7366_v21, %v5832_v10  ;;  %v16144_v55 = vpop.f32.mrb[8].mxu0 }
 0x546   : > { %v7387_v18 = vadd.f32 %v7379_v3, %v5829_v22  ;;  %v7373_v47 = vsub.f32 %v7365_v54, %v5831_v0  ;;  %v15958_v7 = vpop.f32.mrb[28].mxu1  ;;  %v7404_v17 = vsub.f32 %v7396_v43, %v16144_v55  ;;  %v7311_v20 = vpop.f32.mrb[9].mxu0 }
 0x547   : > { %v7431_v35 = vsel %vm908_vm0, %v7388_v50, 0  ;;  %v7382_v46 = vmul.f32 %v7374_v32, %v20193_v48  ;;  %v5834_v61 = vsub.f32 %v15862_v53, %v15958_v7  ;;  %v5807_v59 = vpop.f32.mrb[29].mxu1  ;;  %v7403_v33 = vsub.f32 %v7395_v12, %v7311_v20  ;;  %v7397_v50 = vld [vmem:[%s19081_s23 + $0x10] sm:$0xff]  ;;  %v7400_v32 = vld [vmem:[%s19081_s23 + $0x28] sm:$0xff] }
 0x548   : > { %v20207_v30 = vand.u32 4294901760, %v7431_v35  ;;  %v7428_v6 = vsel %vm908_vm0, %v7387_v18, 0  ;;  %v7381_v31 = vmul.f32 %v7373_v47, %v20196_v38  ;;  %v7412_v24 = vmul.f32 %v7404_v17, %v20193_v48 }
 0x549   : > { %v20213_v37 = vand.u32 4294901760, %v7428_v6  ;;  %v7390_v26 = vadd.f32 %v7382_v46, %v5832_v10  ;;  %v7376_v1 = vsub.f32 %v7368_v4, %v5834_v61  ;;  %v5833_v56 = vsub.f32 %v5023_v36, %v5807_v59  ;;  %v16147_v60 = vpop.f32.mrb[10].mxu0  ;;  %v7399_v4 = vld [vmem:[%s19081_s23 + $0x20] sm:$0xff] }
 0x54a   : > { %v20216_v19 = vsub.f32 %v7431_v35, %v20207_v30  ;;  %v7389_v51 = vadd.f32 %v7381_v31, %v5831_v0  ;;  %v7420_v5 = vadd.f32 %v16144_v55, %v7412_v24  ;;  %v7411_v13 = vmul.f32 %v7403_v33, %v20196_v38  ;;  %v15961_v11 = vpop.f32.mrb[30].mxu1  ;;  %v20219_v16 = vpop.f32.mrb[11].mxu0 }
 0x54b   : > { %v7437_v8 = vsel %vm908_vm0, %v7390_v26, 0  ;;  %v7384_v62 = vmul.f32 %v7376_v1, %v20193_v48  ;;  %v7375_v27 = vsub.f32 %v7367_v25, %v5833_v56  ;;  %v5819_v23 = vpop.f32.mrb[31].mxu1  ;;  %v20225_v53 = vsub.f32 %v7428_v6, %v20213_v37  ;;  %v7402_v25 = vld [vmem:[%s19081_s23 + $0x38] sm:$0xff] }
 0x54c   : > { %v20227_v36 = vand.u32 4294901760, %v7437_v8  ;;  %v7434_v40 = vsel %vm908_vm0, %v7389_v51, 0  ;;  %v8215_v41 = vsel %vm908_vm0, %v7420_v5, 0  ;;  %v20238_v22 = vand.u32 4294901760, %v20216_v19 }
 0x54d   : > { %v20231_v57 = vand.u32 4294901760, %v7434_v40  ;;  %v7392_v14 = vadd.f32 %v7384_v62, %v5834_v61  ;;  %v20233_v39 = vand.u32 4294901760, %v8215_v41  ;;  %v7383_v42 = vmul.f32 %v7375_v27, %v20196_v38  ;;  %v16150_v34 = vpop.f32.mrb[12].mxu0 }
 0x54e   : > { %v7419_v52 = vadd.f32 %v7411_v13, %v7311_v20  ;;  %v5836_v2 = vsub.f32 %v20186_v63, %v15961_v11  ;;  %v7406_v15 = vsub.f32 %v7398_v9, %v16147_v60  ;;  %v7335_v21 = vpop.f32.mrb[13].mxu0  ;;  %v20242_v29 = vsub.f32 %v7437_v8, %v20227_v36  ;;  %v7369_v63 = vld [vmem:[%s19079_s25 + $0x30] sm:$0xff]  ;;  %s14404_s25 = sld [smem:[#allocation2 + $0x1]] }
 0x54f   : > { %v7443_v10 = vsel %vm908_vm0, %v7392_v14, 0  ;;  %v20246_v58 = vsub.f32 %v8215_v41, %v20233_v39  ;;  %v7391_v54 = vadd.f32 %v7383_v42, %v5833_v56  ;;  %v20256_v55 = vsub.f32 %v7434_v40, %v20231_v57 }
 0x550   : > { %v20248_v43 = vand.u32 4294901760, %v7443_v10  ;;  %v8212_v3 = vsel %vm908_vm0, %v7419_v52, 0  ;;  %v7378_v0 = vsub.f32 %v7370_v49, %v5836_v2  ;;  %v7414_v12 = vmul.f32 %v7406_v15, %v20193_v48 }
 0x551   : > { %v7440_v18 = vsel %vm908_vm0, %v7391_v54, 0  ;;  %v20259_v47 = vand.u32 4294901760, %v8212_v3  ;;  %v5835_v7 = vsub.f32 %v20188_v28, %v5819_v23  ;;  %v16153_v17 = vpop.f32.mrb[14].mxu0  ;;  %v20267_v35 = vand.u32 4294901760, %v20246_v58  ;;  %v7401_v28 = vld [vmem:[%s19081_s23 + $0x30] sm:$0xff]  ;;  %s21327_s23 = scalar_lea.vmem [#allocation19], %s19051_s24 }
 0x552   : > { %v20264_v20 = vsub.f32 %v7443_v10, %v20248_v43  ;;  %v7386_v46 = vmul.f32 %v7378_v0, %v20193_v48  ;;  %v7422_v61 = vadd.f32 %v16147_v60, %v7414_v12  ;;  %v7347_v59 = vpop.f32.mrb[15].mxu0  ;;  %v20270_v33 = vand.u32 4294901760, %v7440_v18  ;;  %s14424_s24 = sshll.u32 %s21629_s2, 9 }
 0x553   : > { %v7377_v6 = vsub.f32 %v7369_v63, %v5835_v7  ;;  %v7405_v31 = vsub.f32 %v7397_v50, %v20219_v16  ;;  %v7408_v24 = vsub.f32 %v7400_v32, %v16150_v34  ;;  %v20276_v26 = vsub.f32 %v8212_v3, %v20259_v47  ;;  %s21368_s27 = scalar_lea.hbm %s21752_s16, %s14424_s24  ;;  %s21377_s20 = scalar_lea.hbm %s21753_s29, %s14424_s24 }
 0x554   : > { %v7394_v1 = vadd.f32 %v7386_v46, %v5836_v2  ;;  %v8221_v56 = vsel %vm908_vm0, %v7422_v61, 0  ;;  %v7407_v51 = vsub.f32 %v7399_v4, %v7335_v21  ;;  %v7410_v27 = vsub.f32 %v7402_v25, %v16153_v17  ;;  %s13875_s6 = ssub.f32 1.0, %s14404_s25 }
 0x555   : > { %v20279_v5 = vand.u32 4294901760, %v8221_v56  ;;  %v7385_v60 = vmul.f32 %v7377_v6, %v20196_v38  ;;  %v7413_v13 = vmul.f32 %v7405_v31, %v20196_v38  ;;  %v7416_v11 = vmul.f32 %v7408_v24, %v20193_v48 }
 0x556   : > { %v7449_v8 = vsel %vm908_vm0, %v7394_v1, 0  ;;  %v7415_v62 = vmul.f32 %v7407_v51, %v20196_v38  ;;  %v7409_v9 = vsub.f32 %v7401_v28, %v7347_v59  ;;  %v20287_v23 = vsub.f32 %v7440_v18, %v20270_v33 }
 0x557   : > { %v20289_v40 = vand.u32 4294901760, %v7449_v8  ;;  %v7393_v41 = vadd.f32 %v7385_v60, %v5835_v7  ;;  %v7421_v14 = vadd.f32 %v7413_v13, %v20219_v16  ;;  %v7424_v42 = vadd.f32 %v16150_v34, %v7416_v11 }
 0x558   : > { %v7423_v49 = vadd.f32 %v7415_v62, %v7335_v21  ;;  %v7418_v52 = vmul.f32 %v7410_v27, %v20193_v48  ;;  %v7417_v2 = vmul.f32 %v7409_v9, %v20196_v38  ;;  %v20295_v15 = vsub.f32 %v8221_v56, %v20279_v5 }
 0x559   : > { %v7446_v10 = vsel %vm908_vm0, %v7393_v41, 0  ;;  %v8218_v54 = vsel %vm908_vm0, %v7421_v14, 0  ;;  %v20300_v3 = vand.u32 4294901760, %v20225_v53  ;;  %v8227_v16 = vsel %vm908_vm0, %v7424_v42, 0 }
 0x55a   : > { %v20302_v0 = vand.u32 4294901760, %v7446_v10  ;;  %v20304_v12 = vand.u32 4294901760, %v8218_v54  ;;  %v8224_v48 = vsel %vm908_vm0, %v7423_v49, 0  ;;  %v20309_v38 = vsub.f32 %v7449_v8, %v20289_v40 }
 0x55b   : > { %v20311_v34 = vand.u32 4294901760, %v8227_v16  ;;  %v7426_v21 = vadd.f32 %v16153_v17, %v7418_v52  ;;  %v7425_v63 = vadd.f32 %v7417_v2, %v7347_v59  ;;  %v20316_v32 = vand.u32 4294901760, %v8224_v48 }
 0x55c   : > { %v20314_v50 = vsub.f32 %v7446_v10, %v20302_v0  ;;  %v7521_v18 = vsub.f32 %v20225_v53, %v20300_v3  ;;  %v7531_v7 = vsub.f32 %v20216_v19, %v20238_v22  ;;  %v20323_v4 = vsub.f32 %v8218_v54, %v20304_v12 }
 0x55d   : > { %v20326_v46 = vsub.f32 %v8227_v16, %v20311_v34  ;;  %v8233_v17 = vsel %vm908_vm0, %v7426_v21, 0  ;;  %v8230_v61 = vsel %vm908_vm0, %v7425_v63, 0  ;;  %v20339_v25 = vand.u32 4294901760, %v20256_v55  ;;  %v21709_v16 = vld [vmem:[#allocation43_spill] sm:$0xff] }
 0x55e   : > { %v20330_v59 = vand.u32 4294901760, %v8233_v17  ;;  %v20332_v6 = vand.u32 4294901760, %v8230_v61  ;;  %v20334_v31 = vand.u32 4294901760, %v7521_v18  ;;  %v20336_v24 = vand.u32 4294901760, %v7531_v7 }
 0x55f   : > { %v20342_v28 = vand.u32 4294901760, %v20242_v29  ;;  %v20345_v1 = vand.u32 4294901760, %v20276_v26  ;;  %v8315_v56 = vsub.f32 %v20246_v58, %v20267_v35  ;;  %v20350_v51 = vsub.f32 %v8224_v48, %v20316_v32 }
 0x560   : > { %21703 = vst [vmem:[#allocation45_spill] sm:$0xff] %v20334_v31  ;;  %21704 = vst [vmem:[#allocation50_spill] sm:$0xff] %v20336_v24  ;;  %v20353_v60 = vsub.f32 %v8233_v17, %v20330_v59  ;;  %16158 = vmatprep.mubr.f32.mxu1 %v20334_v31  ;;  %v20357_v13 = vand.u32 4294901760, %v20287_v23  ;;  %v20360_v11 = vand.u32 4294901760, %v20264_v20  ;;  %v20363_v8 = vsub.f32 %v8230_v61, %v20332_v6 }
 0x561   : > { %21705 = vst [vmem:[#allocation53_spill] sm:$0xff] %v20342_v28  ;;  %16159 = vmatmul.mubr.f32.vlgmr.msra.gmra.mrb[32].mxu1 %v20336_v24  ;;  %v7541_v62 = vsub.f32 %v20256_v55, %v20339_v25  ;;  %v7551_v27 = vsub.f32 %v20242_v29, %v20342_v28  ;;  %v8305_v9 = vsub.f32 %v20276_v26, %v20345_v1  ;;  %v20373_v41 = vand.u32 4294901760, %v8315_v56 }
 0x562   : > { %21706 = vst [vmem:[#allocation51_spill] sm:$0xff] %v20357_v13  ;;  %17121 = vmatpush3.bf16.msra.mxu1 %v21702_v45  ;;  %v7561_v14 = vsub.f32 %v20287_v23, %v20357_v13  ;;  %v20378_v42 = vand.u32 4294901760, %v20323_v4  ;;  %v20381_v49 = vand.u32 4294901760, %v20295_v15  ;;  %v7571_v10 = vsub.f32 %v20264_v20, %v20360_v11 }
 0x563   : > { %v20383_v52 = vand.u32 4294901760, %v7541_v62  ;;  %v20385_v2 = vand.u32 4294901760, %v8305_v9  ;;  %v20390_v54 = vand.u32 4294901760, %v20314_v50  ;;  %17123 = vmatprep.subr.bf16.mxu1 %v21709_v16  ;;  %v20393_v48 = vand.u32 4294901760, %v7551_v27 }
 0x564   : > { %v20395_v21 = vand.u32 4294901760, %v7561_v14  ;;  %v8325_v63 = vsub.f32 %v20323_v4, %v20378_v42  ;;  %v8335_v18 = vsub.f32 %v20295_v15, %v20381_v49  ;;  %v20406_v17 = vand.u32 4294901760, %v20309_v38 }
 0x565   : > { %21707 = vst [vmem:[#allocation52_spill] sm:$0xff] %v20383_v52  ;;  %21708 = vst [vmem:[#allocation58_spill] sm:$0xff] %v20390_v54  ;;  %16161 = vmatprep.mubr.f32.mxu1 %v20383_v52  ;;  %16350 = vmatprep.mubr.f32.mxu0 %v20385_v2  ;;  %v7581_v7 = vsub.f32 %v20314_v50, %v20390_v54  ;;  %v20409_v61 = vand.u32 4294901760, %v20350_v51  ;;  %v20412_v56 = vand.u32 4294901760, %v20326_v46  ;;  %v20419_v27 = vand.u32 4294901760, %v20363_v8 }
 0x566   : > { %21710 = vst [vmem:[#allocation48_spill] sm:$0xff] %v20393_v48  ;;  %21711 = vst [vmem:[#allocation47_spill] sm:$0xff] %v20395_v21  ;;  %16162 = vmatmul.mubr.f32.gmra.mrb[34].mxu1 %v20393_v48  ;;  %16351 = vmatmul.mubr.f32.vlgmr.msra.gmra.mrb[16].mxu0 %v20373_v41  ;;  %v20416_v62 = vand.u32 4294901760, %v8325_v63  ;;  %v20423_v9 = vand.u32 4294901760, %v7571_v10  ;;  %v20425_v14 = vand.u32 4294901760, %v8335_v18  ;;  %v7591_v63 = vsub.f32 %v20309_v38, %v20406_v17 }
 0x567   : > { %21712 = vst [vmem:[#allocation49_spill] sm:$0xff] %v20406_v17  ;;  %17169 = vmatpush3.bf16.msra.mxu0 %v21702_v45  ;;  %16164 = vmatprep.mubr.f32.mxu1 %v20395_v21  ;;  %v20427_v52 = vand.u32 4294901760, %v7581_v7  ;;  %v8345_v48 = vsub.f32 %v20350_v51, %v20409_v61  ;;  %v8355_v24 = vsub.f32 %v20326_v46, %v20412_v56  ;;  %v20439_v10 = vand.u32 4294901760, %v20353_v60 }
 0x568   : > { %21713 = vst [vmem:[#allocation55_spill] sm:$0xff] %v20416_v62  ;;  %16353 = vmatprep.mubr.f32.mxu0 %v20416_v62  ;;  %v8365_v45 = vsub.f32 %v20363_v8, %v20419_v27  ;;  %17171 = vmatprep.subr.bf16.mxu0 %v21709_v16  ;;  %v20450_v21 = vand.u32 4294901760, %v7591_v63  ;;  %v21716_v63 = vld [vmem:[#allocation59_spill] sm:$0xff] }
 0x569   : > { %v20442_v18 = vand.u32 4294901760, %v8345_v48  ;;  %v20452_v31 = vand.u32 4294901760, %v8355_v24  ;;  %v8375_v62 = vsub.f32 %v20353_v60, %v20439_v10  ;;  %v21714_v24 = vld [vmem:[#allocation46_spill] sm:$0xff] }
 0x56a   : > { %16165 = vmatmul.mubr.f32.gmra.mrb[36].mxu1 %v20423_v9  ;;  %16354 = vmatmul.mubr.f32.gmra.mrb[18].mxu0 %v20425_v14  ;;  %v20448_v7 = vand.u32 4294901760, %v8365_v45  ;;  %v753_v45 = vsub.f32 0.0, %v21716_v63 }
 0x56b   : > { %16167 = vmatprep.mubr.f32.mxu1 %v20427_v52  ;;  %16356 = vmatprep.mubr.f32.mxu0 %v20442_v18  ;;  %v20460_v48 = vand.u32 4294901760, %v8375_v62 }
 0x56e   : > { %16168 = vmatmul.mubr.f32.gmra.mrb[38].mxu1 %v20450_v21  ;;  %16357 = vmatmul.mubr.f32.gmra.mrb[20].mxu0 %v20452_v31 }
 0x56f   : > { %16174 = vmatprep.mubr.f32.mxu1 %v20213_v37  ;;  %16359 = vmatprep.mubr.f32.mxu0 %v20448_v7 }
 0x572   : > { %16175 = vmatmul.mubr.f32.vlgmr.msra.gmra.mrb[32].mxu1 %v20207_v30  ;;  %16360 = vmatmul.mubr.f32.gmra.mrb[22].mxu0 %v20460_v48 }
 0x573   : > { %16177 = vmatprep.mubr.f32.mxu1 %v20231_v57  ;;  %17125 = vmatpush3.bf16.msra.mxu1 %v21709_v16 }
 0x574   : > { %16366 = vmatprep.mubr.f32.mxu0 %v20259_v47  ;;  %17127 = vmatprep.subr.bf16.mxu1 %v19702_v44 }
 0x576   : > { %16178 = vmatmul.mubr.f32.gmra.mrb[34].mxu1 %v20227_v36  ;;  %16367 = vmatmul.mubr.f32.vlgmr.msra.gmra.mrb[16].mxu0 %v20233_v39 }
 0x577   : > { %16180 = vmatprep.mubr.f32.mxu1 %v20270_v33  ;;  %17173 = vmatpush3.bf16.msra.mxu0 %v21709_v16  ;;  %v21715_v16 = vld [vmem:[#allocation57_spill] sm:$0xff] }
 0x578   : > { %16369 = vmatprep.mubr.f32.mxu0 %v20304_v12  ;;  %17175 = vmatprep.subr.bf16.mxu0 %v19702_v44  ;;  %v752_v62 = vsub.f32 0.0, %v21715_v16 }
 0x57a   : > { %16181 = vmatmul.mubr.f32.gmra.mrb[36].mxu1 %v20248_v43  ;;  %16370 = vmatmul.mubr.f32.gmra.mrb[18].mxu0 %v20279_v5 }
 0x57b   : > { %16183 = vmatprep.mubr.f32.mxu1 %v20302_v0  ;;  %16372 = vmatprep.mubr.f32.mxu0 %v20316_v32 }
 0x57e   : > { %16184 = vmatmul.mubr.f32.gmra.mrb[38].mxu1 %v20289_v40  ;;  %16373 = vmatmul.mubr.f32.gmra.mrb[20].mxu0 %v20311_v34 }
 0x57f   : > { %16190 = vmatprep.mubr.f32.mxu1 %v20225_v53  ;;  %16375 = vmatprep.mubr.f32.mxu0 %v20332_v6 }
 0x582   : > { %16191 = vmatmul.mubr.f32.vlgmr.msra.gmra.mrb[32].mxu1 %v20216_v19  ;;  %16376 = vmatmul.mubr.f32.gmra.mrb[22].mxu0 %v20330_v59 }
 0x583   : > { %16193 = vmatprep.mubr.f32.mxu1 %v20256_v55  ;;  %17129 = vmatpush3.bf16.msra.mxu1 %v19702_v44 }
 0x584   : > { %16382 = vmatprep.mubr.f32.mxu0 %v20276_v26  ;;  %17131 = vmatprep.subr.bf16.mxu1 %v21714_v24 }
 0x586   : > { %16194 = vmatmul.mubr.f32.gmra.mrb[34].mxu1 %v20242_v29  ;;  %16383 = vmatmul.mubr.f32.vlgmr.msra.gmra.mrb[16].mxu0 %v20246_v58 }
 0x587   : > { %16196 = vmatprep.mubr.f32.mxu1 %v20287_v23  ;;  %17177 = vmatpush3.bf16.msra.mxu0 %v19702_v44 }
 0x588   : > { %16385 = vmatprep.mubr.f32.mxu0 %v20323_v4  ;;  %17179 = vmatprep.subr.bf16.mxu0 %v21714_v24 }
 0x58a   : > { %16197 = vmatmul.mubr.f32.gmra.mrb[36].mxu1 %v20264_v20  ;;  %16386 = vmatmul.mubr.f32.gmra.mrb[18].mxu0 %v20295_v15 }
 0x58b   : > { %16199 = vmatprep.mubr.f32.mxu1 %v20314_v50  ;;  %16388 = vmatprep.mubr.f32.mxu0 %v20350_v51 }
 0x58e   : > { %16200 = vmatmul.mubr.f32.gmra.mrb[38].mxu1 %v20309_v38  ;;  %16389 = vmatmul.mubr.f32.gmra.mrb[20].mxu0 %v20326_v46 }
 0x58f   : > { %16206 = vmatprep.mubr.f32.mxu1 %v20300_v3  ;;  %16391 = vmatprep.mubr.f32.mxu0 %v20363_v8 }
 0x592   : > { %16207 = vmatmul.mubr.f32.vlgmr.msra.gmra.mrb[32].mxu1 %v20238_v22  ;;  %16392 = vmatmul.mubr.f32.gmra.mrb[22].mxu0 %v20353_v60 }
 0x593   : > { %16209 = vmatprep.mubr.f32.mxu1 %v20339_v25  ;;  %17133 = vmatpush3.bf16.msra.mxu1 %v21714_v24 }
 0x594   : > { %16398 = vmatprep.mubr.f32.mxu0 %v20345_v1  ;;  %17135 = vmatprep.subr.bf16.mxu1 %v19702_v44 }
 0x596   : > { %16210 = vmatmul.mubr.f32.gmra.mrb[34].mxu1 %v20342_v28  ;;  %16399 = vmatmul.mubr.f32.vlgmr.msra.gmra.mrb[16].mxu0 %v20267_v35  ;;  %v8236_v28 = vand.u32 4294901760, %v752_v62 }
 0x597   : > { %16212 = vmatprep.mubr.f32.mxu1 %v20357_v13  ;;  %17181 = vmatpush3.bf16.msra.mxu0 %v21714_v24  ;;  %v8239_v13 = vand.u32 4294901760, %v753_v45 }
 0x598   : > { %16401 = vmatprep.mubr.f32.mxu0 %v20378_v42  ;;  %17183 = vmatprep.subr.bf16.mxu0 %v19702_v44  ;;  %v20526_v16 = vsub.f32 %v752_v62, %v8236_v28 }
 0x599   : > { %v20524_v24 = vpack.c.bf16 %v8239_v13, %v8236_v28  ;;  %v20528_v63 = vsub.f32 %v753_v45, %v8239_v13 }
 0x59a   : > { %16213 = vmatmul.mubr.f32.gmra.mrb[36].mxu1 %v20360_v11  ;;  %16402 = vmatmul.mubr.f32.gmra.mrb[18].mxu0 %v20381_v49 }
 0x59b   : > { %16215 = vmatprep.mubr.f32.mxu1 %v20390_v54  ;;  %16404 = vmatprep.mubr.f32.mxu0 %v20409_v61  ;;  %v8392_v54 = vand.u32 4294901760, %v20528_v63 }
 0x59d   : > { %v8393_v13 = vsub.f32 %v20528_v63, %v8392_v54 }
 0x59e   : > { %16216 = vmatmul.mubr.f32.gmra.mrb[38].mxu1 %v20406_v17  ;;  %16405 = vmatmul.mubr.f32.gmra.mrb[20].mxu0 %v20412_v56  ;;  %v8385_v17 = vand.u32 4294901760, %v20526_v16 }
 0x59f   : > { %16222 = vmatprep.mubr.f32.mxu1 %v20213_v37  ;;  %16407 = vmatprep.mubr.f32.mxu0 %v20419_v27  ;;  %v8394_v62 = vand.u32 4294901760, %v8393_v13  ;;  %v21717_v13 = vld [vmem:[#allocation55_spill] sm:$0xff] }
 0x5a0   : > { %v8386_v28 = vsub.f32 %v20526_v16, %v8385_v17 }
 0x5a2   : > { %16223 = vmatmul.mubr.f32.vlgmr.msra.gmra.mrb[32].mxu1 %v20207_v30  ;;  %16408 = vmatmul.mubr.f32.gmra.mrb[22].mxu0 %v20439_v10 }
 0x5a3   : > { %16225 = vmatprep.mubr.f32.mxu1 %v20231_v57  ;;  %17137 = vmatpush3.bf16.msra.mxu1 %v19702_v44 }
 0x5a4   : > { %16414 = vmatprep.mubr.f32.mxu0 %v20259_v47  ;;  %17139 = vmatprep.subr.bf16.mxu1 %v20524_v24 }
 0x5a6   : > { %16226 = vmatmul.mubr.f32.gmra.mrb[34].mxu1 %v20227_v36  ;;  %16415 = vmatmul.mubr.f32.vlgmr.msra.gmra.mrb[16].mxu0 %v20233_v39 }
 0x5a7   : > { %16228 = vmatprep.mubr.f32.mxu1 %v20270_v33  ;;  %17185 = vmatpush3.bf16.msra.mxu0 %v19702_v44  ;;  %v8387_v44 = vand.u32 4294901760, %v8386_v28  ;;  %v17146_v28 = vpack.c.bf16 %v20528_v63, %v20526_v16 }
 0x5a8   : > { %16417 = vmatprep.mubr.f32.mxu0 %v20304_v12  ;;  %17187 = vmatprep.subr.bf16.mxu0 %v20524_v24 }
 0x5a9   : > { %v17142_v45 = vpack.c.bf16 %v8394_v62, %v8387_v44  ;;  %v21718_v44 = vld [vmem:[#allocation45_spill] sm:$0xff]  ;;  %v21719_v62 = vld [vmem:[#allocation50_spill] sm:$0xff] }
 0x5aa   : > { %16229 = vmatmul.mubr.f32.gmra.mrb[36].mxu1 %v20248_v43  ;;  %16418 = vmatmul.mubr.f32.gmra.mrb[18].mxu0 %v20279_v5 }
 0x5ab   : > { %16231 = vmatprep.mubr.f32.mxu1 %v20302_v0  ;;  %16420 = vmatprep.mubr.f32.mxu0 %v20316_v32 }
 0x5ae   : > { %16232 = vmatmul.mubr.f32.gmra.mrb[38].mxu1 %v20289_v40  ;;  %16421 = vmatmul.mubr.f32.gmra.mrb[20].mxu0 %v20311_v34 }
 0x5af   : > { %16238 = vmatprep.mubr.f32.mxu1 %v20213_v37  ;;  %16423 = vmatprep.mubr.f32.mxu0 %v20332_v6 }
 0x5b2   : > { %16239 = vmatmul.mubr.f32.vlgmr.msra.gmra.mrb[32].mxu1 %v20207_v30  ;;  %16424 = vmatmul.mubr.f32.gmra.mrb[22].mxu0 %v20330_v59 }
 0x5b3   : > { %16241 = vmatprep.mubr.f32.mxu1 %v20231_v57  ;;  %17141 = vmatpush3.bf16.msra.mxu1 %v20524_v24 }
 0x5b4   : > { %16430 = vmatprep.mubr.f32.mxu0 %v20259_v47  ;;  %17143 = vmatprep.subr.bf16.mxu1 %v17142_v45 }
 0x5b6   : > { %16242 = vmatmul.mubr.f32.gmra.mrb[34].mxu1 %v20227_v36  ;;  %16431 = vmatmul.mubr.f32.vlgmr.msra.gmra.mrb[16].mxu0 %v20233_v39 }
 0x5b7   : > { %16244 = vmatprep.mubr.f32.mxu1 %v20270_v33  ;;  %17189 = vmatpush3.bf16.msra.mxu0 %v20524_v24 }
 0x5b8   : > { %16433 = vmatprep.mubr.f32.mxu0 %v20304_v12  ;;  %17191 = vmatprep.subr.bf16.mxu0 %v17142_v45 }
 0x5ba   : > { %16245 = vmatmul.mubr.f32.gmra.mrb[36].mxu1 %v20248_v43  ;;  %16434 = vmatmul.mubr.f32.gmra.mrb[18].mxu0 %v20279_v5 }
 0x5bb   : > { %16247 = vmatprep.mubr.f32.mxu1 %v20302_v0  ;;  %16436 = vmatprep.mubr.f32.mxu0 %v20316_v32 }
 0x5be   : > { %16248 = vmatmul.mubr.f32.gmra.mrb[38].mxu1 %v20289_v40  ;;  %16437 = vmatmul.mubr.f32.gmra.mrb[20].mxu0 %v20311_v34 }
 0x5bf   : > { %16254 = vmatprep.mubr.f32.mxu1 %v20385_v2  ;;  %16439 = vmatprep.mubr.f32.mxu0 %v20332_v6  ;;  %v21720_v2 = vld [vmem:[#allocation52_spill] sm:$0xff] }
 0x5c2   : > { %16255 = vmatmul.mubr.f32.vlgmr.msra.gmra.mrb[40].mxu1 %v20373_v41  ;;  %16440 = vmatmul.mubr.f32.gmra.mrb[22].mxu0 %v20330_v59  ;;  %v21721_v41 = vld [vmem:[#allocation48_spill] sm:$0xff] }
 0x5c3   : > { %16257 = vmatprep.mubr.f32.mxu1 %v21717_v13  ;;  %17145 = vmatpush3.bf16.msra.mxu1 %v17142_v45  ;;  %v21722_v13 = vld [vmem:[#allocation47_spill] sm:$0xff] }
 0x5c4   : > { %16446 = vmatprep.mubr.f32.mxu0 %v21718_v44  ;;  %17147 = vmatprep.subr.bf16.mxu1 %v17146_v28 }
 0x5c6   : > { %16258 = vmatmul.mubr.f32.gmra.mrb[42].mxu1 %v20425_v14  ;;  %16447 = vmatmul.mubr.f32.vlgmr.msra.gmra.mrb[16].mxu0 %v21719_v62 }
 0x5c7   : > { %16260 = vmatprep.mubr.f32.mxu1 %v20442_v18  ;;  %17193 = vmatpush3.bf16.msra.mxu0 %v17142_v45 }
 0x5c8   : > { %16449 = vmatprep.mubr.f32.mxu0 %v21720_v2  ;;  %17195 = vmatprep.subr.bf16.mxu0 %v17146_v28 }
 0x5ca   : > { %16261 = vmatmul.mubr.f32.gmra.mrb[44].mxu1 %v20452_v31  ;;  %16450 = vmatmul.mubr.f32.gmra.mrb[18].mxu0 %v21721_v41  ;;  %v17154_v31 = vpack.c.bf16 %v8392_v54, %v8385_v17 }
 0x5cb   : > { %16263 = vmatprep.mubr.f32.mxu1 %v20448_v7  ;;  %16452 = vmatprep.mubr.f32.mxu0 %v21722_v13 }
 0x5ce   : > { %16264 = vmatmul.mubr.f32.gmra.mrb[46].mxu1 %v20460_v48  ;;  %16453 = vmatmul.mubr.f32.gmra.mrb[20].mxu0 %v20423_v9 }
 0x5cf   : > { %16270 = vmatprep.mubr.f32.mxu1 %v20259_v47  ;;  %16455 = vmatprep.mubr.f32.mxu0 %v20427_v52 }
 0x5d2   : > { %16271 = vmatmul.mubr.f32.vlgmr.msra.gmra.mrb[40].mxu1 %v20233_v39  ;;  %16456 = vmatmul.mubr.f32.gmra.mrb[22].mxu0 %v20450_v21 }
 0x5d3   : > { %16273 = vmatprep.mubr.f32.mxu1 %v20304_v12  ;;  %17149 = vmatpush3.bf16.msra.mxu1 %v17146_v28 }
 0x5d4   : > { %16462 = vmatprep.mubr.f32.mxu0 %v20213_v37  ;;  %17151 = vmatprep.subr.bf16.mxu1 %v20524_v24 }
 0x5d6   : > { %16274 = vmatmul.mubr.f32.gmra.mrb[42].mxu1 %v20279_v5  ;;  %16463 = vmatmul.mubr.f32.vlgmr.msra.gmra.mrb[16].mxu0 %v20207_v30 }
 0x5d7   : > { %16276 = vmatprep.mubr.f32.mxu1 %v20316_v32  ;;  %17197 = vmatpush3.bf16.msra.mxu0 %v17146_v28 }
 0x5d8   : > { %16465 = vmatprep.mubr.f32.mxu0 %v20231_v57  ;;  %17199 = vmatprep.subr.bf16.mxu0 %v20524_v24 }
 0x5da   : > { %16277 = vmatmul.mubr.f32.gmra.mrb[44].mxu1 %v20311_v34  ;;  %16466 = vmatmul.mubr.f32.gmra.mrb[18].mxu0 %v20227_v36 }
 0x5db   : > { %16279 = vmatprep.mubr.f32.mxu1 %v20332_v6  ;;  %16468 = vmatprep.mubr.f32.mxu0 %v20270_v33 }
 0x5de   : > { %16280 = vmatmul.mubr.f32.gmra.mrb[46].mxu1 %v20330_v59  ;;  %16469 = vmatmul.mubr.f32.gmra.mrb[20].mxu0 %v20248_v43 }
 0x5df   : > { %16286 = vmatprep.mubr.f32.mxu1 %v20276_v26  ;;  %16471 = vmatprep.mubr.f32.mxu0 %v20302_v0 }
 0x5e2   : > { %16287 = vmatmul.mubr.f32.vlgmr.msra.gmra.mrb[40].mxu1 %v20246_v58  ;;  %16472 = vmatmul.mubr.f32.gmra.mrb[22].mxu0 %v20289_v40  ;;  %v21727_v58 = vld [vmem:[#allocation41_spill] sm:$0xff] }
 0x5e3   : > { %16289 = vmatprep.mubr.f32.mxu1 %v20323_v4  ;;  %17153 = vmatpush3.bf16.msra.mxu1 %v20524_v24 }
 0x5e4   : > { %16478 = vmatprep.mubr.f32.mxu0 %v20225_v53  ;;  %17155 = vmatprep.subr.bf16.mxu1 %v17154_v31  ;;  %v21724_v53 = vld [vmem:[#allocation51_spill] sm:$0xff] }
 0x5e6   : > { %16290 = vmatmul.mubr.f32.gmra.mrb[42].mxu1 %v20295_v15  ;;  %16479 = vmatmul.mubr.f32.vlgmr.msra.gmra.mrb[16].mxu0 %v20216_v19  ;;  %v21723_v19 = vld [vmem:[#allocation53_spill] sm:$0xff] }
 0x5e7   : > { %16292 = vmatprep.mubr.f32.mxu1 %v20350_v51  ;;  %17201 = vmatpush3.bf16.msra.mxu0 %v20524_v24 }
 0x5e8   : > { %16481 = vmatprep.mubr.f32.mxu0 %v20256_v55  ;;  %17203 = vmatprep.subr.bf16.mxu0 %v17154_v31  ;;  %v21728_v55 = vld [vmem:[#allocation42_spill] sm:$0xff] }
 0x5ea   : > { %16293 = vmatmul.mubr.f32.gmra.mrb[44].mxu1 %v20326_v46  ;;  %16482 = vmatmul.mubr.f32.gmra.mrb[18].mxu0 %v20242_v29  ;;  %v21726_v29 = vld [vmem:[#allocation49_spill] sm:$0xff] }
 0x5eb   : > { %16295 = vmatprep.mubr.f32.mxu1 %v20363_v8  ;;  %16484 = vmatprep.mubr.f32.mxu0 %v20287_v23 }
 0x5ee   : > { %16296 = vmatmul.mubr.f32.gmra.mrb[46].mxu1 %v20353_v60  ;;  %16485 = vmatmul.mubr.f32.gmra.mrb[20].mxu0 %v20264_v20 }
 0x5ef   : > { %16302 = vmatprep.mubr.f32.mxu1 %v20345_v1  ;;  %16487 = vmatprep.mubr.f32.mxu0 %v20314_v50 }
 0x5f2   : > { %16303 = vmatmul.mubr.f32.vlgmr.msra.gmra.mrb[40].mxu1 %v20267_v35  ;;  %16488 = vmatmul.mubr.f32.gmra.mrb[22].mxu0 %v20309_v38 }
 0x5f3   : > { %16305 = vmatprep.mubr.f32.mxu1 %v20378_v42  ;;  %17157 = vmatpush3.bf16.msra.mxu1 %v17154_v31 }
 0x5f4   : > { %16494 = vmatprep.mubr.f32.mxu0 %v20300_v3  ;;  %17159 = vmatprep.subr.bf16.mxu1 %v20524_v24 }
 0x5f6   : > { %16306 = vmatmul.mubr.f32.gmra.mrb[42].mxu1 %v20381_v49  ;;  %16495 = vmatmul.mubr.f32.vlgmr.msra.gmra.mrb[16].mxu0 %v20238_v22  ;;  %v21725_v22 = vld [vmem:[#allocation58_spill] sm:$0xff] }
 0x5f7   : > { %16308 = vmatprep.mubr.f32.mxu1 %v20409_v61  ;;  %17205 = vmatpush3.bf16.msra.mxu0 %v17154_v31 }
 0x5f8   : > { %16497 = vmatprep.mubr.f32.mxu0 %v20339_v25  ;;  %17207 = vmatprep.subr.bf16.mxu0 %v20524_v24 }
 0x5fa   : > { %16309 = vmatmul.mubr.f32.gmra.mrb[44].mxu1 %v20412_v56  ;;  %16498 = vmatmul.mubr.f32.gmra.mrb[18].mxu0 %v21723_v19 }
 0x5fb   : > { %16311 = vmatprep.mubr.f32.mxu1 %v20419_v27  ;;  %16500 = vmatprep.mubr.f32.mxu0 %v21724_v53 }
 0x5fe   : > { %16312 = vmatmul.mubr.f32.gmra.mrb[46].mxu1 %v20439_v10  ;;  %16501 = vmatmul.mubr.f32.gmra.mrb[20].mxu0 %v20360_v11 }
 0x5ff   : > { %16318 = vmatprep.mubr.f32.mxu1 %v20259_v47  ;;  %16503 = vmatprep.mubr.f32.mxu0 %v21725_v22 }
 0x602   : > { %16319 = vmatmul.mubr.f32.vlgmr.msra.gmra.mrb[40].mxu1 %v20233_v39  ;;  %16504 = vmatmul.mubr.f32.gmra.mrb[22].mxu0 %v21726_v29 }
 0x603   : > { %16321 = vmatprep.mubr.f32.mxu1 %v20304_v12  ;;  %17161 = vmatpush3.bf16.msra.mxu1 %v20524_v24 }
 0x604   : > { %16510 = vmatprep.mubr.f32.mxu0 %v20213_v37  ;;  %17211 = vmatprep.subr.bf16.mxu1 %v21727_v58 }
 0x606   : > { %16322 = vmatmul.mubr.f32.gmra.mrb[42].mxu1 %v20279_v5  ;;  %16511 = vmatmul.mubr.f32.vlgmr.msra.gmra.mrb[16].mxu0 %v20207_v30 }
 0x607   : > { %16324 = vmatprep.mubr.f32.mxu1 %v20316_v32  ;;  %17209 = vmatpush3.bf16.msra.mxu0 %v20524_v24 }
 0x608   : > { %16513 = vmatprep.mubr.f32.mxu0 %v20231_v57  ;;  %17259 = vmatprep.subr.bf16.mxu0 %v21727_v58 }
 0x60a   : > { %16325 = vmatmul.mubr.f32.gmra.mrb[44].mxu1 %v20311_v34  ;;  %16514 = vmatmul.mubr.f32.gmra.mrb[18].mxu0 %v20227_v36 }
 0x60b   : > { %16327 = vmatprep.mubr.f32.mxu1 %v20332_v6  ;;  %16516 = vmatprep.mubr.f32.mxu0 %v20270_v33 }
 0x60e   : > { %16328 = vmatmul.mubr.f32.gmra.mrb[46].mxu1 %v20330_v59  ;;  %16517 = vmatmul.mubr.f32.gmra.mrb[20].mxu0 %v20248_v43 }
 0x60f   : > { %16334 = vmatprep.mubr.f32.mxu1 %v20259_v47  ;;  %16519 = vmatprep.mubr.f32.mxu0 %v20302_v0 }
 0x612   : > { %16335 = vmatmul.mubr.f32.vlgmr.msra.gmra.mrb[40].mxu1 %v20233_v39  ;;  %16520 = vmatmul.mubr.f32.gmra.mrb[22].mxu0 %v20289_v40 }
 0x613   : > { %16337 = vmatprep.mubr.f32.mxu1 %v20304_v12  ;;  %16526 = vmatprep.mubr.f32.mxu0 %v20213_v37 }
 0x614   : > { %17213 = vmatpush3.bf16.msra.mxu1 %v21727_v58 }
 0x615   : > { %17215 = vmatprep.subr.bf16.mxu1 %v21728_v55 }
 0x616   : > { %16338 = vmatmul.mubr.f32.gmra.mrb[42].mxu1 %v20279_v5  ;;  %16527 = vmatmul.mubr.f32.vlgmr.msra.gmra.mrb[16].mxu0 %v20207_v30 }
 0x617   : > { %16340 = vmatprep.mubr.f32.mxu1 %v20316_v32  ;;  %16529 = vmatprep.mubr.f32.mxu0 %v20231_v57 }
 0x618   : > { %17261 = vmatpush3.bf16.msra.mxu0 %v21727_v58 }
 0x619   : > { %17263 = vmatprep.subr.bf16.mxu0 %v21728_v55 }
 0x61a   : > { %16341 = vmatmul.mubr.f32.gmra.mrb[44].mxu1 %v20311_v34  ;;  %16530 = vmatmul.mubr.f32.gmra.mrb[18].mxu0 %v20227_v36 }
 0x61b   : > { %16343 = vmatprep.mubr.f32.mxu1 %v20332_v6  ;;  %16532 = vmatprep.mubr.f32.mxu0 %v20270_v33 }
 0x61e   : > { %16344 = vmatmul.mubr.f32.gmra.mrb[46].mxu1 %v20330_v59  ;;  %16533 = vmatmul.mubr.f32.gmra.mrb[20].mxu0 %v20248_v43 }
 0x61f   : > { %16535 = vmatprep.mubr.f32.mxu0 %v20302_v0 }
 0x622   : > { %16536 = vmatmul.mubr.f32.gmra.mrb[22].mxu0 %v20289_v40 }
 0x685   : > { %v16240_v30 = vpop.f32.mrb[32].mxu1 }
 0x686   : > { %v8165_v37 = vpop.f32.mrb[33].mxu1 }
 0x689   : > { %v16243_v57 = vpop.f32.mrb[34].mxu1 }
 0x68a   : > { %v8177_v39 = vpop.f32.mrb[35].mxu1 }
 0x68d   : > { %v16246_v47 = vpop.f32.mrb[36].mxu1 }
 0x68e   : > { %v8189_v20 = vpop.f32.mrb[37].mxu1 }
 0x691   : > { %v16249_v35 = vpop.f32.mrb[38].mxu1 }
 0x692   : > { %v8201_v36 = vpop.f32.mrb[39].mxu1 }
 0x6e5   : > { %v16336_v26 = vpop.f32.mrb[40].mxu1 }
 0x6e6   : > { %v8996_v5 = vsub.f32 %v16240_v30, %v16336_v26  ;;  %v8949_v23 = vpop.f32.mrb[41].mxu1 }
 0x6e7   : > { %v8995_v33 = vsub.f32 %v8165_v37, %v8949_v23 }
 0x6e9   : > { %10523 = vxpose.xlu0.b32.start [1/2] (short) (narrow) %v8995_v33, 16  ;;  %v16339_v15 = vpop.f32.mrb[42].mxu1  ;;  %v16528_v3 = vpop.f32.mrb[16].mxu0 }
 0x6ea   : > { %v8998_v43 = vsub.f32 %v16243_v57, %v16339_v15  ;;  %v8961_v12 = vpop.f32.mrb[43].mxu1  ;;  %v10477_v0 = vpop.f32.mrb[17].mxu0 }
 0x6eb   : > { %v8997_v38 = vsub.f32 %v8177_v39, %v8961_v12  ;;  %10651 = vxpose.xlu1.b32.start [1/2] (short) (narrow) %v10477_v0, 16 }
 0x6ed   : > { %10524 = vxpose.xlu0.b32.end [2/2] (short) (narrow) %v8996_v5, 16  ;;  %v16342_v40 = vpop.f32.mrb[44].mxu1  ;;  %v16531_v34 = vpop.f32.mrb[18].mxu0 }
 0x6ee   : > { %v9000_v50 = vsub.f32 %v16246_v47, %v16342_v40  ;;  %v8973_v32 = vpop.f32.mrb[45].mxu1  ;;  %v10489_v4 = vpop.f32.mrb[19].mxu0 }
 0x6ef   : > { %v8999_v46 = vsub.f32 %v8189_v20, %v8973_v32  ;;  %10652 = vxpose.xlu1.b32.end [2/2] (short) (narrow) %v16528_v3, 16 }
 0x6f1   : > { %10555 = vxpose.xlu0.b32.start [1/2] (short) (narrow) %v8997_v38, 16  ;;  %v16345_v59 = vpop.f32.mrb[46].mxu1  ;;  %v16534_v6 = vpop.f32.mrb[20].mxu0 }
 0x6f2   : > { %v9002_v25 = vsub.f32 %v16249_v35, %v16345_v59  ;;  %v8985_v1 = vpop.f32.mrb[47].mxu1  ;;  %v10501_v51 = vpop.f32.mrb[21].mxu0 }
 0x6f3   : > { %v9001_v60 = vsub.f32 %v8201_v36, %v8985_v1  ;;  %10683 = vxpose.xlu1.b32.start [1/2] (short) (narrow) %v10489_v4, 16 }
 0x6f5   : > { %10556 = vxpose.xlu0.b32.end [2/2] (short) (narrow) %v8998_v43, 16  ;;  %v16537_v11 = vpop.f32.mrb[22].mxu0 }
 0x6f6   : > { %v10513_v8 = vpop.f32.mrb[23].mxu0 }
 0x6f7   : > { %10684 = vxpose.xlu1.b32.end [2/2] (short) (narrow) %v16531_v34, 16 }
 0x6f9   : > { %10587 = vxpose.xlu0.b32.start [1/2] (short) (narrow) %v8999_v46, 16  ;;  %v21731_v46 = vld [vmem:[#allocation54_spill] sm:$0xff] }
 0x6fb   : > { %10715 = vxpose.xlu1.b32.start [1/2] (short) (narrow) %v10501_v51, 16 }
 0x6fd   : > { %10588 = vxpose.xlu0.b32.end [2/2] (short) (narrow) %v9000_v50, 16 }
 0x6ff   : > { %10716 = vxpose.xlu1.b32.end [2/2] (short) (narrow) %v16534_v6, 16 }
 0x701   : > { %10619 = vxpose.xlu0.b32.start [1/2] (short) (narrow) %v9001_v60, 16 }
 0x703   : > { %10747 = vxpose.xlu1.b32.start [1/2] (short) (narrow) %v10513_v8, 16 }
 0x705   : > { %10620 = vxpose.xlu0.b32.end [2/2] (short) (narrow) %v9002_v25, 16 }
 0x707   : > { %10748 = vxpose.xlu1.b32.end [2/2] (short) (narrow) %v16537_v11, 16 }
 0x769   : > { %v10539_v42 = vpop.trf.xlu0 }
 0x76a   : > { %v10780_v49 = vsel %vm908_vm0, %v10539_v42, 0 }
 0x76b   : > { %v20693_v52 = vand.u32 4294901760, %v10780_v49  ;;  %v10667_v54 = vpop.trf.xlu1 }
 0x76c   : > { %v11564_v21 = vsel %vm908_vm0, %v10667_v54, 0 }
 0x76d   : > { %v20697_v17 = vsub.f32 %v10780_v49, %v20693_v52  ;;  %v20699_v61 = vand.u32 4294901760, %v11564_v21  ;;  %v10540_v56 = vpop.trf.xlu0 }
 0x76e   : > { %v10783_v27 = vsel %vm908_vm0, %v10540_v56, 0 }
 0x76f   : > { %v20703_v9 = vsub.f32 %v11564_v21, %v20699_v61  ;;  %v20705_v14 = vand.u32 4294901760, %v10783_v27  ;;  %v10668_v10 = vpop.trf.xlu1  ;;  %v20708_v18 = vand.u32 4294901760, %v20697_v17 }
 0x770   : > { %v11567_v7 = vsel %vm908_vm0, %v10668_v10, 0 }
 0x771   : > { %v20712_v48 = vsub.f32 %v10783_v27, %v20705_v14  ;;  %v20714_v24 = vand.u32 4294901760, %v11567_v7  ;;  %v10571_v16 = vpop.trf.xlu0  ;;  %v10873_v63 = vsub.f32 %v20697_v17, %v20708_v18  ;;  %v20719_v45 = vand.u32 4294901760, %v20703_v9 }
 0x772   : > { %v10786_v28 = vsel %vm908_vm0, %v10571_v16, 0 }
 0x773   : > { %v20723_v44 = vand.u32 4294901760, %v20712_v48  ;;  %v20726_v62 = vsub.f32 %v11567_v7, %v20714_v24  ;;  %v20728_v2 = vand.u32 4294901760, %v10786_v28  ;;  %v10699_v41 = vpop.trf.xlu1  ;;  %v20730_v13 = vand.u32 4294901760, %v10873_v63 }
 0x774   : > { %v11570_v31 = vsel %vm908_vm0, %v10699_v41, 0  ;;  %v11657_v19 = vsub.f32 %v20703_v9, %v20719_v45 }
 0x775   : > { %v10883_v53 = vsub.f32 %v20712_v48, %v20723_v44  ;;  %v20738_v22 = vand.u32 4294901760, %v20726_v62  ;;  %v20741_v29 = vsub.f32 %v10786_v28, %v20728_v2  ;;  %v20743_v30 = vand.u32 4294901760, %v11570_v31  ;;  %16542 = vmatprep.mubr.f32.mxu1 %v20730_v13  ;;  %v10572_v37 = vpop.trf.xlu0 }
 0x776   : > { %v10789_v57 = vsel %vm908_vm0, %v10572_v37, 0  ;;  %v20747_v39 = vand.u32 4294901760, %v11657_v19 }
 0x777   : > { %v20749_v47 = vand.u32 4294901760, %v10883_v53  ;;  %v11667_v20 = vsub.f32 %v20726_v62, %v20738_v22  ;;  %v20754_v35 = vsub.f32 %v11570_v31, %v20743_v30  ;;  %v20756_v36 = vand.u32 4294901760, %v10789_v57  ;;  %v10700_v26 = vpop.trf.xlu1 }
 0x778   : > { %16734 = vmatprep.mubr.f32.mxu0 %v20747_v39  ;;  %v11573_v5 = vsel %vm908_vm0, %v10700_v26, 0  ;;  %v20761_v23 = vand.u32 4294901760, %v20741_v29 }
 0x779   : > { %v20763_v33 = vand.u32 4294901760, %v11667_v20  ;;  %v20766_v15 = vsub.f32 %v10789_v57, %v20756_v36  ;;  %v20768_v3 = vand.u32 4294901760, %v11573_v5  ;;  %16543 = vmatmul.mubr.f32.vlgmr.msra.gmra.mrb[48].mxu1 %v20749_v47  ;;  %v10603_v43 = vpop.trf.xlu0  ;;  %v20772_v12 = vand.u32 4294901760, %v20754_v35 }
 0x77a   : > { %21729 = vst [vmem:[#allocation44_spill] sm:$0xff] %v20761_v23  ;;  %v10792_v0 = vsel %vm908_vm0, %v10603_v43, 0  ;;  %v10893_v38 = vsub.f32 %v20741_v29, %v20761_v23  ;;  %17217 = vmatpush3.bf16.msra.mxu1 %v21728_v55 }
 0x77b   : > { %v20779_v40 = vsub.f32 %v11573_v5, %v20768_v3  ;;  %v20781_v34 = vand.u32 4294901760, %v10792_v0  ;;  %16735 = vmatmul.mubr.f32.vlgmr.msra.gmra.mrb[24].mxu0 %v20763_v33  ;;  %v10731_v50 = vpop.trf.xlu1  ;;  %v11677_v32 = vsub.f32 %v20754_v35, %v20772_v12  ;;  %v20787_v4 = vand.u32 4294901760, %v20766_v15  ;;  %17219 = vmatprep.subr.bf16.mxu1 %v21731_v46 }
 0x77c   : > { %v11576_v59 = vsel %vm908_vm0, %v10731_v50, 0  ;;  %v20791_v6 = vand.u32 4294901760, %v10893_v38  ;;  %17265 = vmatpush3.bf16.msra.mxu0 %v21728_v55 }
 0x77d   : > { %21730 = vst [vmem:[#allocation43_spill] sm:$0xff] %v20787_v4  ;;  %v20795_v25 = vsub.f32 %v10792_v0, %v20781_v34  ;;  %v20797_v1 = vand.u32 4294901760, %v11576_v59  ;;  %v10604_v51 = vpop.trf.xlu0  ;;  %v20799_v60 = vand.u32 4294901760, %v11677_v32  ;;  %v10903_v11 = vsub.f32 %v20766_v15, %v20787_v4  ;;  %17267 = vmatprep.subr.bf16.mxu0 %v21731_v46 }
 0x77e   : > { %16545 = vmatprep.mubr.f32.mxu1 %v20791_v6  ;;  %v10795_v8 = vsel %vm908_vm0, %v10604_v51, 0  ;;  %v20807_v42 = vand.u32 4294901760, %v20779_v40 }
 0x77f   : > { %v20810_v55 = vsub.f32 %v11576_v59, %v20797_v1  ;;  %v20812_v49 = vand.u32 4294901760, %v10795_v8  ;;  %16737 = vmatprep.mubr.f32.mxu0 %v20799_v60  ;;  %v10732_v54 = vpop.trf.xlu1  ;;  %v20815_v21 = vand.u32 4294901760, %v10903_v11  ;;  %v20818_v56 = vand.u32 4294901760, %v20795_v25 }
 0x780   : > { %v11579_v27 = vsel %vm908_vm0, %v10732_v54, 0  ;;  %v11687_v10 = vsub.f32 %v20779_v40, %v20807_v42 }
 0x781   : > { %21732 = vst [vmem:[#allocation46_spill] sm:$0xff] %v20815_v21  ;;  %21733 = vst [vmem:[#allocation57_spill] sm:$0xff] %v20818_v56  ;;  %v20824_v7 = vsub.f32 %v10795_v8, %v20812_v49  ;;  %v20826_v16 = vand.u32 4294901760, %v11579_v27  ;;  %16546 = vmatmul.mubr.f32.gmra.mrb[50].mxu1 %v20815_v21  ;;  %v10635_v63 = vpop.trf.xlu0  ;;  %v10913_v28 = vsub.f32 %v20795_v25, %v20818_v56  ;;  %v20832_v41 = vand.u32 4294901760, %v20810_v55 }
 0x782   : > { %v10798_v31 = vsel %vm908_vm0, %v10635_v63, 0  ;;  %v20835_v19 = vand.u32 4294901760, %v11687_v10 }
 0x783   : > { %v20838_v53 = vsub.f32 %v11579_v27, %v20826_v16  ;;  %v20840_v37 = vand.u32 4294901760, %v10798_v31  ;;  %v10763_v57 = vpop.trf.xlu1  ;;  %v20842_v20 = vand.u32 4294901760, %v10913_v28  ;;  %v11697_v26 = vsub.f32 %v20810_v55, %v20832_v41 }
 0x784   : > { %16738 = vmatmul.mubr.f32.gmra.mrb[26].mxu0 %v20835_v19  ;;  %v11582_v5 = vsel %vm908_vm0, %v10763_v57, 0  ;;  %v20849_v43 = vand.u32 4294901760, %v20824_v7 }
 0x785   : > { %21734 = vst [vmem:[#allocation59_spill] sm:$0xff] %v20842_v20  ;;  %v20852_v0 = vsub.f32 %v10798_v31, %v20840_v37  ;;  %v20854_v38 = vand.u32 4294901760, %v11582_v5  ;;  %16548 = vmatprep.mubr.f32.mxu1 %v20842_v20  ;;  %v10636_v50 = vpop.trf.xlu0  ;;  %v20857_v32 = vand.u32 4294901760, %v11697_v26  ;;  %v20860_v59 = vand.u32 4294901760, %v20838_v53 }
 0x786   : > { %v10801_v51 = vsel %vm908_vm0, %v10636_v50, 0  ;;  %v10923_v11 = vsub.f32 %v20824_v7, %v20849_v43 }
 0x787   : > { %21735 = vst [vmem:[#allocation55_spill] sm:$0xff] %v20857_v32  ;;  %v20866_v8 = vsub.f32 %v11582_v5, %v20854_v38  ;;  %v20868_v54 = vand.u32 4294901760, %v10801_v51  ;;  %16740 = vmatprep.mubr.f32.mxu0 %v20857_v32  ;;  %v10764_v27 = vpop.trf.xlu1  ;;  %v20872_v10 = vand.u32 4294901760, %v20852_v0  ;;  %v11707_v63 = vsub.f32 %v20838_v53, %v20860_v59 }
 0x788   : > { %v11585_v28 = vsel %vm908_vm0, %v10764_v27, 0  ;;  %v20877_v31 = vand.u32 4294901760, %v10923_v11 }
 0x789   : > { %v20880_v57 = vsub.f32 %v10801_v51, %v20868_v54  ;;  %v20882_v26 = vand.u32 4294901760, %v11585_v28  ;;  %v10933_v5 = vsub.f32 %v20852_v0, %v20872_v10  ;;  %v20886_v50 = vand.u32 4294901760, %v11707_v63 }
 0x78a   : > { %21736 = vst [vmem:[#allocation45_spill] sm:$0xff] %v20877_v31  ;;  %16549 = vmatmul.mubr.f32.gmra.mrb[52].mxu1 %v20877_v31  ;;  %v20890_v20 = vand.u32 4294901760, %v20866_v8 }
 0x78b   : > { %21737 = vst [vmem:[#allocation50_spill] sm:$0xff] %v20886_v50  ;;  %v20893_v21 = vsub.f32 %v11585_v28, %v20882_v26  ;;  %v20895_v11 = vand.u32 4294901760, %v10933_v5  ;;  %16741 = vmatmul.mubr.f32.gmra.mrb[28].mxu0 %v20886_v50  ;;  %v20899_v51 = vand.u32 4294901760, %v20880_v57 }
 0x78c   : > { %v11717_v27 = vsub.f32 %v20866_v8, %v20890_v20 }
 0x78d   : > { %21738 = vst [vmem:[#allocation52_spill] sm:$0xff] %v20899_v51  ;;  %16551 = vmatprep.mubr.f32.mxu1 %v20895_v11  ;;  %v10943_v63 = vsub.f32 %v20880_v57, %v20899_v51  ;;  %v20907_v31 = vand.u32 4294901760, %v20893_v21 }
 0x78e   : > { %v20909_v28 = vand.u32 4294901760, %v11717_v27 }
 0x78f   : > { %21739 = vst [vmem:[#allocation48_spill] sm:$0xff] %v20907_v31  ;;  %v20911_v5 = vand.u32 4294901760, %v10943_v63  ;;  %v11727_v50 = vsub.f32 %v20893_v21, %v20907_v31  ;;  %v18096_v63 = vld [vmem:[#allocation18 + $0x8] sm:$0xff] }
 0x790   : > { %16743 = vmatprep.mubr.f32.mxu0 %v20909_v28 }
 0x791   : > { %16552 = vmatmul.mubr.f32.gmra.mrb[54].mxu1 %v20911_v5  ;;  %v20917_v32 = vand.u32 4294901760, %v11727_v50  ;;  %v18095_v50 = vld [vmem:[#allocation18] sm:$0xff] }
 0x792   : > { %16558 = vmatprep.mubr.f32.mxu1 %v20693_v52  ;;  %v754_v27 = vsub.f32 0.0, %v18095_v50 }
 0x793   : > { %16744 = vmatmul.mubr.f32.gmra.mrb[30].mxu0 %v20917_v32 }
 0x794   : > { %16750 = vmatprep.mubr.f32.mxu0 %v20699_v61 }
 0x795   : > { %16559 = vmatmul.mubr.f32.vlgmr.msra.gmra.mrb[48].mxu1 %v20705_v14 }
 0x796   : > { %16561 = vmatprep.mubr.f32.mxu1 %v20728_v2  ;;  %17221 = vmatpush3.bf16.msra.mxu1 %v21731_v46 }
 0x797   : > { %16751 = vmatmul.mubr.f32.vlgmr.msra.gmra.mrb[24].mxu0 %v20714_v24  ;;  %17223 = vmatprep.subr.bf16.mxu1 %v21727_v58 }
 0x798   : > { %17269 = vmatpush3.bf16.msra.mxu0 %v21731_v46  ;;  %16753 = vmatprep.mubr.f32.mxu0 %v20743_v30  ;;  %v21740_v46 = vld [vmem:[#allocation56_spill] sm:$0xff] }
 0x799   : > { %16562 = vmatmul.mubr.f32.gmra.mrb[50].mxu1 %v20756_v36  ;;  %17271 = vmatprep.subr.bf16.mxu0 %v21727_v58 }
 0x79a   : > { %16564 = vmatprep.mubr.f32.mxu1 %v20781_v34 }
 0x79b   : > { %16754 = vmatmul.mubr.f32.gmra.mrb[26].mxu0 %v20768_v3 }
 0x79c   : > { %16756 = vmatprep.mubr.f32.mxu0 %v20797_v1 }
 0x79d   : > { %16565 = vmatmul.mubr.f32.gmra.mrb[52].mxu1 %v20812_v49 }
 0x79e   : > { %16567 = vmatprep.mubr.f32.mxu1 %v20840_v37 }
 0x79f   : > { %16757 = vmatmul.mubr.f32.gmra.mrb[28].mxu0 %v20826_v16 }
 0x7a0   : > { %16759 = vmatprep.mubr.f32.mxu0 %v20854_v38 }
 0x7a1   : > { %16568 = vmatmul.mubr.f32.gmra.mrb[54].mxu1 %v20868_v54 }
 0x7a2   : > { %16574 = vmatprep.mubr.f32.mxu1 %v20697_v17 }
 0x7a3   : > { %16760 = vmatmul.mubr.f32.gmra.mrb[30].mxu0 %v20882_v26 }
 0x7a4   : > { %16766 = vmatprep.mubr.f32.mxu0 %v20703_v9 }
 0x7a5   : > { %16575 = vmatmul.mubr.f32.vlgmr.msra.gmra.mrb[48].mxu1 %v20712_v48 }
 0x7a6   : > { %16577 = vmatprep.mubr.f32.mxu1 %v20741_v29  ;;  %17225 = vmatpush3.bf16.msra.mxu1 %v21727_v58 }
 0x7a7   : > { %16767 = vmatmul.mubr.f32.vlgmr.msra.gmra.mrb[24].mxu0 %v20726_v62  ;;  %17227 = vmatprep.subr.bf16.mxu1 %v21740_v46 }
 0x7a8   : > { %17273 = vmatpush3.bf16.msra.mxu0 %v21727_v58  ;;  %16769 = vmatprep.mubr.f32.mxu0 %v20754_v35 }
 0x7a9   : > { %16578 = vmatmul.mubr.f32.gmra.mrb[50].mxu1 %v20766_v15  ;;  %17275 = vmatprep.subr.bf16.mxu0 %v21740_v46 }
 0x7aa   : > { %16580 = vmatprep.mubr.f32.mxu1 %v20795_v25 }
 0x7ab   : > { %16770 = vmatmul.mubr.f32.gmra.mrb[26].mxu0 %v20779_v40 }
 0x7ac   : > { %16772 = vmatprep.mubr.f32.mxu0 %v20810_v55 }
 0x7ad   : > { %16581 = vmatmul.mubr.f32.gmra.mrb[52].mxu1 %v20824_v7 }
 0x7ae   : > { %16583 = vmatprep.mubr.f32.mxu1 %v20852_v0 }
 0x7af   : > { %16773 = vmatmul.mubr.f32.gmra.mrb[28].mxu0 %v20838_v53 }
 0x7b0   : > { %16775 = vmatprep.mubr.f32.mxu0 %v20866_v8 }
 0x7b1   : > { %16584 = vmatmul.mubr.f32.gmra.mrb[54].mxu1 %v20880_v57 }
 0x7b2   : > { %16590 = vmatprep.mubr.f32.mxu1 %v20708_v18 }
 0x7b3   : > { %16776 = vmatmul.mubr.f32.gmra.mrb[30].mxu0 %v20893_v21 }
 0x7b4   : > { %16782 = vmatprep.mubr.f32.mxu0 %v20719_v45 }
 0x7b5   : > { %16591 = vmatmul.mubr.f32.vlgmr.msra.gmra.mrb[48].mxu1 %v20723_v44 }
 0x7b6   : > { %16593 = vmatprep.mubr.f32.mxu1 %v20761_v23  ;;  %17229 = vmatpush3.bf16.msra.mxu1 %v21740_v46  ;;  %v755_v23 = vsub.f32 0.0, %v18096_v63 }
 0x7b7   : > { %16783 = vmatmul.mubr.f32.vlgmr.msra.gmra.mrb[24].mxu0 %v20738_v22  ;;  %17231 = vmatprep.subr.bf16.mxu1 %v21727_v58 }
 0x7b8   : > { %17277 = vmatpush3.bf16.msra.mxu0 %v21740_v46  ;;  %16785 = vmatprep.mubr.f32.mxu0 %v20772_v12  ;;  %v11588_v46 = vand.u32 4294901760, %v754_v27 }
 0x7b9   : > { %16594 = vmatmul.mubr.f32.gmra.mrb[50].mxu1 %v20787_v4  ;;  %17279 = vmatprep.subr.bf16.mxu0 %v21727_v58  ;;  %v11591_v4 = vand.u32 4294901760, %v755_v23 }
 0x7ba   : > { %16596 = vmatprep.mubr.f32.mxu1 %v20818_v56  ;;  %v20983_v63 = vsub.f32 %v754_v27, %v11588_v46 }
 0x7bb   : > { %16786 = vmatmul.mubr.f32.gmra.mrb[26].mxu0 %v20807_v42  ;;  %v20981_v50 = vpack.c.bf16 %v11591_v4, %v11588_v46  ;;  %v20985_v56 = vsub.f32 %v755_v23, %v11591_v4 }
 0x7bc   : > { %16788 = vmatprep.mubr.f32.mxu0 %v20832_v41 }
 0x7bd   : > { %16597 = vmatmul.mubr.f32.gmra.mrb[52].mxu1 %v20849_v43 }
 0x7be   : > { %16599 = vmatprep.mubr.f32.mxu1 %v20872_v10 }
 0x7bf   : > { %16789 = vmatmul.mubr.f32.gmra.mrb[28].mxu0 %v20860_v59 }
 0x7c0   : > { %16791 = vmatprep.mubr.f32.mxu0 %v20890_v20 }
 0x7c1   : > { %16600 = vmatmul.mubr.f32.gmra.mrb[54].mxu1 %v20899_v51  ;;  %v11737_v51 = vand.u32 4294901760, %v20983_v63 }
 0x7c2   : > { %16606 = vmatprep.mubr.f32.mxu1 %v20693_v52 }
 0x7c3   : > { %16792 = vmatmul.mubr.f32.gmra.mrb[30].mxu0 %v20907_v31  ;;  %v11744_v31 = vand.u32 4294901760, %v20985_v56  ;;  %v11738_v23 = vsub.f32 %v20983_v63, %v11737_v51 }
 0x7c4   : > { %16798 = vmatprep.mubr.f32.mxu0 %v20699_v61 }
 0x7c5   : > { %16607 = vmatmul.mubr.f32.vlgmr.msra.gmra.mrb[48].mxu1 %v20705_v14  ;;  %v11745_v4 = vsub.f32 %v20985_v56, %v11744_v31 }
 0x7c6   : > { %16609 = vmatprep.mubr.f32.mxu1 %v20728_v2  ;;  %17233 = vmatpush3.bf16.msra.mxu1 %v21727_v58 }
 0x7c7   : > { %16799 = vmatmul.mubr.f32.vlgmr.msra.gmra.mrb[24].mxu0 %v20714_v24  ;;  %17235 = vmatprep.subr.bf16.mxu1 %v20981_v50  ;;  %v11746_v27 = vand.u32 4294901760, %v11745_v4  ;;  %v21742_v4 = vld [vmem:[#allocation46_spill] sm:$0xff] }
 0x7c8   : > { %17281 = vmatpush3.bf16.msra.mxu0 %v21727_v58  ;;  %16801 = vmatprep.mubr.f32.mxu0 %v20743_v30  ;;  %v11739_v58 = vand.u32 4294901760, %v11738_v23  ;;  %v17242_v23 = vpack.c.bf16 %v20985_v56, %v20983_v63  ;;  %v18102_v56 = vld [vmem:[%s19063_s22] sm:$0xff] }
 0x7c9   : > { %16610 = vmatmul.mubr.f32.gmra.mrb[50].mxu1 %v20756_v36  ;;  %17283 = vmatprep.subr.bf16.mxu0 %v20981_v50 }
 0x7ca   : > { %16612 = vmatprep.mubr.f32.mxu1 %v20781_v34  ;;  %v17238_v46 = vpack.c.bf16 %v11746_v27, %v11739_v58  ;;  %v21743_v58 = vld [vmem:[#allocation59_spill] sm:$0xff] }
 0x7cb   : > { %16802 = vmatmul.mubr.f32.gmra.mrb[26].mxu0 %v20768_v3 }
 0x7cc   : > { %16804 = vmatprep.mubr.f32.mxu0 %v20797_v1 }
 0x7cd   : > { %16613 = vmatmul.mubr.f32.gmra.mrb[52].mxu1 %v20812_v49 }
 0x7ce   : > { %16615 = vmatprep.mubr.f32.mxu1 %v20840_v37 }
 0x7cf   : > { %16805 = vmatmul.mubr.f32.gmra.mrb[28].mxu0 %v20826_v16 }
 0x7d0   : > { %16807 = vmatprep.mubr.f32.mxu0 %v20854_v38 }
 0x7d1   : > { %16616 = vmatmul.mubr.f32.gmra.mrb[54].mxu1 %v20868_v54 }
 0x7d2   : > { %16622 = vmatprep.mubr.f32.mxu1 %v20693_v52 }
 0x7d3   : > { %16808 = vmatmul.mubr.f32.gmra.mrb[30].mxu0 %v20882_v26 }
 0x7d4   : > { %16814 = vmatprep.mubr.f32.mxu0 %v20699_v61 }
 0x7d5   : > { %16623 = vmatmul.mubr.f32.vlgmr.msra.gmra.mrb[48].mxu1 %v20705_v14 }
 0x7d6   : > { %16625 = vmatprep.mubr.f32.mxu1 %v20728_v2  ;;  %17237 = vmatpush3.bf16.msra.mxu1 %v20981_v50 }
 0x7d7   : > { %16815 = vmatmul.mubr.f32.vlgmr.msra.gmra.mrb[24].mxu0 %v20714_v24  ;;  %17239 = vmatprep.subr.bf16.mxu1 %v17238_v46 }
 0x7d8   : > { %17285 = vmatpush3.bf16.msra.mxu0 %v20981_v50  ;;  %16817 = vmatprep.mubr.f32.mxu0 %v20743_v30 }
 0x7d9   : > { %16626 = vmatmul.mubr.f32.gmra.mrb[50].mxu1 %v20756_v36  ;;  %17287 = vmatprep.subr.bf16.mxu0 %v17238_v46 }
 0x7da   : > { %16628 = vmatprep.mubr.f32.mxu1 %v20781_v34 }
 0x7db   : > { %16818 = vmatmul.mubr.f32.gmra.mrb[26].mxu0 %v20768_v3 }
 0x7dc   : > { %16820 = vmatprep.mubr.f32.mxu0 %v20797_v1 }
 0x7dd   : > { %16629 = vmatmul.mubr.f32.gmra.mrb[52].mxu1 %v20812_v49 }
 0x7de   : > { %16631 = vmatprep.mubr.f32.mxu1 %v20840_v37 }
 0x7df   : > { %16821 = vmatmul.mubr.f32.gmra.mrb[28].mxu0 %v20826_v16 }
 0x7e0   : > { %16823 = vmatprep.mubr.f32.mxu0 %v20854_v38 }
 0x7e1   : > { %16632 = vmatmul.mubr.f32.gmra.mrb[54].mxu1 %v20868_v54 }
 0x7e2   : > { %16638 = vmatprep.mubr.f32.mxu1 %v20747_v39  ;;  %v21741_v39 = vld [vmem:[#allocation55_spill] sm:$0xff] }
 0x7e3   : > { %16824 = vmatmul.mubr.f32.gmra.mrb[30].mxu0 %v20882_v26 }
 0x7e4   : > { %16830 = vmatprep.mubr.f32.mxu0 %v20730_v13  ;;  %v21744_v13 = vld [vmem:[#allocation50_spill] sm:$0xff] }
 0x7e5   : > { %16639 = vmatmul.mubr.f32.vlgmr.msra.gmra.mrb[56].mxu1 %v20763_v33  ;;  %v21745_v33 = vld [vmem:[#allocation45_spill] sm:$0xff] }
 0x7e6   : > { %16641 = vmatprep.mubr.f32.mxu1 %v20799_v60  ;;  %17241 = vmatpush3.bf16.msra.mxu1 %v17238_v46 }
 0x7e7   : > { %16831 = vmatmul.mubr.f32.vlgmr.msra.gmra.mrb[24].mxu0 %v20749_v47  ;;  %17243 = vmatprep.subr.bf16.mxu1 %v17242_v23  ;;  %v17250_v47 = vpack.c.bf16 %v11744_v31, %v11737_v51 }
 0x7e8   : > { %17289 = vmatpush3.bf16.msra.mxu0 %v17238_v46  ;;  %16833 = vmatprep.mubr.f32.mxu0 %v20791_v6  ;;  %v18099_v6 = vld [vmem:[%s19055_s13 + $0x18] sm:$0xff] }
 0x7e9   : > { %16642 = vmatmul.mubr.f32.gmra.mrb[58].mxu1 %v20835_v19  ;;  %17291 = vmatprep.subr.bf16.mxu0 %v17242_v23  ;;  %v18104_v19 = vld [vmem:[%s19072_s9 + $0x8] sm:$0xff] }
 0x7ea   : > { %16644 = vmatprep.mubr.f32.mxu1 %v21741_v39 }
 0x7eb   : > { %16834 = vmatmul.mubr.f32.gmra.mrb[26].mxu0 %v21742_v4 }
 0x7ec   : > { %16836 = vmatprep.mubr.f32.mxu0 %v21743_v58  ;;  %v18111_v58 = vld [vmem:[%s19070_s26 + $0x28] sm:$0xff] }
 0x7ed   : > { %16645 = vmatmul.mubr.f32.gmra.mrb[60].mxu1 %v21744_v13 }
 0x7ee   : > { %16647 = vmatprep.mubr.f32.mxu1 %v20909_v28 }
 0x7ef   : > { %16837 = vmatmul.mubr.f32.gmra.mrb[28].mxu0 %v21745_v33  ;;  %v18112_v33 = vld [vmem:[%s19072_s9 + $0x28] sm:$0xff] }
 0x7f0   : > { %16839 = vmatprep.mubr.f32.mxu0 %v20895_v11 }
 0x7f1   : > { %16648 = vmatmul.mubr.f32.gmra.mrb[62].mxu1 %v20917_v32  ;;  %v18107_v32 = vld [vmem:[%s19070_s26] sm:$0xff] }
 0x7f2   : > { %16654 = vmatprep.mubr.f32.mxu1 %v20699_v61 }
 0x7f3   : > { %16840 = vmatmul.mubr.f32.gmra.mrb[30].mxu0 %v20911_v5 }
 0x7f4   : > { %16846 = vmatprep.mubr.f32.mxu0 %v20693_v52 }
 0x7f5   : > { %16655 = vmatmul.mubr.f32.vlgmr.msra.gmra.mrb[56].mxu1 %v20714_v24 }
 0x7f6   : > { %16657 = vmatprep.mubr.f32.mxu1 %v20743_v30  ;;  %17245 = vmatpush3.bf16.msra.mxu1 %v17242_v23 }
 0x7f7   : > { %16847 = vmatmul.mubr.f32.vlgmr.msra.gmra.mrb[24].mxu0 %v20705_v14  ;;  %17247 = vmatprep.subr.bf16.mxu1 %v20981_v50 }
 0x7f8   : > { %17293 = vmatpush3.bf16.msra.mxu0 %v17242_v23  ;;  %16849 = vmatprep.mubr.f32.mxu0 %v20728_v2 }
 0x7f9   : > { %16658 = vmatmul.mubr.f32.gmra.mrb[58].mxu1 %v20768_v3  ;;  %17295 = vmatprep.subr.bf16.mxu0 %v20981_v50 }
 0x7fa   : > { %16660 = vmatprep.mubr.f32.mxu1 %v20797_v1 }
 0x7fb   : > { %16850 = vmatmul.mubr.f32.gmra.mrb[26].mxu0 %v20756_v36 }
 0x7fc   : > { %16852 = vmatprep.mubr.f32.mxu0 %v20781_v34 }
 0x7fd   : > { %16661 = vmatmul.mubr.f32.gmra.mrb[60].mxu1 %v20826_v16 }
 0x7fe   : > { %16663 = vmatprep.mubr.f32.mxu1 %v20854_v38 }
 0x7ff   : > { %16853 = vmatmul.mubr.f32.gmra.mrb[28].mxu0 %v20812_v49 }
 0x800   : > { %16855 = vmatprep.mubr.f32.mxu0 %v20840_v37 }
 0x801   : > { %16664 = vmatmul.mubr.f32.gmra.mrb[62].mxu1 %v20882_v26 }
 0x802   : > { %16670 = vmatprep.mubr.f32.mxu1 %v20703_v9  ;;  %v21747_v9 = vld [vmem:[#allocation43_spill] sm:$0xff] }
 0x803   : > { %16856 = vmatmul.mubr.f32.gmra.mrb[30].mxu0 %v20868_v54 }
 0x804   : > { %16862 = vmatprep.mubr.f32.mxu0 %v20697_v17  ;;  %v21746_v17 = vld [vmem:[#allocation44_spill] sm:$0xff] }
 0x805   : > { %16671 = vmatmul.mubr.f32.vlgmr.msra.gmra.mrb[56].mxu1 %v20726_v62 }
 0x806   : > { %16673 = vmatprep.mubr.f32.mxu1 %v20754_v35  ;;  %17249 = vmatpush3.bf16.msra.mxu1 %v20981_v50  ;;  %v18097_v35 = vld [vmem:[%s19055_s13 + $0x8] sm:$0xff] }
 0x807   : > { %16863 = vmatmul.mubr.f32.vlgmr.msra.gmra.mrb[24].mxu0 %v20712_v48  ;;  %17251 = vmatprep.subr.bf16.mxu1 %v17250_v47  ;;  %v21749_v48 = vld [vmem:[#allocation48_spill] sm:$0xff] }
 0x808   : > { %17297 = vmatpush3.bf16.msra.mxu0 %v20981_v50  ;;  %16865 = vmatprep.mubr.f32.mxu0 %v20741_v29  ;;  %v21150_v29 = vstv %s14404_s25 }
 0x809   : > { %16674 = vmatmul.mubr.f32.gmra.mrb[58].mxu1 %v20779_v40  ;;  %17299 = vmatprep.subr.bf16.mxu0 %v17250_v47  ;;  %v18098_v40 = vld [vmem:[%s19063_s22 + $0x8] sm:$0xff] }
 0x80a   : > { %16676 = vmatprep.mubr.f32.mxu1 %v20810_v55 }
 0x80b   : > { %16866 = vmatmul.mubr.f32.gmra.mrb[26].mxu0 %v20766_v15 }
 0x80c   : > { %16868 = vmatprep.mubr.f32.mxu0 %v20795_v25  ;;  %v21164_v25 = vmul.f32 %v18099_v6, %v21150_v29  ;;  %v21203_v6 = vld [vmem:[%s19070_s26 + $0x30] sm:$0xff] }
 0x80d   : > { %16677 = vmatmul.mubr.f32.gmra.mrb[60].mxu1 %v20838_v53 }
 0x80e   : > { %16679 = vmatprep.mubr.f32.mxu1 %v20866_v8  ;;  %v18108_v8 = vld [vmem:[%s19072_s9] sm:$0xff] }
 0x80f   : > { %16869 = vmatmul.mubr.f32.gmra.mrb[28].mxu0 %v20824_v7  ;;  %v21176_v7 = vmul.f32 %v18102_v56, %v21150_v29 }
 0x810   : > { %16871 = vmatprep.mubr.f32.mxu0 %v20852_v0 }
 0x811   : > { %16680 = vmatmul.mubr.f32.gmra.mrb[62].mxu1 %v20893_v21 }
 0x812   : > { %16686 = vmatprep.mubr.f32.mxu1 %v20719_v45  ;;  %v21750_v45 = vld [vmem:[#allocation52_spill] sm:$0xff] }
 0x813   : > { %16872 = vmatmul.mubr.f32.gmra.mrb[30].mxu0 %v20880_v57  ;;  %v18110_v57 = vld [vmem:[%s19072_s9 + $0x10] sm:$0xff] }
 0x814   : > { %16878 = vmatprep.mubr.f32.mxu0 %v20708_v18  ;;  %v21748_v18 = vld [vmem:[#allocation57_spill] sm:$0xff] }
 0x815   : > { %16687 = vmatmul.mubr.f32.vlgmr.msra.gmra.mrb[56].mxu1 %v20738_v22 }
 0x816   : > { %16689 = vmatprep.mubr.f32.mxu1 %v20772_v12  ;;  %17253 = vmatpush3.bf16.msra.mxu1 %v17250_v47  ;;  %v21156_v12 = vstv %s13875_s6 }
 0x817   : > { %16879 = vmatmul.mubr.f32.vlgmr.msra.gmra.mrb[24].mxu0 %v20723_v44  ;;  %17255 = vmatprep.subr.bf16.mxu1 %v20981_v50 }
 0x818   : > { %17301 = vmatpush3.bf16.msra.mxu0 %v17250_v47  ;;  %16881 = vmatprep.mubr.f32.mxu0 %v21746_v17  ;;  %v18113_v17 = vld [vmem:[%s19070_s26 + $0x38] sm:$0xff] }
 0x819   : > { %16690 = vmatmul.mubr.f32.gmra.mrb[58].mxu1 %v20807_v42  ;;  %17303 = vmatprep.subr.bf16.mxu0 %v20981_v50  ;;  %v18100_v42 = vld [vmem:[%s19063_s22 + $0x18] sm:$0xff] }
 0x81a   : > { %16692 = vmatprep.mubr.f32.mxu1 %v20832_v41  ;;  %v21168_v55 = vmul.f32 %v18100_v42, %v21150_v29 }
 0x81b   : > { %16882 = vmatmul.mubr.f32.gmra.mrb[26].mxu0 %v21747_v9 }
 0x81c   : > { %16884 = vmatprep.mubr.f32.mxu0 %v21748_v18  ;;  %v18114_v18 = vld [vmem:[%s19072_s9 + $0x38] sm:$0xff] }
 0x81d   : > { %16693 = vmatmul.mubr.f32.gmra.mrb[60].mxu1 %v20860_v59 }
 0x81e   : > { %16695 = vmatprep.mubr.f32.mxu1 %v20890_v20 }
 0x81f   : > { %16885 = vmatmul.mubr.f32.gmra.mrb[28].mxu0 %v20849_v43  ;;  %v18106_v43 = vld [vmem:[%s19072_s9 + $0x18] sm:$0xff] }
 0x820   : > { %16887 = vmatprep.mubr.f32.mxu0 %v20872_v10  ;;  %v18109_v10 = vld [vmem:[%s19070_s26 + $0x10] sm:$0xff] }
 0x821   : > { %16696 = vmatmul.mubr.f32.gmra.mrb[62].mxu1 %v21749_v48 }
 0x822   : > { %16702 = vmatprep.mubr.f32.mxu1 %v20699_v61 }
 0x823   : > { %16888 = vmatmul.mubr.f32.gmra.mrb[30].mxu0 %v21750_v45 }
 0x824   : > { %16894 = vmatprep.mubr.f32.mxu0 %v20693_v52 }
 0x825   : > { %16703 = vmatmul.mubr.f32.vlgmr.msra.gmra.mrb[56].mxu1 %v20714_v24 }
 0x826   : > { %16705 = vmatprep.mubr.f32.mxu1 %v20743_v30  ;;  %17257 = vmatpush3.bf16.msra.mxu1 %v20981_v50 }
 0x827   : > { %16895 = vmatmul.mubr.f32.vlgmr.msra.gmra.mrb[24].mxu0 %v20705_v14 }
 0x828   : > { %17305 = vmatpush3.bf16.msra.mxu0 %v20981_v50  ;;  %16897 = vmatprep.mubr.f32.mxu0 %v20728_v2 }
 0x829   : > { %16706 = vmatmul.mubr.f32.gmra.mrb[58].mxu1 %v20768_v3 }
 0x82a   : > { %16708 = vmatprep.mubr.f32.mxu1 %v20797_v1 }
 0x82b   : > { %16898 = vmatmul.mubr.f32.gmra.mrb[26].mxu0 %v20756_v36 }
 0x82c   : > { %16900 = vmatprep.mubr.f32.mxu0 %v20781_v34 }
 0x82d   : > { %16709 = vmatmul.mubr.f32.gmra.mrb[60].mxu1 %v20826_v16 }
 0x82e   : > { %16711 = vmatprep.mubr.f32.mxu1 %v20854_v38 }
 0x82f   : > { %16901 = vmatmul.mubr.f32.gmra.mrb[28].mxu0 %v20812_v49 }
 0x830   : > { %16903 = vmatprep.mubr.f32.mxu0 %v20840_v37 }
 0x831   : > { %16712 = vmatmul.mubr.f32.gmra.mrb[62].mxu1 %v20882_v26 }
 0x832   : > { %16718 = vmatprep.mubr.f32.mxu1 %v20699_v61 }
 0x833   : > { %16904 = vmatmul.mubr.f32.gmra.mrb[30].mxu0 %v20868_v54 }
 0x834   : > { %16910 = vmatprep.mubr.f32.mxu0 %v20693_v52 }
 0x835   : > { %16719 = vmatmul.mubr.f32.vlgmr.msra.gmra.mrb[56].mxu1 %v20714_v24 }
 0x836   : > { %16721 = vmatprep.mubr.f32.mxu1 %v20743_v30 }
 0x837   : > { %16911 = vmatmul.mubr.f32.vlgmr.msra.gmra.mrb[24].mxu0 %v20705_v14 }
 0x838   : > { %16913 = vmatprep.mubr.f32.mxu0 %v20728_v2 }
 0x839   : > { %16722 = vmatmul.mubr.f32.gmra.mrb[58].mxu1 %v20768_v3 }
 0x83a   : > { %16724 = vmatprep.mubr.f32.mxu1 %v20797_v1 }
 0x83b   : > { %16914 = vmatmul.mubr.f32.gmra.mrb[26].mxu0 %v20756_v36  ;;  %v21154_v36 = vmul.f32 %v18097_v35, %v21150_v29  ;;  %v18115_v35 = vld [vmem:[%s19070_s26 + $0x20] sm:$0xff] }
 0x83c   : > { %16916 = vmatprep.mubr.f32.mxu0 %v20781_v34  ;;  %v21160_v34 = vmul.f32 %v18098_v40, %v21150_v29 }
 0x83d   : > { %16725 = vmatmul.mubr.f32.gmra.mrb[60].mxu1 %v20826_v16  ;;  %v18103_v16 = vld [vmem:[%s19070_s26 + $0x8] sm:$0xff] }
 0x83e   : > { %16727 = vmatprep.mubr.f32.mxu1 %v20854_v38 }
 0x83f   : > { %16917 = vmatmul.mubr.f32.gmra.mrb[28].mxu0 %v20812_v49  ;;  %v18101_v49 = vld [vmem:[%s19055_s13] sm:$0xff] }
 0x840   : > { %16919 = vmatprep.mubr.f32.mxu0 %v20840_v37  ;;  %v21172_v21 = vmul.f32 %v18101_v49, %v21150_v29  ;;  %v18105_v37 = vld [vmem:[%s19070_s26 + $0x18] sm:$0xff] }
 0x841   : > { %16728 = vmatmul.mubr.f32.gmra.mrb[62].mxu1 %v20882_v26 }
 0x843   : > { %16920 = vmatmul.mubr.f32.gmra.mrb[30].mxu0 %v20868_v54 }
 0x8a8   : > { %v16624_v52 = vpop.f32.mrb[48].mxu1 }
 0x8a9   : > { %v11517_v61 = vpop.f32.mrb[49].mxu1 }
 0x8ac   : > { %v16627_v14 = vpop.f32.mrb[50].mxu1 }
 0x8ad   : > { %v11529_v24 = vpop.f32.mrb[51].mxu1 }
 0x8b0   : > { %v21142_v44 = vpop.f32.mrb[52].mxu1 }
 0x8b1   : > { %v21144_v62 = vpop.f32.mrb[53].mxu1 }
 0x8b4   : > { %v21146_v2 = vpop.f32.mrb[54].mxu1 }
 0x8b5   : > { %v21148_v22 = vpop.f32.mrb[55].mxu1 }
 0x908   : > { %v16720_v30 = vpop.f32.mrb[56].mxu1 }
 0x909   : > { %v12348_v15 = vsub.f32 %v16624_v52, %v16720_v30  ;;  %v12301_v3 = vpop.f32.mrb[57].mxu1 }
 0x90a   : > { %v12347_v1 = vsub.f32 %v11517_v61, %v12301_v3  ;;  %v16912_v60 = vpop.f32.mrb[24].mxu0  ;;  %v18116_v3 = vld [vmem:[%s19072_s9 + $0x20] sm:$0xff] }
 0x90b   : > { %v13877_v41 = vmul.f32 %v18103_v16, %v12348_v15  ;;  %v13923_v53 = vmul.f32 %v18104_v19, %v12348_v15  ;;  %v13971_v20 = vmul.f32 %v18105_v37, %v12348_v15  ;;  %v14017_v0 = vmul.f32 %v18106_v43, %v12348_v15  ;;  %v13829_v38 = vpop.f32.mrb[25].mxu0 }
 0x90c   : > { %v13876_v59 = vmul.f32 %v18107_v32, %v12347_v1  ;;  %v13922_v54 = vmul.f32 %v18108_v8, %v12347_v1  ;;  %v13970_v31 = vmul.f32 %v18109_v10, %v12347_v1  ;;  %v21186_v26 = vmul.f32 %v18110_v57, %v12347_v1  ;;  %v16723_v11 = vpop.f32.mrb[58].mxu1 }
 0x90d   : > { %v12350_v51 = vsub.f32 %v16627_v14, %v16723_v11  ;;  %v13885_v28 = vmul.f32 %v18104_v19, %v16912_v60  ;;  %v13915_v5 = vmul.f32 %v18103_v16, %v16912_v60  ;;  %v13979_v50 = vmul.f32 %v18106_v43, %v16912_v60  ;;  %v12313_v63 = vpop.f32.mrb[59].mxu1 }
 0x90e   : > { %v14009_v27 = vmul.f32 %v18105_v37, %v16912_v60  ;;  %v12349_v46 = vsub.f32 %v11529_v24, %v12313_v63  ;;  %v13884_v23 = vmul.f32 %v18108_v8, %v13829_v38  ;;  %v13914_v39 = vmul.f32 %v18107_v32, %v13829_v38  ;;  %v16915_v4 = vpop.f32.mrb[26].mxu0  ;;  %v18118_v60 = vld [vmem:[%s19072_s9 + $0x30] sm:$0xff] }
 0x90f   : > { %v13879_v13 = vmul.f32 %v18111_v58, %v12350_v51  ;;  %v13925_v47 = vmul.f32 %v18112_v33, %v12350_v51  ;;  %v13973_v9 = vmul.f32 %v18113_v17, %v12350_v51  ;;  %v21192_v48 = vmul.f32 %v18114_v18, %v12350_v51  ;;  %v21194_v45 = vpop.f32.mrb[27].mxu0 }
 0x910   : > { %v13893_v52 = vadd.f32 %v13885_v28, %v13877_v41  ;;  %v13931_v61 = vsub.f32 %v13915_v5, %v13923_v53  ;;  %v13987_v14 = vadd.f32 %v13979_v50, %v13971_v20  ;;  %v14025_v24 = vsub.f32 %v14009_v27, %v14017_v0  ;;  %v16726_v30 = vpop.f32.mrb[60].mxu1 }
 0x911   : > { %v21197_v15 = vmul.f32 %v18115_v35, %v12349_v46  ;;  %v21200_v40 = vmul.f32 %v18116_v3, %v12349_v46  ;;  %v21206_v1 = vmul.f32 %v21203_v6, %v12349_v46  ;;  %v21209_v42 = vmul.f32 %v18118_v60, %v12349_v46  ;;  %v12325_v49 = vpop.f32.mrb[61].mxu1 }
 0x912   : > { %v13907_v56 = vsel %vm908_vm0, %v13893_v52, 0.0  ;;  %v13945_v16 = vsel %vm908_vm0, %v13931_v61, 0.0  ;;  %v14001_v41 = vsel %vm908_vm0, %v13987_v14, 0.0  ;;  %v14039_v19 = vsel %vm908_vm0, %v14025_v24, 0.0  ;;  %v21215_v53 = vpop.f32.mrb[28].mxu0 }
 0x913   : > { %v13892_v37 = vadd.f32 %v13884_v23, %v13876_v59  ;;  %v13930_v20 = vsub.f32 %v13914_v39, %v13922_v54  ;;  %v13978_v43 = vmul.f32 %v18110_v57, %v13829_v38  ;;  %v14008_v0 = vmul.f32 %v18109_v10, %v13829_v38  ;;  %v21217_v32 = vpop.f32.mrb[29].mxu0  ;;  %v18119_v38 = vld [vmem:[%s19070_s26 + $0x48] sm:$0xff]  ;;  %v18122_v39 = vld [vmem:[%s19072_s9 + $0x58] sm:$0xff] }
 0x914   : > { %v12352_v8 = vsub.f32 %v21142_v44, %v16726_v30  ;;  %v13887_v11 = vmul.f32 %v18112_v33, %v16915_v4  ;;  %v13917_v51 = vmul.f32 %v18111_v58, %v16915_v4  ;;  %v13981_v28 = vmul.f32 %v18114_v18, %v16915_v4  ;;  %v16729_v5 = vpop.f32.mrb[62].mxu1  ;;  %v18120_v57 = vld [vmem:[%s19072_s9 + $0x48] sm:$0xff]  ;;  %v18121_v44 = vld [vmem:[%s19070_s26 + $0x58] sm:$0xff] }
 0x915   : > { %v13900_v50 = vsel %vm908_vm0, %v13892_v37, 0.0  ;;  %v13938_v63 = vsel %vm908_vm0, %v13930_v20, 0.0  ;;  %v13986_v27 = vadd.f32 %v13978_v43, %v13970_v31  ;;  %v14024_v59 = vsub.f32 %v14008_v0, %v21186_v26  ;;  %v21223_v54 = vpop.f32.mrb[63].mxu1 }
 0x916   : > { %v13881_v10 = vmul.f32 %v18119_v38, %v12352_v8  ;;  %v21227_v46 = vmul.f32 %v18120_v57, %v12352_v8  ;;  %v21230_v23 = vmul.f32 %v18121_v44, %v12352_v8  ;;  %v21233_v58 = vmul.f32 %v18122_v39, %v12352_v8  ;;  %v21235_v33 = vpop.f32.mrb[30].mxu0 }
 0x917   : > { %v13994_v18 = vsel %vm908_vm0, %v13986_v27, 0.0  ;;  %v14032_v31 = vsel %vm908_vm0, %v14024_v59, 0.0  ;;  %v13895_v26 = vadd.f32 %v13887_v11, %v13879_v13  ;;  %v13933_v52 = vsub.f32 %v13917_v51, %v13925_v47  ;;  %v21239_v61 = vpop.f32.mrb[31].mxu0  ;;  %v18125_v51 = vld [vmem:[%s19070_s26 + $0x50] sm:$0xff] }
 0x918   : > { %v13989_v14 = vadd.f32 %v13981_v28, %v13973_v9  ;;  %v14011_v24 = vmul.f32 %v18113_v17, %v16915_v4  ;;  %v12351_v30 = vsub.f32 %v21144_v62, %v12325_v49  ;;  %v13886_v37 = vmul.f32 %v18116_v3, %v21194_v45  ;;  %v18123_v9 = vld [vmem:[%s19070_s26 + $0x40] sm:$0xff]  ;;  %v18126_v59 = vld [vmem:[%s19072_s9 + $0x50] sm:$0xff] }
 0x919   : > { %v13908_v20 = vsel %vm908_vm0, %v13895_v26, 0.0  ;;  %v13946_v43 = vsel %vm908_vm0, %v13933_v52, 0.0  ;;  %v13916_v0 = vmul.f32 %v18115_v35, %v21194_v45  ;;  %v13980_v13 = vmul.f32 %v18118_v60, %v21194_v45  ;;  %v18124_v49 = vld [vmem:[%s19072_s9 + $0x40] sm:$0xff] }
 0x91a   : > { %v13909_v47 = vadd.f32 %v13908_v20, %v13907_v56  ;;  %v13947_v8 = vadd.f32 %v13946_v43, %v13945_v16  ;;  %v14002_v11 = vsel %vm908_vm0, %v13989_v14, 0.0  ;;  %v14027_v4 = vsub.f32 %v14011_v24, %v21192_v48  ;;  %v18129_v20 = vld [vmem:[%s19070_s26 + $0x78] sm:$0xff] }
 0x91b   : > { %v14003_v17 = vadd.f32 %v14002_v11, %v14001_v41  ;;  %v13880_v62 = vmul.f32 %v18123_v9, %v12351_v30  ;;  %v13926_v3 = vmul.f32 %v18124_v49, %v12351_v30  ;;  %v13974_v28 = vmul.f32 %v18125_v51, %v12351_v30 }
 0x91c   : > { %v14040_v27 = vsel %vm908_vm0, %v14027_v4, 0.0  ;;  %v21254_v26 = vmul.f32 %v18126_v59, %v12351_v30  ;;  %v13894_v35 = vadd.f32 %v13886_v37, %v21197_v15  ;;  %v13932_v60 = vsub.f32 %v13916_v0, %v21200_v40 }
 0x91d   : > { %v14041_v56 = vadd.f32 %v14040_v27, %v14039_v19  ;;  %v13988_v48 = vadd.f32 %v13980_v13, %v21206_v1  ;;  %v14010_v16 = vmul.f32 %v21203_v6, %v21194_v45  ;;  %v12354_v41 = vsub.f32 %v21146_v2, %v16729_v5  ;;  %v18127_v45 = vld [vmem:[%s19070_s26 + $0x68] sm:$0xff] }
 0x91e   : > { %v13901_v52 = vsel %vm908_vm0, %v13894_v35, 0.0  ;;  %v13939_v14 = vsel %vm908_vm0, %v13932_v60, 0.0  ;;  %v13889_v24 = vmul.f32 %v18120_v57, %v21215_v53  ;;  %v13919_v15 = vmul.f32 %v18119_v38, %v21215_v53  ;;  %v18128_v6 = vld [vmem:[%s19072_s9 + $0x68] sm:$0xff]  ;;  %v18130_v57 = vld [vmem:[%s19072_s9 + $0x78] sm:$0xff] }
 0x91f   : > { %v13902_v40 = vadd.f32 %v13901_v52, %v13900_v50  ;;  %v21266_v30 = vadd.f32 %v13939_v14, %v13938_v63  ;;  %v13995_v1 = vsel %vm908_vm0, %v13988_v48, 0.0  ;;  %v14026_v19 = vsub.f32 %v14010_v16, %v21209_v42  ;;  %v18131_v52 = vld [vmem:[%s19070_s26 + $0x60] sm:$0xff] }
 0x920   : > { %v21270_v37 = vadd.f32 %v13995_v1, %v13994_v18  ;;  %v13883_v2 = vmul.f32 %v18127_v45, %v12354_v41  ;;  %v13929_v5 = vmul.f32 %v18128_v6, %v12354_v41  ;;  %v13977_v43 = vmul.f32 %v18129_v20, %v12354_v41 }
 0x921   : > { %v14033_v0 = vsel %vm908_vm0, %v14026_v19, 0.0  ;;  %v14023_v13 = vmul.f32 %v18130_v57, %v12354_v41  ;;  %v13897_v38 = vadd.f32 %v13889_v24, %v13881_v10  ;;  %v13935_v50 = vsub.f32 %v13919_v15, %v21227_v46  ;;  %v18132_v24 = vld [vmem:[%s19072_s9 + $0x60] sm:$0xff] }
 0x922   : > { %v21278_v63 = vadd.f32 %v14033_v0, %v14032_v31  ;;  %v13983_v11 = vmul.f32 %v18122_v39, %v21215_v53  ;;  %v14013_v42 = vmul.f32 %v18121_v44, %v21215_v53  ;;  %v21284_v18 = vsub.f32 %v21148_v22, %v21223_v54 }
 0x923   : > { %v13910_v4 = vsel %vm908_vm0, %v13897_v38, 0.0  ;;  %v13948_v27 = vsel %vm908_vm0, %v13935_v50, 0.0  ;;  %v13888_v35 = vmul.f32 %v18124_v49, %v21217_v32  ;;  %v13918_v10 = vmul.f32 %v18123_v9, %v21217_v32 }
 0x924   : > { %v13911_v60 = vadd.f32 %v13910_v4, %v13909_v47  ;;  %v13949_v46 = vadd.f32 %v13948_v27, %v13947_v8  ;;  %v13991_v31 = vadd.f32 %v13983_v11, %v21230_v23  ;;  %v14029_v39 = vsub.f32 %v14013_v42, %v21233_v58 }
 0x925   : > { %v13896_v48 = vadd.f32 %v13888_v35, %v13880_v62  ;;  %v13934_v53 = vsub.f32 %v13918_v10, %v13926_v3  ;;  %v13982_v44 = vmul.f32 %v18126_v59, %v21217_v32  ;;  %v14012_v22 = vmul.f32 %v18125_v51, %v21217_v32 }
 0x926   : > { %v14004_v54 = vsel %vm908_vm0, %v13991_v31, 0.0  ;;  %v14042_v49 = vsel %vm908_vm0, %v14029_v39, 0.0  ;;  %v13891_v9 = vmul.f32 %v18128_v6, %v21235_v33  ;;  %v13921_v47 = vmul.f32 %v18127_v45, %v21235_v33  ;;  %v18133_v31 = vld [vmem:[%s19070_s26 + $0x70] sm:$0xff]  ;;  %s14083_s26 = sshll.u32 %s21327_s23, 4  ;;  %s21372_s26 = int_to_ptr.vmem [resolvable:$true] %s14083_s26 }
 0x927   : > { %v14005_v8 = vadd.f32 %v14004_v54, %v14003_v17  ;;  %v14043_v23 = vadd.f32 %v14042_v49, %v14041_v56  ;;  %v13903_v58 = vsel %vm908_vm0, %v13896_v48, 0.0  ;;  %v13941_v62 = vsel %vm908_vm0, %v13934_v53, 0.0  ;;  %s18416_s30 = scalar_lea.vmem %s21372_s26, 512  ;;  %p18423_p7 = scmp.lt.s32.totalorder %s21372_s26, %s18421_s7 }
 0x928   : > { %v13990_v3 = vadd.f32 %v13982_v44, %v13974_v28  ;;  %v14028_v59 = vsub.f32 %v14012_v22, %v21254_v26  ;;  %v13899_v16 = vadd.f32 %v13891_v9, %v13883_v2  ;;  %v13937_v32 = vsub.f32 %v13921_v47, %v13929_v5  ;;  %p18417_p5 = scmp.ne.s32.totalorder %s21372_s26, %s18416_s30  ;;  %p18424_p6 = scmp.lt.s32.totalorder %s18422_s15, %s18416_s30 }
 0x929   : > { %v13985_v51 = vmul.f32 %v18130_v57, %v21235_v33  ;;  %v14015_v41 = vmul.f32 %v18129_v20, %v21235_v33  ;;  %v13882_v14 = vmul.f32 %v18131_v52, %v21284_v18  ;;  %v13890_v17 = vmul.f32 %v18132_v24, %v21239_v61 }
 0x92a   : > { %v13997_v56 = vsel %vm908_vm0, %v13990_v3, 0.0  ;;  %v14035_v15 = vsel %vm908_vm0, %v14028_v59, 0.0  ;;  %v13912_v28 = vsel %vm908_vm0, %v13899_v16, 0.0  ;;  %v13950_v26 = vsel %vm908_vm0, %v13937_v32, 0.0  ;;  %p18425_p9 = por %p18424_p6, %p18423_p7 }
 0x92b   : > { %v13913_v1 = vadd.f32 %v13912_v28, %v13911_v60  ;;  %v13951_v19 = vadd.f32 %v13950_v26, %v13949_v46  ;;  %v13993_v45 = vadd.f32 %v13985_v51, %v13977_v43  ;;  %v14031_v2 = vsub.f32 %v14015_v41, %v14023_v13 }
 0x92c   : > { %v13898_v6 = vadd.f32 %v13890_v17, %v13882_v14  ;;  %v13904_v33 = vadd.f32 %v13903_v58, %v13902_v40  ;;  %v13920_v5 = vmul.f32 %v18131_v52, %v21239_v61  ;;  %v13928_v20 = vmul.f32 %v18132_v24, %v21284_v18 }
 0x92d   : > { %v13957_v0 = vmul.f32 %v21156_v12, %v13913_v1  ;;  %v13965_v57 = vmul.f32 %v21156_v12, %v13951_v19  ;;  %v14006_v38 = vsel %vm908_vm0, %v13993_v45, 0.0  ;;  %v14044_v50 = vsel %vm908_vm0, %v14031_v2, 0.0 }
 0x92e   : > { %v14007_v11 = vadd.f32 %v14006_v38, %v14005_v8  ;;  %v14045_v43 = vadd.f32 %v14044_v50, %v14043_v23  ;;  %v13905_v13 = vsel %vm908_vm0, %v13898_v6, 0.0  ;;  %v13936_v40 = vsub.f32 %v13920_v5, %v13928_v20 }
 0x92f   : > { %v13959_v42 = vadd.f32 %v13957_v0, %v21154_v36  ;;  %v13967_v4 = vadd.f32 %v13965_v57, %v21160_v34  ;;  %v13906_v27 = vadd.f32 %v13905_v13, %v13904_v33  ;;  %v13942_v35 = vadd.f32 %v13941_v62, %v21266_v30  ;;  %v18134_v30 = vld [vmem:[%s19072_s9 + $0x70] sm:$0xff]  ;;  %s21751_s9 = sld [smem:[#allocation37_spill]] }
 0x930   : > { %v14049_v10 = vmul.f32 %v14007_v11, %v21156_v12  ;;  %v14058_v60 = vmul.f32 %v14045_v43, %v21156_v12  ;;  %v13943_v46 = vsel %vm908_vm0, %v13936_v40, 0.0  ;;  %v13976_v39 = vmul.f32 %v18133_v31, %v21284_v18  ;;  %v18136_v62 = vld [vmem:[%s19063_s22 + $0x10] sm:$0xff] }
 0x931   : > { %13961 = vst.msk [vmem:[%s21327_s23 + $0x8] sm:$0xff] %vm908_vm0, %v13959_v42  ;;  %13969 = vst.msk [vmem:[%s21332_s19 + $0x8] sm:$0xff] %vm908_vm0, %v13967_v4  ;;  %v13944_v36 = vadd.f32 %v13943_v46, %v13942_v35  ;;  %v13956_v34 = vmul.f32 %v21156_v12, %v13906_v27  ;;  %v13984_v48 = vmul.f32 %v18134_v30, %v21239_v61 }
 0x932   : > { %v13998_v53 = vadd.f32 %v13997_v56, %v21270_v37  ;;  %v14051_v44 = vadd.f32 %v14049_v10, %v21164_v25  ;;  %v14060_v22 = vadd.f32 %v14058_v60, %v21168_v55  ;;  %v14014_v54 = vmul.f32 %v18133_v31, %v21239_v61 }
 0x933   : > { %v14022_v49 = vmul.f32 %v18134_v30, %v21284_v18  ;;  %v13958_v9 = vadd.f32 %v13956_v34, %v21172_v21  ;;  %v13964_v47 = vmul.f32 %v21156_v12, %v13944_v36  ;;  %v13992_v8 = vadd.f32 %v13984_v48, %v13976_v39  ;;  %v18135_v18 = vld [vmem:[%s19055_s13 + $0x10] sm:$0xff]  ;;  %s14099_s13 = sshll.u32 %s21332_s19, 4  ;;  %s21379_s13 = int_to_ptr.vmem [resolvable:$true] %s14099_s13 }
 0x934   : > { %v14036_v23 = vadd.f32 %v14035_v15, %v21278_v63  ;;  %14406 = vst.msk [vmem:[%s21327_s23 + $0x18] sm:$0xff] %vm908_vm0, %v14051_v44  ;;  %14408 = vst.msk [vmem:[%s21332_s19 + $0x18] sm:$0xff] %vm908_vm0, %v14060_v22  ;;  %v14046_v63 = vmul.f32 %v18135_v18, %v21150_v29 }
 0x935   : > { %v14030_v25 = vsub.f32 %v14014_v54, %v14022_v49  ;;  %13960 = vst.msk [vmem:[%s21327_s23] sm:$0xff] %vm908_vm0, %v13958_v9  ;;  %v13966_v55 = vadd.f32 %v13964_v47, %v21176_v7  ;;  %v13999_v61 = vsel %vm908_vm0, %v13992_v8, 0.0  ;;  %v14055_v7 = vmul.f32 %v18136_v62, %v21150_v29  ;;  %p21754_p3 = scmp.ne.s32.totalorder %s21751_s9, 0 }
 0x936   : > { %v14000_v21 = vadd.f32 %v13999_v61, %v13998_v53 }
 0x937   : > { %v14037_v37 = vsel %vm908_vm0, %v14030_v25, 0.0  ;;  %13968 = vst.msk [vmem:[%s21332_s19] sm:$0xff] %vm908_vm0, %v13966_v55  ;;  %p18418_p2 = pnand %p18417_p5, %p21754_p3 }
 0x938   : > { %v14038_v58 = vadd.f32 %v14037_v37, %v14036_v23  ;;  %v14048_v3 = vmul.f32 %v14000_v21, %v21156_v12 }
 0x939   : > { %p18419_p8 = pneg %p18418_p2 }
 0x93a   : > { %v14057_v59 = vmul.f32 %v14038_v58, %v21156_v12  ;;  %v14050_v16 = vadd.f32 %v14048_v3, %v14046_v63 }
 0x93b   : > { %p18426_p0 = pnand %p18425_p9, %p18419_p8 }
 0x93c   : > { %v14059_v32 = vadd.f32 %v14057_v59, %v14055_v7  ;;  %14405 = vst.msk [vmem:[%s21327_s23 + $0x10] sm:$0xff] %vm908_vm0, %v14050_v16 }
 0x93e   : > { %14407 = vst.msk [vmem:[%s21332_s19 + $0x10] sm:$0xff] %vm908_vm0, %v14059_v32 }
 0x93f   : > { %18429 = shalt.err (!%p18426_p0)
}
 0x940   : > { %s18430_s25 = scalar_lea.hbm %s21368_s27, 512  ;;  %s18434_s19 = scalar_lea.hbm %s21752_s16, 1024 }
 0x941   : > { %p18431_p12 = scmp.ne.s32.totalorder %s21368_s27, %s18430_s25  ;;  %p18435_p10 = scmp.lt.u32.totalorder %s21368_s27, %s21752_s16 }
 0x942   : > { %p18436_p11 = scmp.lt.u32.totalorder %s18434_s19, %s18430_s25  ;;  %p18438_p5 = scmp.lt.u32.totalorder %s18430_s25, %s21368_s27 }
 0x943   : > { %p18432_p13 = pnand %p18431_p12, %p21754_p3 }
 0x944   : > { %p18437_p4 = por %p18436_p11, %p18435_p10 }
 0x945   : > { %p18433_p1 = pneg %p18432_p13 }
 0x946   : > { %p18439_p2 = por %p18438_p5, %p18437_p4 }
 0x948   : > { %p18440_p8 = pnand %p18439_p2, %p18433_p1 }
 0x94a   : > { %18443 = shalt.err (!%p18440_p8)
}
 0x94b   : > { %s18549_s10 = smov 128   ;;  %s18550_s22 = smov 8  }
 0x94c   : > { %18004 = dma.vmem_to_hbm [thread:$0]  (%p21754_p3), %s21372_s26, 512, %s21368_s27, %s14065_s14, %s18549_s10, %s18549_s10, %s18550_s22  }
 0x94d   : > { %s14070_s12 = scalar_lea.sflag [#allocation21], %s19048_s17  ;;  %s18444_s30 = scalar_lea.vmem %s21379_s13, 512 }
 0x94e   : > { %p18445_p7 = scmp.ne.s32.totalorder %s21379_s13, %s18444_s30  ;;  %s18551_s4 = smov [#allocation20]  }
 0x94f   : > { %s18448_s7 = sshll.u32 %s18551_s4, 4  ;;  %s18449_s7 = int_to_ptr.vmem [resolvable:$false] %s18448_s7 }
 0x950   : > { %p18446_p6 = pnand %p18445_p7, %p21754_p3  ;;  %s18450_s15 = scalar_lea.vmem %s18449_s7, 1024 }
 0x951   : > { %p18451_p0 = scmp.lt.s32.totalorder %s21379_s13, %s18449_s7  ;;  %p18452_p12 = scmp.lt.s32.totalorder %s18450_s15, %s18444_s30 }
 0x952   : > { %p18447_p9 = pneg %p18446_p6 }
 0x953   : > { %p18453_p13 = por %p18452_p12, %p18451_p0 }
 0x955   : > { %p18454_p1 = pnand %p18453_p13, %p18447_p9 }
 0x957   : > { %18457 = shalt.err (!%p18454_p1)
}
 0x958   : > { %s18458_s26 = scalar_lea.hbm %s21377_s20, 512  ;;  %s18462_s25 = scalar_lea.hbm %s21753_s29, 1024 }
 0x959   : > { %p18459_p10 = scmp.ne.s32.totalorder %s21377_s20, %s18458_s26  ;;  %p18463_p5 = scmp.lt.u32.totalorder %s21377_s20, %s21753_s29 }
 0x95a   : > { %p18464_p2 = scmp.lt.u32.totalorder %s18462_s25, %s18458_s26  ;;  %p18466_p7 = scmp.lt.u32.totalorder %s18458_s26, %s21377_s20 }
 0x95b   : > { %p18460_p11 = pnand %p18459_p10, %p21754_p3 }
 0x95c   : > { %p18465_p8 = por %p18464_p2, %p18463_p5 }
 0x95d   : > { %p18461_p4 = pneg %p18460_p11 }
 0x95e   : > { %p18467_p6 = por %p18466_p7, %p18465_p8 }
 0x960   : > { %p18468_p9 = pnand %p18467_p6, %p18461_p4 }
 0x962   : > { %18471 = shalt.err (!%p18468_p9)
}
 0x963   : > { %18005 = dma.vmem_to_hbm [thread:$0]  (%p21754_p3), %s21379_s13, 512, %s21377_s20, %s14070_s12, %s18549_s10, %s18549_s10, %s18550_s22  }
 0x964 PF: > { %s21755_s19 = sld [smem:[#allocation30_spill]]  ;;  %s21756_s24 = sld [smem:[#allocation38_spill]] }
 0x965   : > { %p21758_p12 = scmp.ge.s32.totalorder %s18534_s28, 2 }
 0x96a   : > { %s14114_s2 = sand.u32 1, %s21755_s19   ;;  %p21757_p0 = scmp.ne.s32.totalorder %s21756_s24, 0 }
 0x96b   : > { %s14115_s30 = scalar_lea.sflag [#allocation4], %s14114_s2 }
 0x96c   : > { %p18041_p13 = pnand %p21758_p12, %p21757_p0 }
 0x96e   : > { %18513 = dma.done.wait (!%p18041_p13), %s14115_s30, 512  }
 0x96f   : > { %18515 = vsyncadd (!%p18041_p13), %s14115_s30, 4294966784  ;;  %s14124_s9 = scalar_lea.sflag [#allocation21], %s14114_s2 }
 0x970   : > { %18517 = dma.done.wait (!%p18041_p13), %s14124_s9, 512  }
 0x971   : > { %18519 = vsyncadd (!%p18041_p13), %s14124_s9, 4294966784  ;;  %s21759_s28 = sld [smem:[#allocation34_spill]]  ;;  %s21760_s25 = sld [smem:[#allocation31_spill]] }
 0x972   : > { %s21761_s26 = sld [smem:[#allocation32_spill]]  ;;  %s21762_s27 = sld [smem:[#allocation35_spill]] }
 0x977   : > { %p41_p3 = scmp.ge.s32.totalorder %s21759_s28, 4  }
 0x979   :  { %43 = sbr.rel (!%p41_p3) target bundleno = 25 (0x19), region = 217 }
 0x980   :  { %14129 = vsyncpa [#allocation3], 1 }
 0x981   :  { %14131 = vsyncpa [#allocation3 + $0x1], 1 }
 0x982   :  { %14132 = vsyncpa [#allocation8], 1 }
 0x983   :  { %14134 = vsyncpa [#allocation8 + $0x1], 1 }
 0x984   :  { %14135 = vsyncpa [#allocation11], 1 }
 0x985   :  { %14137 = vsyncpa [#allocation11 + $0x1], 1 }
 0x986   :  { %14138 = vsyncpa [#allocation14], 1 }
 0x987   :  { %14140 = vsyncpa [#allocation14 + $0x1], 1 }
 0x988   :  { %14141 = vsyncpa [#allocation17], 1 }
 0x989   :  { %14142 = vsyncpa [#allocation4], 1 }
 0x98a   :  { %14144 = vsyncpa [#allocation4 + $0x1], 1 }
 0x98b   :  { %14145 = vsyncpa [#allocation21], 1 }
 0x98c   :  { %14147 = vsyncpa [#allocation21 + $0x1], 1 }
 0x98d   :  { %14148 = vsyncpa [#allocation5], 1 }
 0x98e   :  { %14150 = vsyncpa [#allocation5 + $0x1], 1 }

</bundles_post_ra>
